<compile_context>
chip_gen: v7x
topology: tpu7x:2x2x1
jax: 0.10.0
libtpu: 0.0.40
codegen_flags: <defaults>
</compile_context>

<pallas_src>
import functools

import jax
import jax.numpy as jnp
import numpy as np
from jax import lax
from jax.experimental import pallas as pl
from jax.experimental.pallas import tpu as pltpu


# Deterministic stand-in for `(random.random() > 0.5) * 2 - 1` chosen at
# __init__ in the PyTorch module.  Both directions are validated in __main__.
SHIFT_DIRECTION = 1


# ---------------------------------------------------------------------------
# Kernel body.
# ---------------------------------------------------------------------------
def _fused_kernel(x_ref, w_ref, o_ref, xp_ref, xs_ref, rp_ref, *,
                  N, C, J, KH, PAD, shift, LB):
    """One grid step processes LB batch elements, everything resident in VMEM.

    x_ref : (LB, J, S)      f32, S = M*N flattened spatial (lane-dense)
    w_ref : (2C, KH*J)      bf16 collapsed tap weights (constant block)
    o_ref : (LB, C, S)      f32
    xp_ref: (J, S + 2*PAD)  f32 padded copy of x  (stencil taps = static slices)
    xs_ref: (KH*J, S)       bf16 stacked matmul operand
    rp_ref: (C, S + 2*N)    f32 padded copy of the conv result that gets rolled
    """
    S = o_ref.shape[-1]

    # Position n inside each length-N row along the flattened (m, n) lane axis.
    npos = lax.broadcasted_iota(jnp.int32, (1, S), 1) % N

    # Per-tap row-boundary masks, hoisted: computed once per grid step.
    keeps = {}
    for kh in range(KH):
        d = kh - PAD
        if d != 0:
            keeps[kh] = jnp.logical_and(npos + d >= 0, npos + d < N)

    w = w_ref[...]                                      # (2C, KH*J) bf16

    for li in range(LB):
        x = x_ref[li]                                   # (J, S) f32

        # Padded copy of x so every stencil tap is a static lane slice.  The
        # pad columns are never *selected* (keeps masks kill them), so they
        # are left uninitialised — no zeroing stores.
        xp_ref[:, PAD:PAD + S] = x
        for kh in range(KH):
            d = kh - PAD
            if d == 0:
                xw = x
            else:
                xs = xp_ref[:, PAD + d:PAD + d + S]     # x[., p + d]
                xw = jnp.where(keeps[kh], xs, 0.0)      # kill cross-row taps
            xs_ref[kh * J:(kh + 1) * J, :] = xw.astype(xs_ref.dtype)

        # ONE fused MXU matmul over all taps and both w2 slices:
        #   (2C, KH*J) @ (KH*J, S) -> (2C, S), bf16 operands, f32 accumulate.
        acc = jnp.dot(w, xs_ref[...], preferred_element_type=jnp.float32)
        a = acc[:C, :]                                  # conv with w2[:, 0, :]
        b = acc[C:, :]                                  # conv with w2[:, 1, :]

        # Circular roll over n (per m row) of the slice that moves, done with
        # a padded scratch + static slices.  Pad columns again never selected.
        moving = b if shift == 1 else a
        base = a if shift == 1 else b
        rp_ref[:, N:N + S] = moving
        if shift == 1:
            r_main = rp_ref[:, N - 1:N - 1 + S]          # moving[p - 1]
            r_wrap = rp_ref[:, 2 * N - 1:2 * N - 1 + S]  # moving[p + N - 1]
            rolled = jnp.where(npos == 0, r_wrap, r_main)
        else:
            r_main = rp_ref[:, N + 1:N + 1 + S]          # moving[p + 1]
            r_wrap = rp_ref[:, 1:1 + S]                  # moving[p - (N - 1)]
            rolled = jnp.where(npos == N - 1, r_wrap, r_main)

        o_ref[li] = base + rolled


# ---------------------------------------------------------------------------
# Weight collapse (outside the kernel, f32 HIGHEST, then cast to bf16).
# ---------------------------------------------------------------------------
def _build_tap_weights(w1, w2):
    """Collapse w1 (C,KH,I) and w2 (J,2,I) into one (2C, KH*J) tap matrix."""
    hp = lax.Precision.HIGHEST
    C, KH, _ = w1.shape
    J = w2.shape[0]
    wa = jnp.einsum("cki,ji->ckj", w1, w2[:, 0, :], precision=hp)  # (C, KH, J)
    wb = jnp.einsum("cki,ji->ckj", w1, w2[:, 1, :], precision=hp)  # (C, KH, J)
    return jnp.concatenate(
        [wa.reshape(C, KH * J), wb.reshape(C, KH * J)], axis=0)    # (2C, KH*J)


# ---------------------------------------------------------------------------
# Wrapper.
# ---------------------------------------------------------------------------
@functools.partial(jax.jit, static_argnames=("shift", "l_block", "vmem_cap_mb"))
def _forward(x, w1, w2, shift, l_block, vmem_cap_mb):
    L, J, M, N = x.shape
    C, KH, I = w1.shape            # (192, 9, 14)
    J2, K, I2 = w2.shape           # (48, 2, 14)
    assert J == J2 and I == I2 and K == 2 and shift in (1, -1)
    assert L % l_block == 0
    PAD = (KH - 1) // 2
    S = M * N
    KJ = KH * J

    w_taps = _build_tap_weights(w1, w2).astype(jnp.bfloat16)       # (2C, KJ)
    xf = x.astype(jnp.float32).reshape(L, J, S)    # free reshape (contig dims)

    kern = functools.partial(_fused_kernel, N=N, C=C, J=J, KH=KH, PAD=PAD,
                             shift=shift, LB=l_block)

    # Rough per-step VMEM need: double-buffered x/out blocks + weights +
    # explicit scratch + compiler temporaries (matmul acc, roll/select temps).
    need = (2 * l_block * J * S * 4
            + 2 * l_block * C * S * 4
            + 2 * 2 * C * KJ * 2
            + J * (S + 2 * PAD) * 4
            + KJ * S * 2
            + C * (S + 2 * N) * 4
            + 5 * 2 * C * S * 4)
    vmem_limit = int(min(vmem_cap_mb << 20, need + (8 << 20)))

    flops = 2 * L * (2 * C) * KJ * S
    bytes_accessed = 4 * L * J * S + 4 * L * C * S + 2 * 2 * C * KJ

    y = pl.pallas_call(
        kern,
        out_shape=jax.ShapeDtypeStruct((L, C, S), jnp.float32),
        grid=(L // l_block,),
        in_specs=[
            pl.BlockSpec((l_block, J, S), lambda l: (l, 0, 0)),
            pl.BlockSpec((2 * C, KJ), lambda l: (0, 0)),           # fetched once
        ],
        out_specs=pl.BlockSpec((l_block, C, S), lambda l: (l, 0, 0)),
        scratch_shapes=[
            pltpu.VMEM((J, S + 2 * PAD), jnp.float32),   # padded x copy
            pltpu.VMEM((KJ, S), jnp.bfloat16),           # stacked matmul operand
            pltpu.VMEM((C, S + 2 * N), jnp.float32),     # padded roll buffer
        ],
        compiler_params=pltpu.CompilerParams(
            dimension_semantics=("parallel",),
            vmem_limit_bytes=vmem_limit,
        ),
        cost_estimate=pl.CostEstimate(
            flops=flops, transcendentals=0, bytes_accessed=bytes_accessed
        ),
    )(xf, w_taps)

    return y.reshape(L, C, M, N)   # free reshape back to NCHW


def _pick_schedule(L):
    """Batch block + VMEM cap per TPU generation (v7x has 64 MiB VMEM/core)."""
    try:
        kind = jax.devices()[0].device_kind.lower()
    except Exception:
        kind = ""
    is_v7 = "7" in kind
    target = 2 if is_v7 else 4
    l_block = 1
    for t in range(min(target, L), 0, -1):
        if L % t == 0:
            l_block = t
            break
    return l_block, (40 if is_v7 else 64)


def kernel_generated_2_forward(x, w1, w2, shift=SHIFT_DIRECTION):
    l_block, cap_mb = _pick_schedule(x.shape[0])
    return _forward(x, w1, w2, shift=shift, l_block=l_block, vmem_cap_mb=cap_mb)


# ---------------------------------------------------------------------------
# Literal pure-JAX reference mirroring the PyTorch ops (for self-check).
# ---------------------------------------------------------------------------
def reference_forward(x, w1, w2, shift=SHIFT_DIRECTION):
    L, J, M, N = x.shape
    C_out, KH, I = w1.shape
    _, K, _ = w2.shape
    hp = lax.Precision.HIGHEST
    t3 = jnp.einsum("ljmn,jki->lmnki", x, w2, precision=hp)
    t4 = t3.reshape(L, M, N, K * I)
    pad = (KH - 1) // 2
    t4p = jnp.pad(t4, ((0, 0), (0, 0), (pad, pad), (0, 0)))
    u = jnp.stack([t4p[:, :, kh:kh + N, :] for kh in range(KH)], axis=2)
    u = u.reshape(L, M, KH, N * K, I)
    u = jnp.roll(u, shift, axis=3)
    u = u.reshape(L, M, KH, N, K, I)
    s = u.sum(axis=4)
    y = jnp.einsum("lmjni,kji->lkmn", s, w1, precision=hp)
    return y


if __name__ == "__main__":
    key = jax.random.PRNGKey(0)
    k_x, k_w1, k_w2, k_x2 = jax.random.split(key, 4)

    # Weight shapes come straight from the module's __init__.
    w1 = jax.random.normal(k_w1, (192, 9, 14), dtype=jnp.float32)
    w2 = jax.random.normal(k_w2, (48, 2, 14), dtype=jnp.float32)

    # Small input consistent with the module: (L, J=48, M, N).
    # (Reference full size would be (128, 48, 56, 56).)
    x = jax.random.normal(k_x, (2, 48, 8, 16), dtype=jnp.float32)

    def check(y, y_ref):
        y = np.asarray(y)
        y_ref = np.asarray(y_ref)
        # bf16 MXU operands (f32 accumulate): per-element error is
        # O(sqrt(#terms) * |w*x| * 2^-9) ~ 0.2 abs on |y| ~ 1e2, relative
        # L2 error ~ 2e-3.  Structural errors would be O(1e2) per element
        # and O(1) in relative norm, far above these bounds.
        np.testing.assert_allclose(y, y_ref, rtol=2e-2, atol=2.0)
        rel = float(np.linalg.norm(y - y_ref) / np.linalg.norm(y_ref))
        assert rel < 5e-3, f"relative L2 error too large: {rel}"

    for shift in (1, -1):
        y = jax.block_until_ready(kernel_generated_2_forward(x, w1, w2, shift=shift))
        assert y.shape == (2, 192, 8, 16), y.shape
        check(y, reference_forward(x, w1, w2, shift=shift))

    # Second shape whose flattened spatial (4*56=224) is not a multiple of 128,
    # exercising the masked-lane path used by the reference 56x56 spatial.
    x2 = jax.random.normal(k_x2, (1, 48, 4, 56), dtype=jnp.float32)
    y2 = jax.block_until_ready(kernel_generated_2_forward(x2, w1, w2, shift=1))
    check(y2, reference_forward(x2, w1, w2, shift=1))

    # TODO(synk): SHIFT_DIRECTION stands in for the module's random +-1 picked
    # at __init__; instantiate with the deployed module's actual sign.
    print("KERNEL_OK")
</pallas_src>

<mosaic_0001>
module attributes {stable_mosaic.version = 11 : i64} {
  func.func @_fused_kernel(%arg0: i32, %arg1: memref<2x48x128xf32, #tpu.memory_space<vmem>>, %arg2: memref<384x432xbf16, #tpu.memory_space<vmem>>, %arg3: memref<2x192x128xf32, #tpu.memory_space<vmem>>, %arg4: memref<48x136xf32, #tpu.memory_space<vmem>>, %arg5: memref<432x128xbf16, #tpu.memory_space<vmem>>, %arg6: memref<192x160xf32, #tpu.memory_space<vmem>>) attributes {dimension_semantics = [#tpu.dimension_semantics<parallel>], iteration_bounds = array<i64: 1>, scalar_prefetch = 0 : i64, scratch_operands = 3 : i64, tpu.core_type = #tpu.core_type<tc>, window_params = [{transform_indices = @transform_0, window_bounds = array<i64: 2, 48, 128>}, {pipeline_mode = #tpu.pipeline_mode<synchronous>, transform_indices = @transform_1, window_bounds = array<i64: 384, 432>}, {transform_indices = @transform_2, window_bounds = array<i64: 2, 192, 128>}]} {
    %0 = tpu.iota {dimensions = array<i32: 1>} : vector<1x128xi32>
    %c16_i32 = arith.constant 16 : i32
    %c0_i32 = arith.constant 0 : i32
    %1 = arith.cmpi eq, %c16_i32, %c0_i32 : i32
    %c1_i32 = arith.constant 1 : i32
    %2 = arith.select %1, %c1_i32, %c16_i32 : i32
    %3 = vector.broadcast %2 : i32 to vector<1x128xi32>
    %4 = arith.remsi %0, %3 : vector<1x128xi32>
    %c0_i32_0 = arith.constant 0 : i32
    %5 = vector.broadcast %c0_i32_0 : i32 to vector<1x128xi32>
    %6 = arith.cmpi ne, %4, %5 : vector<1x128xi32>
    %c0_i32_1 = arith.constant 0 : i32
    %7 = vector.broadcast %c0_i32_1 : i32 to vector<1x128xi32>
    %8 = arith.cmpi slt, %4, %7 : vector<1x128xi32>
    %c0_i32_2 = arith.constant 0 : i32
    %9 = arith.cmpi slt, %2, %c0_i32_2 : i32
    %10 = vector.broadcast %9 : i1 to vector<1x128xi1>
    %11 = vector.broadcast %10 : vector<1x128xi1> to vector<1x128xi1>
    %12 = arith.xori %8, %11 : vector<1x128xi1>
    %13 = arith.andi %12, %6 : vector<1x128xi1>
    %14 = vector.broadcast %2 : i32 to vector<1x128xi32>
    %15 = arith.addi %4, %14 : vector<1x128xi32>
    %16 = arith.select %13, %15, %4 : vector<1x128xi1>, vector<1x128xi32>
    %c-4_i32 = arith.constant -4 : i32
    %17 = vector.broadcast %c-4_i32 : i32 to vector<1x128xi32>
    %18 = arith.addi %16, %17 : vector<1x128xi32>
    %c0_i32_3 = arith.constant 0 : i32
    %19 = vector.broadcast %c0_i32_3 : i32 to vector<1x128xi32>
    %20 = arith.cmpi sge, %18, %19 : vector<1x128xi32>
    %c-4_i32_4 = arith.constant -4 : i32
    %21 = vector.broadcast %c-4_i32_4 : i32 to vector<1x128xi32>
    %22 = arith.addi %16, %21 : vector<1x128xi32>
    %c16_i32_5 = arith.constant 16 : i32
    %23 = vector.broadcast %c16_i32_5 : i32 to vector<1x128xi32>
    %24 = arith.cmpi slt, %22, %23 : vector<1x128xi32>
    %25 = arith.andi %20, %24 : vector<1x128xi1>
    %c-3_i32 = arith.constant -3 : i32
    %26 = vector.broadcast %c-3_i32 : i32 to vector<1x128xi32>
    %27 = arith.addi %16, %26 : vector<1x128xi32>
    %c0_i32_6 = arith.constant 0 : i32
    %28 = vector.broadcast %c0_i32_6 : i32 to vector<1x128xi32>
    %29 = arith.cmpi sge, %27, %28 : vector<1x128xi32>
    %c-3_i32_7 = arith.constant -3 : i32
    %30 = vector.broadcast %c-3_i32_7 : i32 to vector<1x128xi32>
    %31 = arith.addi %16, %30 : vector<1x128xi32>
    %c16_i32_8 = arith.constant 16 : i32
    %32 = vector.broadcast %c16_i32_8 : i32 to vector<1x128xi32>
    %33 = arith.cmpi slt, %31, %32 : vector<1x128xi32>
    %34 = arith.andi %29, %33 : vector<1x128xi1>
    %c-2_i32 = arith.constant -2 : i32
    %35 = vector.broadcast %c-2_i32 : i32 to vector<1x128xi32>
    %36 = arith.addi %16, %35 : vector<1x128xi32>
    %c0_i32_9 = arith.constant 0 : i32
    %37 = vector.broadcast %c0_i32_9 : i32 to vector<1x128xi32>
    %38 = arith.cmpi sge, %36, %37 : vector<1x128xi32>
    %c-2_i32_10 = arith.constant -2 : i32
    %39 = vector.broadcast %c-2_i32_10 : i32 to vector<1x128xi32>
    %40 = arith.addi %16, %39 : vector<1x128xi32>
    %c16_i32_11 = arith.constant 16 : i32
    %41 = vector.broadcast %c16_i32_11 : i32 to vector<1x128xi32>
    %42 = arith.cmpi slt, %40, %41 : vector<1x128xi32>
    %43 = arith.andi %38, %42 : vector<1x128xi1>
    %c-1_i32 = arith.constant -1 : i32
    %44 = vector.broadcast %c-1_i32 : i32 to vector<1x128xi32>
    %45 = arith.addi %16, %44 : vector<1x128xi32>
    %c0_i32_12 = arith.constant 0 : i32
    %46 = vector.broadcast %c0_i32_12 : i32 to vector<1x128xi32>
    %47 = arith.cmpi sge, %45, %46 : vector<1x128xi32>
    %c-1_i32_13 = arith.constant -1 : i32
    %48 = vector.broadcast %c-1_i32_13 : i32 to vector<1x128xi32>
    %49 = arith.addi %16, %48 : vector<1x128xi32>
    %c16_i32_14 = arith.constant 16 : i32
    %50 = vector.broadcast %c16_i32_14 : i32 to vector<1x128xi32>
    %51 = arith.cmpi slt, %49, %50 : vector<1x128xi32>
    %52 = arith.andi %47, %51 : vector<1x128xi1>
    %c1_i32_15 = arith.constant 1 : i32
    %53 = vector.broadcast %c1_i32_15 : i32 to vector<1x128xi32>
    %54 = arith.addi %16, %53 : vector<1x128xi32>
    %c0_i32_16 = arith.constant 0 : i32
    %55 = vector.broadcast %c0_i32_16 : i32 to vector<1x128xi32>
    %56 = arith.cmpi sge, %54, %55 : vector<1x128xi32>
    %c1_i32_17 = arith.constant 1 : i32
    %57 = vector.broadcast %c1_i32_17 : i32 to vector<1x128xi32>
    %58 = arith.addi %16, %57 : vector<1x128xi32>
    %c16_i32_18 = arith.constant 16 : i32
    %59 = vector.broadcast %c16_i32_18 : i32 to vector<1x128xi32>
    %60 = arith.cmpi slt, %58, %59 : vector<1x128xi32>
    %61 = arith.andi %56, %60 : vector<1x128xi1>
    %c2_i32 = arith.constant 2 : i32
    %62 = vector.broadcast %c2_i32 : i32 to vector<1x128xi32>
    %63 = arith.addi %16, %62 : vector<1x128xi32>
    %c0_i32_19 = arith.constant 0 : i32
    %64 = vector.broadcast %c0_i32_19 : i32 to vector<1x128xi32>
    %65 = arith.cmpi sge, %63, %64 : vector<1x128xi32>
    %c2_i32_20 = arith.constant 2 : i32
    %66 = vector.broadcast %c2_i32_20 : i32 to vector<1x128xi32>
    %67 = arith.addi %16, %66 : vector<1x128xi32>
    %c16_i32_21 = arith.constant 16 : i32
    %68 = vector.broadcast %c16_i32_21 : i32 to vector<1x128xi32>
    %69 = arith.cmpi slt, %67, %68 : vector<1x128xi32>
    %70 = arith.andi %65, %69 : vector<1x128xi1>
    %c3_i32 = arith.constant 3 : i32
    %71 = vector.broadcast %c3_i32 : i32 to vector<1x128xi32>
    %72 = arith.addi %16, %71 : vector<1x128xi32>
    %c0_i32_22 = arith.constant 0 : i32
    %73 = vector.broadcast %c0_i32_22 : i32 to vector<1x128xi32>
    %74 = arith.cmpi sge, %72, %73 : vector<1x128xi32>
    %c3_i32_23 = arith.constant 3 : i32
    %75 = vector.broadcast %c3_i32_23 : i32 to vector<1x128xi32>
    %76 = arith.addi %16, %75 : vector<1x128xi32>
    %c16_i32_24 = arith.constant 16 : i32
    %77 = vector.broadcast %c16_i32_24 : i32 to vector<1x128xi32>
    %78 = arith.cmpi slt, %76, %77 : vector<1x128xi32>
    %79 = arith.andi %74, %78 : vector<1x128xi1>
    %c4_i32 = arith.constant 4 : i32
    %80 = vector.broadcast %c4_i32 : i32 to vector<1x128xi32>
    %81 = arith.addi %16, %80 : vector<1x128xi32>
    %c0_i32_25 = arith.constant 0 : i32
    %82 = vector.broadcast %c0_i32_25 : i32 to vector<1x128xi32>
    %83 = arith.cmpi sge, %81, %82 : vector<1x128xi32>
    %c4_i32_26 = arith.constant 4 : i32
    %84 = vector.broadcast %c4_i32_26 : i32 to vector<1x128xi32>
    %85 = arith.addi %16, %84 : vector<1x128xi32>
    %c16_i32_27 = arith.constant 16 : i32
    %86 = vector.broadcast %c16_i32_27 : i32 to vector<1x128xi32>
    %87 = arith.cmpi slt, %85, %86 : vector<1x128xi32>
    %88 = arith.andi %83, %87 : vector<1x128xi1>
    %c0 = arith.constant 0 : index
    %c0_28 = arith.constant 0 : index
    %89 = vector.load %arg2[%c0, %c0_28] : memref<384x432xbf16, #tpu.memory_space<vmem>>, vector<384x432xbf16>
    %c0_29 = arith.constant 0 : index
    %c0_30 = arith.constant 0 : index
    %c0_31 = arith.constant 0 : index
    %90 = vector.load %arg1[%c0_29, %c0_30, %c0_31] : memref<2x48x128xf32, #tpu.memory_space<vmem>>, vector<1x48x128xf32>
    %91 = vector.shape_cast %90 : vector<1x48x128xf32> to vector<48x128xf32>
    %c0_32 = arith.constant 0 : index
    %c4 = arith.constant 4 : index
    %92 = vector.load %arg4[%c0_32, %c4] : memref<48x136xf32, #tpu.memory_space<vmem>>, vector<48x128xf32>
    tpu.vector_store %arg4[%c0_32, %c4], %91 {strides = array<i32>} : memref<48x136xf32, #tpu.memory_space<vmem>>, vector<48x128xf32>,
    %c0_33 = arith.constant 0 : index
    %c0_34 = arith.constant 0 : index
    %93 = vector.load %arg4[%c0_33, %c0_34] : memref<48x136xf32, #tpu.memory_space<vmem>>, vector<48x128xf32>
    %cst = arith.constant 0.000000e+00 : f32
    %94 = vector.shape_cast %25 : vector<1x128xi1> to vector<1x128xi1>
    %95 = vector.broadcast %94 : vector<1x128xi1> to vector<48x128xi1>
    %96 = vector.broadcast %cst : f32 to vector<48x128xf32>
    %97 = arith.select %95, %93, %96 : vector<48x128xi1>, vector<48x128xf32>
    %98 = arith.truncf %97 : vector<48x128xf32> to vector<48x128xbf16>
    %c0_35 = arith.constant 0 : index
    %c0_36 = arith.constant 0 : index
    %99 = vector.load %arg5[%c0_35, %c0_36] : memref<432x128xbf16, #tpu.memory_space<vmem>>, vector<48x128xbf16>
    tpu.vector_store %arg5[%c0_35, %c0_36], %98 {strides = array<i32>} : memref<432x128xbf16, #tpu.memory_space<vmem>>, vector<48x128xbf16>,
    %c0_37 = arith.constant 0 : index
    %c1 = arith.constant 1 : index
    %100 = vector.load %arg4[%c0_37, %c1] : memref<48x136xf32, #tpu.memory_space<vmem>>, vector<48x128xf32>
    %cst_38 = arith.constant 0.000000e+00 : f32
    %101 = vector.shape_cast %34 : vector<1x128xi1> to vector<1x128xi1>
    %102 = vector.broadcast %101 : vector<1x128xi1> to vector<48x128xi1>
    %103 = vector.broadcast %cst_38 : f32 to vector<48x128xf32>
    %104 = arith.select %102, %100, %103 : vector<48x128xi1>, vector<48x128xf32>
    %105 = arith.truncf %104 : vector<48x128xf32> to vector<48x128xbf16>
    %c48 = arith.constant 48 : index
    %c0_39 = arith.constant 0 : index
    %106 = vector.load %arg5[%c48, %c0_39] : memref<432x128xbf16, #tpu.memory_space<vmem>>, vector<48x128xbf16>
    tpu.vector_store %arg5[%c48, %c0_39], %105 {strides = array<i32>} : memref<432x128xbf16, #tpu.memory_space<vmem>>, vector<48x128xbf16>,
    %c0_40 = arith.constant 0 : index
    %c2 = arith.constant 2 : index
    %107 = vector.load %arg4[%c0_40, %c2] : memref<48x136xf32, #tpu.memory_space<vmem>>, vector<48x128xf32>
    %cst_41 = arith.constant 0.000000e+00 : f32
    %108 = vector.shape_cast %43 : vector<1x128xi1> to vector<1x128xi1>
    %109 = vector.broadcast %108 : vector<1x128xi1> to vector<48x128xi1>
    %110 = vector.broadcast %cst_41 : f32 to vector<48x128xf32>
    %111 = arith.select %109, %107, %110 : vector<48x128xi1>, vector<48x128xf32>
    %112 = arith.truncf %111 : vector<48x128xf32> to vector<48x128xbf16>
    %c96 = arith.constant 96 : index
    %c0_42 = arith.constant 0 : index
    %113 = vector.load %arg5[%c96, %c0_42] : memref<432x128xbf16, #tpu.memory_space<vmem>>, vector<48x128xbf16>
    tpu.vector_store %arg5[%c96, %c0_42], %112 {strides = array<i32>} : memref<432x128xbf16, #tpu.memory_space<vmem>>, vector<48x128xbf16>,
    %c0_43 = arith.constant 0 : index
    %c3 = arith.constant 3 : index
    %114 = vector.load %arg4[%c0_43, %c3] : memref<48x136xf32, #tpu.memory_space<vmem>>, vector<48x128xf32>
    %cst_44 = arith.constant 0.000000e+00 : f32
    %115 = vector.shape_cast %52 : vector<1x128xi1> to vector<1x128xi1>
    %116 = vector.broadcast %115 : vector<1x128xi1> to vector<48x128xi1>
    %117 = vector.broadcast %cst_44 : f32 to vector<48x128xf32>
    %118 = arith.select %116, %114, %117 : vector<48x128xi1>, vector<48x128xf32>
    %119 = arith.truncf %118 : vector<48x128xf32> to vector<48x128xbf16>
    %c144 = arith.constant 144 : index
    %c0_45 = arith.constant 0 : index
    %120 = vector.load %arg5[%c144, %c0_45] : memref<432x128xbf16, #tpu.memory_space<vmem>>, vector<48x128xbf16>
    tpu.vector_store %arg5[%c144, %c0_45], %119 {strides = array<i32>} : memref<432x128xbf16, #tpu.memory_space<vmem>>, vector<48x128xbf16>,
    %121 = arith.truncf %91 : vector<48x128xf32> to vector<48x128xbf16>
    %c192 = arith.constant 192 : index
    %c0_46 = arith.constant 0 : index
    %122 = vector.load %arg5[%c192, %c0_46] : memref<432x128xbf16, #tpu.memory_space<vmem>>, vector<48x128xbf16>
    tpu.vector_store %arg5[%c192, %c0_46], %121 {strides = array<i32>} : memref<432x128xbf16, #tpu.memory_space<vmem>>, vector<48x128xbf16>,
    %c0_47 = arith.constant 0 : index
    %c5 = arith.constant 5 : index
    %123 = vector.load %arg4[%c0_47, %c5] : memref<48x136xf32, #tpu.memory_space<vmem>>, vector<48x128xf32>
    %cst_48 = arith.constant 0.000000e+00 : f32
    %124 = vector.shape_cast %61 : vector<1x128xi1> to vector<1x128xi1>
    %125 = vector.broadcast %124 : vector<1x128xi1> to vector<48x128xi1>
    %126 = vector.broadcast %cst_48 : f32 to vector<48x128xf32>
    %127 = arith.select %125, %123, %126 : vector<48x128xi1>, vector<48x128xf32>
    %128 = arith.truncf %127 : vector<48x128xf32> to vector<48x128xbf16>
    %c240 = arith.constant 240 : index
    %c0_49 = arith.constant 0 : index
    %129 = vector.load %arg5[%c240, %c0_49] : memref<432x128xbf16, #tpu.memory_space<vmem>>, vector<48x128xbf16>
    tpu.vector_store %arg5[%c240, %c0_49], %128 {strides = array<i32>} : memref<432x128xbf16, #tpu.memory_space<vmem>>, vector<48x128xbf16>,
    %c0_50 = arith.constant 0 : index
    %c6 = arith.constant 6 : index
    %130 = vector.load %arg4[%c0_50, %c6] : memref<48x136xf32, #tpu.memory_space<vmem>>, vector<48x128xf32>
    %cst_51 = arith.constant 0.000000e+00 : f32
    %131 = vector.shape_cast %70 : vector<1x128xi1> to vector<1x128xi1>
    %132 = vector.broadcast %131 : vector<1x128xi1> to vector<48x128xi1>
    %133 = vector.broadcast %cst_51 : f32 to vector<48x128xf32>
    %134 = arith.select %132, %130, %133 : vector<48x128xi1>, vector<48x128xf32>
    %135 = arith.truncf %134 : vector<48x128xf32> to vector<48x128xbf16>
    %c288 = arith.constant 288 : index
    %c0_52 = arith.constant 0 : index
    %136 = vector.load %arg5[%c288, %c0_52] : memref<432x128xbf16, #tpu.memory_space<vmem>>, vector<48x128xbf16>
    tpu.vector_store %arg5[%c288, %c0_52], %135 {strides = array<i32>} : memref<432x128xbf16, #tpu.memory_space<vmem>>, vector<48x128xbf16>,
    %c0_53 = arith.constant 0 : index
    %c7 = arith.constant 7 : index
    %137 = vector.load %arg4[%c0_53, %c7] : memref<48x136xf32, #tpu.memory_space<vmem>>, vector<48x128xf32>
    %cst_54 = arith.constant 0.000000e+00 : f32
    %138 = vector.shape_cast %79 : vector<1x128xi1> to vector<1x128xi1>
    %139 = vector.broadcast %138 : vector<1x128xi1> to vector<48x128xi1>
    %140 = vector.broadcast %cst_54 : f32 to vector<48x128xf32>
    %141 = arith.select %139, %137, %140 : vector<48x128xi1>, vector<48x128xf32>
    %142 = arith.truncf %141 : vector<48x128xf32> to vector<48x128xbf16>
    %c336 = arith.constant 336 : index
    %c0_55 = arith.constant 0 : index
    %143 = vector.load %arg5[%c336, %c0_55] : memref<432x128xbf16, #tpu.memory_space<vmem>>, vector<48x128xbf16>
    tpu.vector_store %arg5[%c336, %c0_55], %142 {strides = array<i32>} : memref<432x128xbf16, #tpu.memory_space<vmem>>, vector<48x128xbf16>,
    %c0_56 = arith.constant 0 : index
    %c8 = arith.constant 8 : index
    %144 = vector.load %arg4[%c0_56, %c8] : memref<48x136xf32, #tpu.memory_space<vmem>>, vector<48x128xf32>
    %cst_57 = arith.constant 0.000000e+00 : f32
    %145 = vector.shape_cast %88 : vector<1x128xi1> to vector<1x128xi1>
    %146 = vector.broadcast %145 : vector<1x128xi1> to vector<48x128xi1>
    %147 = vector.broadcast %cst_57 : f32 to vector<48x128xf32>
    %148 = arith.select %146, %144, %147 : vector<48x128xi1>, vector<48x128xf32>
    %149 = arith.truncf %148 : vector<48x128xf32> to vector<48x128xbf16>
    %c384 = arith.constant 384 : index
    %c0_58 = arith.constant 0 : index
    %150 = vector.load %arg5[%c384, %c0_58] : memref<432x128xbf16, #tpu.memory_space<vmem>>, vector<48x128xbf16>
    tpu.vector_store %arg5[%c384, %c0_58], %149 {strides = array<i32>} : memref<432x128xbf16, #tpu.memory_space<vmem>>, vector<48x128xbf16>,
    %c0_59 = arith.constant 0 : index
    %c0_60 = arith.constant 0 : index
    %151 = vector.load %arg5[%c0_59, %c0_60] : memref<432x128xbf16, #tpu.memory_space<vmem>>, vector<432x128xbf16>
    %cst_61 = arith.constant dense<0.000000e+00> : vector<384x128xf32>
    %152 = tpu.matmul %89, %151, %cst_61 {dimension_numbers = #tpu.dot_dimension_numbers<[1], [0], [0], [1], [0, 0, 1, 1], [], []>} : vector<384x432xbf16>, vector<432x128xbf16>, vector<384x128xf32> -> vector<384x128xf32>
    %153 = vector.extract_strided_slice %152 {offsets = [0, 0], sizes = [192, 128], strides = [1, 1]} : vector<384x128xf32> to vector<192x128xf32>
    %154 = vector.extract_strided_slice %152 {offsets = [192, 0], sizes = [192, 128], strides = [1, 1]} : vector<384x128xf32> to vector<192x128xf32>
    %c0_62 = arith.constant 0 : index
    %c16 = arith.constant 16 : index
    %155 = vector.load %arg6[%c0_62, %c16] : memref<192x160xf32, #tpu.memory_space<vmem>>, vector<192x128xf32>
    tpu.vector_store %arg6[%c0_62, %c16], %154 {strides = array<i32>} : memref<192x160xf32, #tpu.memory_space<vmem>>, vector<192x128xf32>,
    %c0_63 = arith.constant 0 : index
    %c15 = arith.constant 15 : index
    %156 = vector.load %arg6[%c0_63, %c15] : memref<192x160xf32, #tpu.memory_space<vmem>>, vector<192x128xf32>
    %c0_64 = arith.constant 0 : index
    %c31 = arith.constant 31 : index
    %157 = vector.load %arg6[%c0_64, %c31] : memref<192x160xf32, #tpu.memory_space<vmem>>, vector<192x128xf32>
    %c0_i32_65 = arith.constant 0 : i32
    %158 = vector.broadcast %c0_i32_65 : i32 to vector<1x128xi32>
    %159 = arith.cmpi eq, %16, %158 : vector<1x128xi32>
    %160 = vector.shape_cast %159 : vector<1x128xi1> to vector<1x128xi1>
    %161 = vector.broadcast %160 : vector<1x128xi1> to vector<192x128xi1>
    %162 = arith.select %161, %157, %156 : vector<192x128xi1>, vector<192x128xf32>
    %163 = arith.addf %153, %162 : vector<192x128xf32>
    %c0_66 = arith.constant 0 : index
    %c0_67 = arith.constant 0 : index
    %c0_68 = arith.constant 0 : index
    %164 = vector.load %arg3[%c0_66, %c0_67, %c0_68] : memref<2x192x128xf32, #tpu.memory_space<vmem>>, vector<1x192x128xf32>
    %165 = vector.shape_cast %164 : vector<1x192x128xf32> to vector<192x128xf32>
    %166 = vector.shape_cast %163 : vector<192x128xf32> to vector<1x192x128xf32>
    tpu.vector_store %arg3[%c0_66, %c0_67, %c0_68], %166 {strides = array<i32>} : memref<2x192x128xf32, #tpu.memory_space<vmem>>, vector<1x192x128xf32>,
    %c1_69 = arith.constant 1 : index
    %c0_70 = arith.constant 0 : index
    %c0_71 = arith.constant 0 : index
    %167 = vector.load %arg1[%c1_69, %c0_70, %c0_71] : memref<2x48x128xf32, #tpu.memory_space<vmem>>, vector<1x48x128xf32>
    %168 = vector.shape_cast %167 : vector<1x48x128xf32> to vector<48x128xf32>
    %c0_72 = arith.constant 0 : index
    %c4_73 = arith.constant 4 : index
    %169 = vector.load %arg4[%c0_72, %c4_73] : memref<48x136xf32, #tpu.memory_space<vmem>>, vector<48x128xf32>
    tpu.vector_store %arg4[%c0_72, %c4_73], %168 {strides = array<i32>} : memref<48x136xf32, #tpu.memory_space<vmem>>, vector<48x128xf32>,
    %c0_74 = arith.constant 0 : index
    %c0_75 = arith.constant 0 : index
    %170 = vector.load %arg4[%c0_74, %c0_75] : memref<48x136xf32, #tpu.memory_space<vmem>>, vector<48x128xf32>
    %cst_76 = arith.constant 0.000000e+00 : f32
    %171 = vector.shape_cast %25 : vector<1x128xi1> to vector<1x128xi1>
    %172 = vector.broadcast %171 : vector<1x128xi1> to vector<48x128xi1>
    %173 = vector.broadcast %cst_76 : f32 to vector<48x128xf32>
    %174 = arith.select %172, %170, %173 : vector<48x128xi1>, vector<48x128xf32>
    %175 = arith.truncf %174 : vector<48x128xf32> to vector<48x128xbf16>
    %c0_77 = arith.constant 0 : index
    %c0_78 = arith.constant 0 : index
    %176 = vector.load %arg5[%c0_77, %c0_78] : memref<432x128xbf16, #tpu.memory_space<vmem>>, vector<48x128xbf16>
    tpu.vector_store %arg5[%c0_77, %c0_78], %175 {strides = array<i32>} : memref<432x128xbf16, #tpu.memory_space<vmem>>, vector<48x128xbf16>,
    %c0_79 = arith.constant 0 : index
    %c1_80 = arith.constant 1 : index
    %177 = vector.load %arg4[%c0_79, %c1_80] : memref<48x136xf32, #tpu.memory_space<vmem>>, vector<48x128xf32>
    %cst_81 = arith.constant 0.000000e+00 : f32
    %178 = vector.shape_cast %34 : vector<1x128xi1> to vector<1x128xi1>
    %179 = vector.broadcast %178 : vector<1x128xi1> to vector<48x128xi1>
    %180 = vector.broadcast %cst_81 : f32 to vector<48x128xf32>
    %181 = arith.select %179, %177, %180 : vector<48x128xi1>, vector<48x128xf32>
    %182 = arith.truncf %181 : vector<48x128xf32> to vector<48x128xbf16>
    %c48_82 = arith.constant 48 : index
    %c0_83 = arith.constant 0 : index
    %183 = vector.load %arg5[%c48_82, %c0_83] : memref<432x128xbf16, #tpu.memory_space<vmem>>, vector<48x128xbf16>
    tpu.vector_store %arg5[%c48_82, %c0_83], %182 {strides = array<i32>} : memref<432x128xbf16, #tpu.memory_space<vmem>>, vector<48x128xbf16>,
    %c0_84 = arith.constant 0 : index
    %c2_85 = arith.constant 2 : index
    %184 = vector.load %arg4[%c0_84, %c2_85] : memref<48x136xf32, #tpu.memory_space<vmem>>, vector<48x128xf32>
    %cst_86 = arith.constant 0.000000e+00 : f32
    %185 = vector.shape_cast %43 : vector<1x128xi1> to vector<1x128xi1>
    %186 = vector.broadcast %185 : vector<1x128xi1> to vector<48x128xi1>
    %187 = vector.broadcast %cst_86 : f32 to vector<48x128xf32>
    %188 = arith.select %186, %184, %187 : vector<48x128xi1>, vector<48x128xf32>
    %189 = arith.truncf %188 : vector<48x128xf32> to vector<48x128xbf16>
    %c96_87 = arith.constant 96 : index
    %c0_88 = arith.constant 0 : index
    %190 = vector.load %arg5[%c96_87, %c0_88] : memref<432x128xbf16, #tpu.memory_space<vmem>>, vector<48x128xbf16>
    tpu.vector_store %arg5[%c96_87, %c0_88], %189 {strides = array<i32>} : memref<432x128xbf16, #tpu.memory_space<vmem>>, vector<48x128xbf16>,
    %c0_89 = arith.constant 0 : index
    %c3_90 = arith.constant 3 : index
    %191 = vector.load %arg4[%c0_89, %c3_90] : memref<48x136xf32, #tpu.memory_space<vmem>>, vector<48x128xf32>
    %cst_91 = arith.constant 0.000000e+00 : f32
    %192 = vector.shape_cast %52 : vector<1x128xi1> to vector<1x128xi1>
    %193 = vector.broadcast %192 : vector<1x128xi1> to vector<48x128xi1>
    %194 = vector.broadcast %cst_91 : f32 to vector<48x128xf32>
    %195 = arith.select %193, %191, %194 : vector<48x128xi1>, vector<48x128xf32>
    %196 = arith.truncf %195 : vector<48x128xf32> to vector<48x128xbf16>
    %c144_92 = arith.constant 144 : index
    %c0_93 = arith.constant 0 : index
    %197 = vector.load %arg5[%c144_92, %c0_93] : memref<432x128xbf16, #tpu.memory_space<vmem>>, vector<48x128xbf16>
    tpu.vector_store %arg5[%c144_92, %c0_93], %196 {strides = array<i32>} : memref<432x128xbf16, #tpu.memory_space<vmem>>, vector<48x128xbf16>,
    %198 = arith.truncf %168 : vector<48x128xf32> to vector<48x128xbf16>
    %c192_94 = arith.constant 192 : index
    %c0_95 = arith.constant 0 : index
    %199 = vector.load %arg5[%c192_94, %c0_95] : memref<432x128xbf16, #tpu.memory_space<vmem>>, vector<48x128xbf16>
    tpu.vector_store %arg5[%c192_94, %c0_95], %198 {strides = array<i32>} : memref<432x128xbf16, #tpu.memory_space<vmem>>, vector<48x128xbf16>,
    %c0_96 = arith.constant 0 : index
    %c5_97 = arith.constant 5 : index
    %200 = vector.load %arg4[%c0_96, %c5_97] : memref<48x136xf32, #tpu.memory_space<vmem>>, vector<48x128xf32>
    %cst_98 = arith.constant 0.000000e+00 : f32
    %201 = vector.shape_cast %61 : vector<1x128xi1> to vector<1x128xi1>
    %202 = vector.broadcast %201 : vector<1x128xi1> to vector<48x128xi1>
    %203 = vector.broadcast %cst_98 : f32 to vector<48x128xf32>
    %204 = arith.select %202, %200, %203 : vector<48x128xi1>, vector<48x128xf32>
    %205 = arith.truncf %204 : vector<48x128xf32> to vector<48x128xbf16>
    %c240_99 = arith.constant 240 : index
    %c0_100 = arith.constant 0 : index
    %206 = vector.load %arg5[%c240_99, %c0_100] : memref<432x128xbf16, #tpu.memory_space<vmem>>, vector<48x128xbf16>
    tpu.vector_store %arg5[%c240_99, %c0_100], %205 {strides = array<i32>} : memref<432x128xbf16, #tpu.memory_space<vmem>>, vector<48x128xbf16>,
    %c0_101 = arith.constant 0 : index
    %c6_102 = arith.constant 6 : index
    %207 = vector.load %arg4[%c0_101, %c6_102] : memref<48x136xf32, #tpu.memory_space<vmem>>, vector<48x128xf32>
    %cst_103 = arith.constant 0.000000e+00 : f32
    %208 = vector.shape_cast %70 : vector<1x128xi1> to vector<1x128xi1>
    %209 = vector.broadcast %208 : vector<1x128xi1> to vector<48x128xi1>
    %210 = vector.broadcast %cst_103 : f32 to vector<48x128xf32>
    %211 = arith.select %209, %207, %210 : vector<48x128xi1>, vector<48x128xf32>
    %212 = arith.truncf %211 : vector<48x128xf32> to vector<48x128xbf16>
    %c288_104 = arith.constant 288 : index
    %c0_105 = arith.constant 0 : index
    %213 = vector.load %arg5[%c288_104, %c0_105] : memref<432x128xbf16, #tpu.memory_space<vmem>>, vector<48x128xbf16>
    tpu.vector_store %arg5[%c288_104, %c0_105], %212 {strides = array<i32>} : memref<432x128xbf16, #tpu.memory_space<vmem>>, vector<48x128xbf16>,
    %c0_106 = arith.constant 0 : index
    %c7_107 = arith.constant 7 : index
    %214 = vector.load %arg4[%c0_106, %c7_107] : memref<48x136xf32, #tpu.memory_space<vmem>>, vector<48x128xf32>
    %cst_108 = arith.constant 0.000000e+00 : f32
    %215 = vector.shape_cast %79 : vector<1x128xi1> to vector<1x128xi1>
    %216 = vector.broadcast %215 : vector<1x128xi1> to vector<48x128xi1>
    %217 = vector.broadcast %cst_108 : f32 to vector<48x128xf32>
    %218 = arith.select %216, %214, %217 : vector<48x128xi1>, vector<48x128xf32>
    %219 = arith.truncf %218 : vector<48x128xf32> to vector<48x128xbf16>
    %c336_109 = arith.constant 336 : index
    %c0_110 = arith.constant 0 : index
    %220 = vector.load %arg5[%c336_109, %c0_110] : memref<432x128xbf16, #tpu.memory_space<vmem>>, vector<48x128xbf16>
    tpu.vector_store %arg5[%c336_109, %c0_110], %219 {strides = array<i32>} : memref<432x128xbf16, #tpu.memory_space<vmem>>, vector<48x128xbf16>,
    %c0_111 = arith.constant 0 : index
    %c8_112 = arith.constant 8 : index
    %221 = vector.load %arg4[%c0_111, %c8_112] : memref<48x136xf32, #tpu.memory_space<vmem>>, vector<48x128xf32>
    %cst_113 = arith.constant 0.000000e+00 : f32
    %222 = vector.shape_cast %88 : vector<1x128xi1> to vector<1x128xi1>
    %223 = vector.broadcast %222 : vector<1x128xi1> to vector<48x128xi1>
    %224 = vector.broadcast %cst_113 : f32 to vector<48x128xf32>
    %225 = arith.select %223, %221, %224 : vector<48x128xi1>, vector<48x128xf32>
    %226 = arith.truncf %225 : vector<48x128xf32> to vector<48x128xbf16>
    %c384_114 = arith.constant 384 : index
    %c0_115 = arith.constant 0 : index
    %227 = vector.load %arg5[%c384_114, %c0_115] : memref<432x128xbf16, #tpu.memory_space<vmem>>, vector<48x128xbf16>
    tpu.vector_store %arg5[%c384_114, %c0_115], %226 {strides = array<i32>} : memref<432x128xbf16, #tpu.memory_space<vmem>>, vector<48x128xbf16>,
    %c0_116 = arith.constant 0 : index
    %c0_117 = arith.constant 0 : index
    %228 = vector.load %arg5[%c0_116, %c0_117] : memref<432x128xbf16, #tpu.memory_space<vmem>>, vector<432x128xbf16>
    %cst_118 = arith.constant dense<0.000000e+00> : vector<384x128xf32>
    %229 = tpu.matmul %89, %228, %cst_118 {dimension_numbers = #tpu.dot_dimension_numbers<[1], [0], [0], [1], [0, 0, 1, 1], [], []>} : vector<384x432xbf16>, vector<432x128xbf16>, vector<384x128xf32> -> vector<384x128xf32>
    %230 = vector.extract_strided_slice %229 {offsets = [0, 0], sizes = [192, 128], strides = [1, 1]} : vector<384x128xf32> to vector<192x128xf32>
    %231 = vector.extract_strided_slice %229 {offsets = [192, 0], sizes = [192, 128], strides = [1, 1]} : vector<384x128xf32> to vector<192x128xf32>
    %c0_119 = arith.constant 0 : index
    %c16_120 = arith.constant 16 : index
    %232 = vector.load %arg6[%c0_119, %c16_120] : memref<192x160xf32, #tpu.memory_space<vmem>>, vector<192x128xf32>
    tpu.vector_store %arg6[%c0_119, %c16_120], %231 {strides = array<i32>} : memref<192x160xf32, #tpu.memory_space<vmem>>, vector<192x128xf32>,
    %c0_121 = arith.constant 0 : index
    %c15_122 = arith.constant 15 : index
    %233 = vector.load %arg6[%c0_121, %c15_122] : memref<192x160xf32, #tpu.memory_space<vmem>>, vector<192x128xf32>
    %c0_123 = arith.constant 0 : index
    %c31_124 = arith.constant 31 : index
    %234 = vector.load %arg6[%c0_123, %c31_124] : memref<192x160xf32, #tpu.memory_space<vmem>>, vector<192x128xf32>
    %c0_i32_125 = arith.constant 0 : i32
    %235 = vector.broadcast %c0_i32_125 : i32 to vector<1x128xi32>
    %236 = arith.cmpi eq, %16, %235 : vector<1x128xi32>
    %237 = vector.shape_cast %236 : vector<1x128xi1> to vector<1x128xi1>
    %238 = vector.broadcast %237 : vector<1x128xi1> to vector<192x128xi1>
    %239 = arith.select %238, %234, %233 : vector<192x128xi1>, vector<192x128xf32>
    %240 = arith.addf %230, %239 : vector<192x128xf32>
    %c1_126 = arith.constant 1 : index
    %c0_127 = arith.constant 0 : index
    %c0_128 = arith.constant 0 : index
    %241 = vector.load %arg3[%c1_126, %c0_127, %c0_128] : memref<2x192x128xf32, #tpu.memory_space<vmem>>, vector<1x192x128xf32>
    %242 = vector.shape_cast %241 : vector<1x192x128xf32> to vector<192x128xf32>
    %243 = vector.shape_cast %240 : vector<192x128xf32> to vector<1x192x128xf32>
    tpu.vector_store %arg3[%c1_126, %c0_127, %c0_128], %243 {strides = array<i32>} : memref<2x192x128xf32, #tpu.memory_space<vmem>>, vector<1x192x128xf32>,
    return
  }
  func.func @transform_0(%arg0: i32) -> (i32, i32, i32) {
    %c0_i32 = arith.constant 0 : i32
    %c0_i32_0 = arith.constant 0 : i32
    %c0_i32_1 = arith.constant 0 : i32
    return %arg0, %c0_i32, %c0_i32_0 : i32, i32, i32
  }
  func.func @transform_1(%arg0: i32) -> (i32, i32) {
    %c0_i32 = arith.constant 0 : i32
    %c0_i32_0 = arith.constant 0 : i32
    %c0_i32_1 = arith.constant 0 : i32
    return %c0_i32, %c0_i32_0 : i32, i32
  }
  func.func @transform_2(%arg0: i32) -> (i32, i32, i32) {
    %c0_i32 = arith.constant 0 : i32
    %c0_i32_0 = arith.constant 0 : i32
    %c0_i32_1 = arith.constant 0 : i32
    return %arg0, %c0_i32, %c0_i32_0 : i32, i32, i32
  }
}

</mosaic_0001>

<bundles_post_ra>
// kernel: _forward.1
= control target key start
LH: loop header
LB: loop body
LE: loop exit
PB: predicated region body
PF: predicated region fallthrough
CT: control target
= control target key end

     0   :  { %s5005_s15 = smov 4   ;;  %v5006_v10 = vmov 0   ;;  %v12_v19 = vlaneseq  ;;  %vm184_vm0 = vcmask 1047584   ;;  %vm186_vm1 = vcmask 31744   ;;  %s5008_s6 = smov 126   ;;  %s7103_s0 = inlined_call_operand.vmem [shape: f32[2,48,128], index: 0, kind: input, shape index: {}]   ;;  %s7104_s1 = inlined_call_operand.vmem [shape: bf16[384,432], index: 1, kind: input, shape index: {}]   ;;  %s7105_s2 = inlined_call_operand.vmem [shape: f32[2,192,128], index: 2, kind: output, shape index: {}]  }
   0x1   :  { %v5035_v0 = vld [vmem:[%s7103_s0 + $0x10] sm:$0xff]  ;;  %v5040_v1 = vld [vmem:[%s7103_s0 + $0x18] sm:$0xff]  ;;  %v5045_v2 = vld [vmem:[%s7103_s0] sm:$0xff]  ;;  %1305 = vmatprep.subr.bf16.mxu0 %v5006_v10  ;;  %2960 = vmatprep.subr.bf16.mxu1 %v5006_v10  ;;  %s5009_s7 = smov 125   ;;  %s5010_s10 = smov 123   ;;  %vm268_vm4 = vcmask 1039360  }
   0x2   :  { %170 = vrot.lane.b32.xlu1 %v5035_v0, %s5005_s15  ;;  %v444_v3 = vpack.c.bf16 %v5040_v1, %v5035_v0  ;;  %v5053_v4 = vld [vmem:[%s7103_s0 + $0x8] sm:$0xff]  ;;  %166 = vrot.lane.b32.xlu0 %v5045_v2, %s5005_s15  ;;  %v5059_v5 = vld [vmem:[%s7103_s0 + $0x20] sm:$0xff]  ;;  %v13_v20 = vand.u32 127, %v12_v19  ;;  %s5011_s11 = smov 122   ;;  %s5012_s12 = smov 121   ;;  %vm343_vm7 = vcmask 1031168  }
   0x3   :  { %v443_v6 = vpack.c.bf16 %v5053_v4, %v5045_v2  ;;  %v5066_v7 = vld [vmem:[%s7103_s0 + $0x28] sm:$0xff]  ;;  %v5071_v8 = vld [vmem:[%s7103_s0 + $0x30] sm:$0xff]  ;;  %v5076_v9 = vld [vmem:[%s7103_s0 + $0x38] sm:$0xff]  ;;  %s5013_s13 = smov 120   ;;  %vm418_vm10 = vcmask 1022976   ;;  %vm499_vm13 = vcmask 1006592  }
   0x4   :  { %v445_v11 = vpack.c.bf16 %v5066_v7, %v5059_v5  ;;  %v2639_v12 = vpack.c.bf16 %v5076_v9, %v5071_v8  ;;  %v5087_v13 = vld [vmem:[%s7103_s0 + $0x40] sm:$0xff]  ;;  %v5092_v14 = vld [vmem:[%s7103_s0 + $0x48] sm:$0xff]  ;;  %v5099_v16 = vld [vmem:[%s7103_s0 + $0x50] sm:$0xff]  ;;  %v5122_v23 = vand.u32 15, %v13_v20  ;;  %s5015_s30 = smov 97   ;;  %s5016_s3 = smov 113  }
   0x5   :  { %v2640_v15 = vpack.c.bf16 %v5092_v14, %v5087_v13  ;;  %v5104_v17 = vld [vmem:[%s7103_s0 + $0x58] sm:$0xff]  ;;  %s5007_s0 = smov 127   ;;  %v4863_v36 = vld [vmem:[%s7104_s1 + $0x4] ss:$16 sps:$4 sm:$0xff]  }
   0x6   :  { %172 = vrot.lane.b32.xlu1 %v5040_v1, %s5005_s15  ;;  %168 = vrot.lane.b32.xlu0 %v5053_v4, %s5005_s15  ;;  %v2641_v18 = vpack.c.bf16 %v5104_v17, %v5099_v16  ;;  %v26_v26 = vadd.s32 4294967292, %v5122_v23 }
   0x7   :  { %1337 = vmatprep.mubr.bf16.mxu0 %v4863_v36  ;;  %2992 = vmatprep.mubr.bf16.mxu1 %v4863_v36 }
   0x8   :  { %vm27_vm2 = vcmp.ge.s32.totalorder %v26_v26, 0 }
   0x9   :  { %vm5139_vm3 = vmpackc.low %vm27_vm2, %vm27_vm2 }
   0xa   :  { %174 = vrot.lane.b32.xlu0 %v5059_v5, %s5005_s15  ;;  %176 = vrot.lane.b32.xlu1 %v5066_v7, %s5005_s15 }
   0xe   :  { %2375 = vrot.lane.b32.xlu0 %v5071_v8, %s5005_s15  ;;  %2377 = vrot.lane.b32.xlu1 %v5076_v9, %s5005_s15 }
  0x12   :  { %2379 = vrot.lane.b32.xlu0 %v5087_v13, %s5005_s15  ;;  %2381 = vrot.lane.b32.xlu1 %v5092_v14, %s5005_s15  ;;  %v5511_v13 = vld [vmem:[%s7104_s1 + $0x44] ss:$16 sps:$4 sm:$0xff]  }
  0x16   :  { %2383 = vrot.lane.b32.xlu0 %v5099_v16, %s5005_s15  ;;  %2385 = vrot.lane.b32.xlu1 %v5104_v17, %s5005_s15 }
  0x74   :  { %v171_v21 = vpop.permute.xlu1 %170  ;;  %v167_v22 = vpop.permute.xlu0 %166 }
  0x75   :  { %190 = vst.msk [vmem:[#allocation2 + $0x20] sm:$0xff] %vm184_vm0, %v171_v21  ;;  %185 = vst.msk [vmem:[#allocation2] sm:$0xff] %vm184_vm0, %v167_v22 }
  0x76   :  { %191 = vst.msk [vmem:[#allocation2 + $0x28] sm:$0xff] %vm186_vm1, %v171_v21  ;;  %187 = vst.msk [vmem:[#allocation2 + $0x8] sm:$0xff] %vm186_vm1, %v167_v22 }
  0x78   :  { %v173_v24 = vpop.permute.xlu1 %172  ;;  %v169_v25 = vpop.permute.xlu0 %168 }
  0x79   :  { %192 = vst.msk [vmem:[#allocation2 + $0x30] sm:$0xff] %vm184_vm0, %v173_v24  ;;  %188 = vst.msk [vmem:[#allocation2 + $0x10] sm:$0xff] %vm184_vm0, %v169_v25 }
  0x7a   :  { %193 = vst.msk [vmem:[#allocation2 + $0x38] sm:$0xff] %vm186_vm1, %v173_v24  ;;  %189 = vst.msk [vmem:[#allocation2 + $0x18] sm:$0xff] %vm186_vm1, %v169_v25 }
  0x7c   :  { %v449_v27 = vld [vmem:[#allocation2] sm:$0xff]  ;;  %v175_v28 = vpop.permute.xlu0 %174  ;;  %v177_v29 = vpop.permute.xlu1 %176 }
  0x7d   :  { %v453_v30 = vld [vmem:[#allocation2 + $0x20] sm:$0xff]  ;;  %v454_v31 = vld [vmem:[#allocation2 + $0x28] sm:$0xff]  ;;  %194 = vst.msk [vmem:[#allocation2 + $0x40] sm:$0xff] %vm184_vm0, %v175_v28  ;;  %196 = vst.msk [vmem:[#allocation2 + $0x50] sm:$0xff] %vm184_vm0, %v177_v29 }
  0x7e   :  { %v450_v32 = vld [vmem:[#allocation2 + $0x8] sm:$0xff]  ;;  %195 = vst.msk [vmem:[#allocation2 + $0x48] sm:$0xff] %vm186_vm1, %v175_v28  ;;  %197 = vst.msk [vmem:[#allocation2 + $0x58] sm:$0xff] %vm186_vm1, %v177_v29  ;;  %v5137_v35 = vpack.i.bf16 %v454_v31, %v453_v30 }
  0x7f   :  { %v5133_v33 = vpack.i.bf16 %v450_v32, %v449_v27 }
  0x80   :  { %v451_v34 = vld [vmem:[#allocation2 + $0x10] sm:$0xff]  ;;  %v2376_v37 = vpop.permute.xlu0 %2375  ;;  %v2378_v38 = vpop.permute.xlu1 %2377 }
  0x81   :  { %4442 = vrot.lane.b32.xlu0 %v5133_v33, %s5007_s0  ;;  %v456_v39 = vld [vmem:[#allocation2 + $0x38] sm:$0xff]  ;;  %v4190_v41 = vpack.c.bf16 %v451_v34, %v449_v27  ;;  %2393 = vst.msk [vmem:[#allocation2] sm:$0xff] %vm184_vm0, %v2376_v37  ;;  %2395 = vst.msk [vmem:[#allocation2 + $0x10] sm:$0xff] %vm184_vm0, %v2378_v38  ;;  %v455_v42 = vld [vmem:[#allocation2 + $0x30] sm:$0xff] }
  0x82   :  { %v452_v40 = vld [vmem:[#allocation2 + $0x18] sm:$0xff]  ;;  %2394 = vst.msk [vmem:[#allocation2 + $0x8] sm:$0xff] %vm186_vm1, %v2376_v37  ;;  %v5155_v47 = vpack.i.bf16 %v456_v39, %v455_v42  ;;  %v4193_v51 = vpack.c.bf16 %v455_v42, %v453_v30 }
  0x83   :  { %v5146_v43 = vpack.i.bf16 %v452_v40, %v451_v34  ;;  %2396 = vst.msk [vmem:[#allocation2 + $0x18] sm:$0xff] %vm186_vm1, %v2378_v38  ;;  %4191 = vmatpush1.bf16.msk.msra.mxu0 %vm5139_vm3, %v4190_v41  ;;  %v30_v38 = vadd.s32 4294967293, %v5122_v23 }
  0x84   :  { %v457_v44 = vld [vmem:[#allocation2 + $0x40] sm:$0xff]  ;;  %v459_v46 = vld [vmem:[#allocation2 + $0x50] sm:$0xff]  ;;  %v2380_v48 = vpop.permute.xlu0 %2379  ;;  %v2382_v49 = vpop.permute.xlu1 %2381  ;;  %1307 = vmatprep.subr.bf16.mxu0 %v5006_v10 }
  0x85   :  { %v458_v45 = vld [vmem:[#allocation2 + $0x48] sm:$0xff]  ;;  %4452 = vrot.lane.b32.xlu0 %v5137_v35, %s5007_s0  ;;  %4447 = vrot.lane.b32.xlu1 %v5146_v43, %s5007_s0  ;;  %v460_v50 = vld [vmem:[#allocation2 + $0x58] sm:$0xff]  ;;  %2397 = vst.msk [vmem:[#allocation2 + $0x20] sm:$0xff] %vm184_vm0, %v2380_v48  ;;  %2399 = vst.msk [vmem:[#allocation2 + $0x30] sm:$0xff] %vm184_vm0, %v2382_v49  ;;  %v4196_v53 = vpack.c.bf16 %v459_v46, %v457_v44  ;;  %vm31_vm5 = vcmp.ge.s32.totalorder %v30_v38, 0 }
  0x86   :  { %v5158_v52 = vpack.i.bf16 %v458_v45, %v457_v44  ;;  %2398 = vst.msk [vmem:[#allocation2 + $0x28] sm:$0xff] %vm186_vm1, %v2380_v48  ;;  %2400 = vst.msk [vmem:[#allocation2 + $0x38] sm:$0xff] %vm186_vm1, %v2382_v49  ;;  %v5170_v54 = vpack.i.bf16 %v460_v50, %v459_v46 }
  0x87   :  { %4194 = vmatpush1.bf16.msk.msra.mxu0 %vm5139_vm3, %v4193_v51  ;;  %vm5307_vm6 = vmpackc.low %vm31_vm5, %vm31_vm5 }
  0x88   :  { %v2384_v55 = vpop.permute.xlu0 %2383  ;;  %v2423_v56 = vld [vmem:[#allocation2] sm:$0xff]  ;;  %v2386_v57 = vpop.permute.xlu1 %2385  ;;  %v2425_v58 = vld [vmem:[#allocation2 + $0x10] sm:$0xff]  ;;  %1309 = vmatprep.subr.bf16.mxu0 %v5006_v10 }
  0x89   :  { %4457 = vrot.lane.b32.xlu1 %v5155_v47, %s5007_s0  ;;  %4462 = vrot.lane.b32.xlu0 %v5158_v52, %s5007_s0  ;;  %2401 = vst.msk [vmem:[#allocation2 + $0x40] sm:$0xff] %vm184_vm0, %v2384_v55  ;;  %2403 = vst.msk [vmem:[#allocation2 + $0x50] sm:$0xff] %vm184_vm0, %v2386_v57  ;;  %v4262_v59 = vpack.c.bf16 %v2425_v58, %v2423_v56  ;;  %v2424_v21 = vld [vmem:[#allocation2 + $0x8] sm:$0xff]  ;;  %vm574_vm0 = vcmask 998400  }
  0x8a   :  { %2402 = vst.msk [vmem:[#allocation2 + $0x48] sm:$0xff] %vm186_vm1, %v2384_v55  ;;  %2404 = vst.msk [vmem:[#allocation2 + $0x58] sm:$0xff] %vm186_vm1, %v2386_v57  ;;  %v5213_v22 = vpack.i.bf16 %v2424_v21, %v2423_v56  ;;  %v2426_v24 = vld [vmem:[#allocation2 + $0x18] sm:$0xff] }
  0x8b   :  { %4197 = vmatpush1.bf16.msk.msra.mxu0 %vm5139_vm3, %v4196_v53  ;;  %4263 = vmatpush1.bf16.msk.msra.mxu1 %vm5139_vm3, %v4262_v59  ;;  %v5219_v26 = vpack.i.bf16 %v2426_v24, %v2425_v58 }
  0x8c   :  { %v2427_v60 = vld [vmem:[#allocation2 + $0x20] sm:$0xff]  ;;  %v2429_v61 = vld [vmem:[#allocation2 + $0x30] sm:$0xff]  ;;  %2962 = vmatprep.subr.bf16.mxu1 %v5006_v10  ;;  %1311 = vmatprep.subr.bf16.mxu0 %v5006_v10 }
  0x8d   :  { %4467 = vrot.lane.b32.xlu1 %v5170_v54, %s5007_s0  ;;  %4472 = vrot.lane.b32.xlu0 %v5133_v33, %s5008_s6  ;;  %v4265_v62 = vpack.c.bf16 %v2429_v61, %v2427_v60  ;;  %v2428_v25 = vld [vmem:[#allocation2 + $0x28] sm:$0xff]  ;;  %v2430_v28 = vld [vmem:[#allocation2 + $0x38] sm:$0xff] }
  0x8e   :  { %v5221_v27 = vpack.i.bf16 %v2428_v25, %v2427_v60  ;;  %v5227_v30 = vpack.i.bf16 %v2430_v28, %v2429_v61  ;;  %v34_v28 = vadd.s32 4294967294, %v5122_v23 }
  0x8f   :  { %4266 = vmatpush1.bf16.msk.msra.mxu1 %vm5139_vm3, %v4265_v62 }
  0x90   :  { %v2431_v63 = vld [vmem:[#allocation2 + $0x40] sm:$0xff]  ;;  %v2433_v19 = vld [vmem:[#allocation2 + $0x50] sm:$0xff]  ;;  %2964 = vmatprep.subr.bf16.mxu1 %v5006_v10  ;;  %vm35_vm8 = vcmp.ge.s32.totalorder %v34_v28, 0 }
  0x91   :  { %4477 = vrot.lane.b32.xlu1 %v5146_v43, %s5008_s6  ;;  %4482 = vrot.lane.b32.xlu0 %v5137_v35, %s5008_s6  ;;  %v4268_v20 = vpack.c.bf16 %v2433_v19, %v2431_v63  ;;  %v2432_v29 = vld [vmem:[#allocation2 + $0x48] sm:$0xff]  ;;  %v2434_v32 = vld [vmem:[#allocation2 + $0x58] sm:$0xff]  ;;  %vm5339_vm9 = vmpackc.low %vm35_vm8, %vm35_vm8 }
  0x92   :  { %v5229_v31 = vpack.i.bf16 %v2432_v29, %v2431_v63  ;;  %v5235_v34 = vpack.i.bf16 %v2434_v32, %v2433_v19 }
  0x93   :  { %4269 = vmatpush1.bf16.msk.msra.mxu1 %vm5139_vm3, %v4268_v20  ;;  %vm649_vm3 = vcmask 990208  }
  0x94   :  { %2966 = vmatprep.subr.bf16.mxu1 %v5006_v10 }
  0x95   :  { %4487 = vrot.lane.b32.xlu1 %v5155_v47, %s5008_s6  ;;  %4492 = vrot.lane.b32.xlu0 %v5158_v52, %s5008_s6 }
  0x99   :  { %4497 = vrot.lane.b32.xlu1 %v5170_v54, %s5008_s6  ;;  %4502 = vrot.lane.b32.xlu0 %v5133_v33, %s5009_s7 }
  0x9d   :  { %4507 = vrot.lane.b32.xlu1 %v5146_v43, %s5009_s7  ;;  %4512 = vrot.lane.b32.xlu0 %v5137_v35, %s5009_s7 }
  0xa1   :  { %4517 = vrot.lane.b32.xlu1 %v5155_v47, %s5009_s7  ;;  %4522 = vrot.lane.b32.xlu0 %v5158_v52, %s5009_s7 }
  0xa5   :  { %4527 = vrot.lane.b32.xlu1 %v5170_v54, %s5009_s7  ;;  %4532 = vrot.lane.b32.xlu0 %v5213_v22, %s5007_s0 }
  0xa9   :  { %4537 = vrot.lane.b32.xlu1 %v5219_v26, %s5007_s0  ;;  %4542 = vrot.lane.b32.xlu0 %v5221_v27, %s5007_s0 }
  0xad   :  { %4547 = vrot.lane.b32.xlu1 %v5227_v30, %s5007_s0  ;;  %4552 = vrot.lane.b32.xlu0 %v5229_v31, %s5007_s0 }
  0xb1   :  { %4557 = vrot.lane.b32.xlu1 %v5235_v34, %s5007_s0  ;;  %4562 = vrot.lane.b32.xlu0 %v5213_v22, %s5008_s6 }
  0xb5   :  { %4567 = vrot.lane.b32.xlu1 %v5219_v26, %s5008_s6  ;;  %4572 = vrot.lane.b32.xlu0 %v5221_v27, %s5008_s6 }
  0xb9   :  { %4577 = vrot.lane.b32.xlu1 %v5227_v30, %s5008_s6  ;;  %4582 = vrot.lane.b32.xlu0 %v5229_v31, %s5008_s6 }
  0xbd   :  { %4587 = vrot.lane.b32.xlu1 %v5235_v34, %s5008_s6  ;;  %4592 = vrot.lane.b32.xlu0 %v5213_v22, %s5009_s7 }
  0xc1   :  { %4597 = vrot.lane.b32.xlu1 %v5219_v26, %s5009_s7  ;;  %4602 = vrot.lane.b32.xlu0 %v5221_v27, %s5009_s7 }
  0xc5   :  { %4607 = vrot.lane.b32.xlu1 %v5227_v30, %s5009_s7  ;;  %4612 = vrot.lane.b32.xlu0 %v5229_v31, %s5009_s7 }
  0xc9   :  { %4617 = vrot.lane.b32.xlu1 %v5235_v34, %s5009_s7  ;;  %4622 = vrot.lane.b32.xlu0 %v5133_v33, %s5010_s10 }
  0xcd   :  { %4627 = vrot.lane.b32.xlu1 %v5146_v43, %s5010_s10  ;;  %4632 = vrot.lane.b32.xlu0 %v5213_v22, %s5010_s10 }
  0xd1   :  { %4637 = vrot.lane.b32.xlu1 %v5219_v26, %s5010_s10  ;;  %4642 = vrot.lane.b32.xlu0 %v5137_v35, %s5010_s10 }
  0xd5   :  { %4647 = vrot.lane.b32.xlu1 %v5155_v47, %s5010_s10  ;;  %4652 = vrot.lane.b32.xlu0 %v5158_v52, %s5010_s10 }
  0xd9   :  { %4657 = vrot.lane.b32.xlu1 %v5170_v54, %s5010_s10  ;;  %4662 = vrot.lane.b32.xlu0 %v5133_v33, %s5011_s11 }
  0xdd   :  { %4667 = vrot.lane.b32.xlu1 %v5146_v43, %s5011_s11  ;;  %4672 = vrot.lane.b32.xlu0 %v5137_v35, %s5011_s11 }
  0xe1   :  { %4677 = vrot.lane.b32.xlu1 %v5155_v47, %s5011_s11  ;;  %4682 = vrot.lane.b32.xlu0 %v5158_v52, %s5011_s11 }
  0xe5   :  { %4687 = vrot.lane.b32.xlu1 %v5170_v54, %s5011_s11  ;;  %4697 = vrot.lane.b32.xlu0 %v5227_v30, %s5010_s10 }
  0xe9   :  { %4692 = vrot.lane.b32.xlu1 %v5221_v27, %s5010_s10  ;;  %4702 = vrot.lane.b32.xlu0 %v5229_v31, %s5010_s10 }
  0xed   :  { %4707 = vrot.lane.b32.xlu1 %v5235_v34, %s5010_s10  ;;  %4712 = vrot.lane.b32.xlu0 %v5213_v22, %s5011_s11 }
  0xf1   :  { %4722 = vrot.lane.b32.xlu1 %v5219_v26, %s5011_s11  ;;  %4717 = vrot.lane.b32.xlu0 %v5133_v33, %s5012_s12 }
  0xf3   :  { %v4443_v37 = vpop.permute.xlu0 %4442 }
  0xf4   :  { %v4445_v39 = vunpack.i.h.bf16 %v4443_v37  ;;  %v4444_v40 = vunpack.i.l.bf16 %v4443_v37 }
  0xf5   :  { %4727 = vrot.lane.b32.xlu1 %v5146_v43, %s5012_s12  ;;  %4732 = vrot.lane.b32.xlu0 %v5221_v27, %s5011_s11 }
  0xf6   :  { %v269_v46 = vsel %vm268_vm4, %v4444_v40, %v4445_v39 }
  0xf7   :  { %v4448_v41 = vpop.permute.xlu1 %4447  ;;  %v4453_v42 = vpop.permute.xlu0 %4452 }
  0xf8   :  { %v4450_v44 = vunpack.i.h.bf16 %v4448_v41  ;;  %v4449_v45 = vunpack.i.l.bf16 %v4448_v41  ;;  %v4455_v49 = vunpack.i.h.bf16 %v4453_v42  ;;  %v4454_v50 = vunpack.i.l.bf16 %v4453_v42 }
  0xf9   :  { %4737 = vrot.lane.b32.xlu1 %v5227_v30, %s5011_s11  ;;  %4742 = vrot.lane.b32.xlu0 %v5137_v35, %s5012_s12 }
  0xfa   :  { %v270_v48 = vsel %vm268_vm4, %v4449_v45, %v4450_v44  ;;  %v271_v61 = vsel %vm268_vm4, %v4454_v50, %v4455_v49 }
  0xfb   :  { %v4458_v51 = vpop.permute.xlu1 %4457  ;;  %v4463_v53 = vpop.permute.xlu0 %4462  ;;  %v4199_v56 = vpack.c.bf16 %v270_v48, %v269_v46 }
  0xfc   :  { %v4460_v57 = vunpack.i.h.bf16 %v4458_v51  ;;  %v4459_v58 = vunpack.i.l.bf16 %v4458_v51  ;;  %v4465_v59 = vunpack.i.h.bf16 %v4463_v53  ;;  %v4464_v60 = vunpack.i.l.bf16 %v4463_v53 }
  0xfd   :  { %4747 = vrot.lane.b32.xlu1 %v5155_v47, %s5012_s12  ;;  %4752 = vrot.lane.b32.xlu0 %v5229_v31, %s5011_s11 }
  0xfe   :  { %v272_v62 = vsel %vm268_vm4, %v4459_v58, %v4460_v57  ;;  %4200 = vmatpush1.bf16.msk.msra.mxu0 %vm5307_vm6, %v4199_v56  ;;  %v273_v21 = vsel %vm268_vm4, %v4464_v60, %v4465_v59 }
  0xff   :  { %v4468_v63 = vpop.permute.xlu1 %4467  ;;  %v4473_v19 = vpop.permute.xlu0 %4472  ;;  %1313 = vmatprep.subr.bf16.mxu0 %v5006_v10  ;;  %v4202_v20 = vpack.c.bf16 %v272_v62, %v271_v61 }
 0x100   :  { %v4470_v24 = vunpack.i.h.bf16 %v4468_v63  ;;  %v4469_v25 = vunpack.i.l.bf16 %v4468_v63  ;;  %v4475_v32 = vunpack.i.h.bf16 %v4473_v19  ;;  %v4474_v36 = vunpack.i.l.bf16 %v4473_v19 }
 0x101   :  { %4757 = vrot.lane.b32.xlu1 %v5235_v34, %s5011_s11  ;;  %4762 = vrot.lane.b32.xlu0 %v5158_v52, %s5012_s12 }
 0x102   :  { %v274_v29 = vsel %vm268_vm4, %v4469_v25, %v4470_v24  ;;  %4203 = vmatpush1.bf16.msk.msra.mxu0 %vm5307_vm6, %v4202_v20  ;;  %v344_v42 = vsel %vm343_vm7, %v4474_v36, %v4475_v32 }
 0x103   :  { %v4478_v37 = vpop.permute.xlu1 %4477  ;;  %v4483_v38 = vpop.permute.xlu0 %4482  ;;  %1315 = vmatprep.subr.bf16.mxu0 %v5006_v10  ;;  %v4205_v39 = vpack.c.bf16 %v274_v29, %v273_v21  ;;  %v38_v21 = vadd.s32 4294967295, %v5122_v23 }
 0x104   :  { %v4480_v40 = vunpack.i.h.bf16 %v4478_v37  ;;  %v4479_v41 = vunpack.i.l.bf16 %v4478_v37  ;;  %v4485_v45 = vunpack.i.h.bf16 %v4483_v38  ;;  %v4484_v46 = vunpack.i.l.bf16 %v4483_v38 }
 0x105   :  { %4767 = vrot.lane.b32.xlu1 %v5170_v54, %s5012_s12  ;;  %4772 = vrot.lane.b32.xlu0 %v5213_v22, %s5012_s12  ;;  %vm39_vm11 = vcmp.ge.s32.totalorder %v38_v21, 0 }
 0x106   :  { %v345_v44 = vsel %vm343_vm7, %v4479_v41, %v4480_v40  ;;  %4206 = vmatpush1.bf16.msk.msra.mxu0 %vm5307_vm6, %v4205_v39  ;;  %v346_v57 = vsel %vm343_vm7, %v4484_v46, %v4485_v45  ;;  %vm5371_vm12 = vmpackc.low %vm39_vm11, %vm39_vm11  ;;  %v5484_v45 = vld [vmem:[%s7104_s1 + $0x24] ss:$16 sps:$4 sm:$0xff]   ;;  %vm1853_vm11 = vcmask 130048  }
 0x107   :  { %v4488_v48 = vpop.permute.xlu1 %4487  ;;  %v4493_v49 = vpop.permute.xlu0 %4492  ;;  %1317 = vmatprep.subr.bf16.mxu0 %v5006_v10  ;;  %v4208_v51 = vpack.c.bf16 %v345_v44, %v344_v42 }
 0x108   :  { %v4490_v53 = vunpack.i.h.bf16 %v4488_v48  ;;  %v4489_v56 = vunpack.i.l.bf16 %v4488_v48  ;;  %v4495_v59 = vunpack.i.h.bf16 %v4493_v49  ;;  %v4494_v60 = vunpack.i.l.bf16 %v4493_v49 }
 0x109   :  { %4777 = vrot.lane.b32.xlu1 %v5219_v26, %s5012_s12  ;;  %4782 = vrot.lane.b32.xlu0 %v5133_v33, %s5013_s13 }
 0x10a   :  { %v347_v58 = vsel %vm343_vm7, %v4489_v56, %v4490_v53  ;;  %4209 = vmatpush1.bf16.msk.msra.mxu0 %vm5339_vm9, %v4208_v51  ;;  %v348_v33 = vsel %vm343_vm7, %v4494_v60, %v4495_v59 }
 0x10b   :  { %v4498_v61 = vpop.permute.xlu1 %4497  ;;  %v4503_v62 = vpop.permute.xlu0 %4502  ;;  %1319 = vmatprep.subr.bf16.mxu0 %v5006_v10  ;;  %v4211_v63 = vpack.c.bf16 %v347_v58, %v346_v57 }
 0x10c   :  { %v4500_v19 = vunpack.i.h.bf16 %v4498_v61  ;;  %v4499_v20 = vunpack.i.l.bf16 %v4498_v61  ;;  %v4505_v25 = vunpack.i.h.bf16 %v4503_v62  ;;  %v4504_v28 = vunpack.i.l.bf16 %v4503_v62 }
 0x10d   :  { %4787 = vrot.lane.b32.xlu1 %v5146_v43, %s5013_s13  ;;  %4792 = vrot.lane.b32.xlu0 %v5221_v27, %s5012_s12 }
 0x10e   :  { %v349_v24 = vsel %vm343_vm7, %v4499_v20, %v4500_v19  ;;  %4212 = vmatpush1.bf16.msk.msra.mxu0 %vm5339_vm9, %v4211_v63  ;;  %v419_v38 = vsel %vm418_vm10, %v4504_v28, %v4505_v25 }
 0x10f   :  { %v4508_v29 = vpop.permute.xlu1 %4507  ;;  %v4513_v32 = vpop.permute.xlu0 %4512  ;;  %1321 = vmatprep.subr.bf16.mxu0 %v5006_v10  ;;  %v4214_v36 = vpack.c.bf16 %v349_v24, %v348_v33 }
 0x110   :  { %v4510_v37 = vunpack.i.h.bf16 %v4508_v29  ;;  %v4509_v43 = vunpack.i.l.bf16 %v4508_v29  ;;  %v4515_v40 = vunpack.i.h.bf16 %v4513_v32  ;;  %v4514_v41 = vunpack.i.l.bf16 %v4513_v32 }
 0x111   :  { %4797 = vrot.lane.b32.xlu1 %v5227_v30, %s5012_s12  ;;  %4802 = vrot.lane.b32.xlu0 %v5137_v35, %s5013_s13 }
 0x112   :  { %v420_v39 = vsel %vm418_vm10, %v4509_v43, %v4510_v37  ;;  %4215 = vmatpush1.bf16.msk.msra.mxu0 %vm5339_vm9, %v4214_v36  ;;  %v421_v49 = vsel %vm418_vm10, %v4514_v41, %v4515_v40 }
 0x113   :  { %v4518_v42 = vpop.permute.xlu1 %4517  ;;  %v4523_v44 = vpop.permute.xlu0 %4522  ;;  %1323 = vmatprep.subr.bf16.mxu0 %v5006_v10  ;;  %v4217_v46 = vpack.c.bf16 %v420_v39, %v419_v38 }
 0x114   :  { %v4520_v48 = vunpack.i.h.bf16 %v4518_v42  ;;  %v4519_v35 = vunpack.i.l.bf16 %v4518_v42  ;;  %v4525_v53 = vunpack.i.h.bf16 %v4523_v44  ;;  %v4524_v56 = vunpack.i.l.bf16 %v4523_v44 }
 0x115   :  { %4807 = vrot.lane.b32.xlu1 %v5155_v47, %s5013_s13  ;;  %4812 = vrot.lane.b32.xlu0 %v5229_v31, %s5012_s12 }
 0x116   :  { %v422_v51 = vsel %vm418_vm10, %v4519_v35, %v4520_v48  ;;  %4218 = vmatpush1.bf16.msk.msra.mxu0 %vm5371_vm12, %v4217_v46  ;;  %v423_v63 = vsel %vm418_vm10, %v4524_v56, %v4525_v53 }
 0x117   :  { %v4528_v57 = vpop.permute.xlu1 %4527  ;;  %v4533_v58 = vpop.permute.xlu0 %4532  ;;  %1325 = vmatprep.subr.bf16.mxu0 %v5006_v10  ;;  %v4220_v59 = vpack.c.bf16 %v422_v51, %v421_v49 }
 0x118   :  { %v4530_v60 = vunpack.i.h.bf16 %v4528_v57  ;;  %v4529_v61 = vunpack.i.l.bf16 %v4528_v57  ;;  %v4535_v47 = vunpack.i.h.bf16 %v4533_v58  ;;  %v4534_v62 = vunpack.i.l.bf16 %v4533_v58 }
 0x119   :  { %4817 = vrot.lane.b32.xlu1 %v5235_v34, %s5012_s12  ;;  %4822 = vrot.lane.b32.xlu0 %v5158_v52, %s5013_s13 }
 0x11a   :  { %v424_v19 = vsel %vm418_vm10, %v4529_v61, %v4530_v60  ;;  %4221 = vmatpush1.bf16.msk.msra.mxu0 %vm5371_vm12, %v4220_v59  ;;  %v2471_v20 = vsel %vm268_vm4, %v4534_v62, %v4535_v47 }
 0x11b   :  { %v4538_v21 = vpop.permute.xlu1 %4537  ;;  %v4543_v33 = vpop.permute.xlu0 %4542  ;;  %1327 = vmatprep.subr.bf16.mxu0 %v5006_v10  ;;  %v4223_v24 = vpack.c.bf16 %v424_v19, %v423_v63 }
 0x11c   :  { %v4540_v25 = vunpack.i.h.bf16 %v4538_v21  ;;  %v4539_v28 = vunpack.i.l.bf16 %v4538_v21  ;;  %v4545_v29 = vunpack.i.h.bf16 %v4543_v33  ;;  %v4544_v32 = vunpack.i.l.bf16 %v4543_v33 }
 0x11d   :  { %4827 = vrot.lane.b32.xlu1 %v5170_v54, %s5013_s13  ;;  %4832 = vrot.lane.b32.xlu0 %v5213_v22, %s5013_s13 }
 0x11e   :  { %v2472_v52 = vsel %vm268_vm4, %v4539_v28, %v4540_v25  ;;  %4224 = vmatpush1.bf16.msk.msra.mxu0 %vm5371_vm12, %v4223_v24  ;;  %v2473_v36 = vsel %vm268_vm4, %v4544_v32, %v4545_v29 }
 0x11f   :  { %v4548_v37 = vpop.permute.xlu1 %4547  ;;  %v4553_v43 = vpop.permute.xlu0 %4552  ;;  %v4271_v38 = vpack.c.bf16 %v2472_v52, %v2471_v20  ;;  %1329 = vmatprep.subr.bf16.mxu0 %v5006_v10 }
 0x120   :  { %v4550_v39 = vunpack.i.h.bf16 %v4548_v37  ;;  %v4549_v40 = vunpack.i.l.bf16 %v4548_v37  ;;  %v4555_v41 = vunpack.i.h.bf16 %v4553_v43  ;;  %v4554_v42 = vunpack.i.l.bf16 %v4553_v43 }
 0x121   :  { %4837 = vrot.lane.b32.xlu1 %v5219_v26, %s5013_s13  ;;  %4842 = vrot.lane.b32.xlu0 %v5221_v27, %s5013_s13 }
 0x122   :  { %v2474_v54 = vsel %vm268_vm4, %v4549_v40, %v4550_v39  ;;  %4272 = vmatpush1.bf16.msk.msra.mxu1 %vm5307_vm6, %v4271_v38  ;;  %1330 = vmatpush1.bf16.msra.mxu0 %v443_v6  ;;  %v2475_v26 = vsel %vm268_vm4, %v4554_v42, %v4555_v41 }
 0x123   :  { %v4558_v22 = vpop.permute.xlu1 %4557  ;;  %v4563_v44 = vpop.permute.xlu0 %4562  ;;  %2968 = vmatprep.subr.bf16.mxu1 %v5006_v10  ;;  %v4274_v46 = vpack.c.bf16 %v2474_v54, %v2473_v36  ;;  %1331 = vmatprep.subr.bf16.mxu0 %v5006_v10 }
 0x124   :  { %v4560_v48 = vunpack.i.h.bf16 %v4558_v22  ;;  %v4559_v27 = vunpack.i.l.bf16 %v4558_v22  ;;  %v4565_v4 = vunpack.i.h.bf16 %v4563_v44  ;;  %v4564_v6 = vunpack.i.l.bf16 %v4563_v44 }
 0x125   :  { %4847 = vrot.lane.b32.xlu1 %v5227_v30, %s5013_s13  ;;  %4852 = vrot.lane.b32.xlu0 %v5229_v31, %s5013_s13 }
 0x126   :  { %v2476_v2 = vsel %vm268_vm4, %v4559_v27, %v4560_v48  ;;  %4275 = vmatpush1.bf16.msk.msra.mxu1 %vm5307_vm6, %v4274_v46  ;;  %1332 = vmatpush1.bf16.msra.mxu0 %v444_v3  ;;  %v2543_v53 = vsel %vm343_vm7, %v4564_v6, %v4565_v4  ;;  %v42_v27 = vadd.s32 1, %v5122_v23 }
 0x127   :  { %v4568_v35 = vpop.permute.xlu1 %4567  ;;  %v4573_v49 = vpop.permute.xlu0 %4572  ;;  %2970 = vmatprep.subr.bf16.mxu1 %v5006_v10  ;;  %v4277_v51 = vpack.c.bf16 %v2476_v2, %v2475_v26  ;;  %1333 = vmatprep.subr.bf16.mxu0 %v5006_v10 }
 0x128   :  { %v4570_v30 = vunpack.i.h.bf16 %v4568_v35  ;;  %v4569_v31 = vunpack.i.l.bf16 %v4568_v35  ;;  %v4575_v57 = vunpack.i.h.bf16 %v4573_v49  ;;  %v4574_v58 = vunpack.i.l.bf16 %v4573_v49 }
 0x129   :  { %4857 = vrot.lane.b32.xlu1 %v5235_v34, %s5013_s13  ;;  %vm44_vm14 = vcmp.lt.s32.totalorder %v42_v27, 16 }
 0x12a   :  { %v2544_v56 = vsel %vm343_vm7, %v4569_v31, %v4570_v30  ;;  %4278 = vmatpush1.bf16.msk.msra.mxu1 %vm5307_vm6, %v4277_v51  ;;  %1334 = vmatpush1.bf16.msra.mxu0 %v445_v11  ;;  %v2545_v60 = vsel %vm343_vm7, %v4574_v58, %v4575_v57  ;;  %vm5469_vm15 = vmpackc.low %vm44_vm14, %vm44_vm14  ;;  %vm724_vm6 = vcmask 982016   ;;  %vm1949_vm14 = vcmp.eq.s32.totalorder %v5122_v23, 0 }
 0x12b   :  { %v4578_v0 = vpop.permute.xlu1 %4577  ;;  %v4583_v1 = vpop.permute.xlu0 %4582  ;;  %2972 = vmatprep.subr.bf16.mxu1 %v5006_v10  ;;  %v4280_v3 = vpack.c.bf16 %v2544_v56, %v2543_v53  ;;  %1335 = vmatprep.subr.bf16.mxu0 %v5006_v10 }
 0x12c   :  { %v4580_v34 = vunpack.i.h.bf16 %v4578_v0  ;;  %v4579_v59 = vunpack.i.l.bf16 %v4578_v0  ;;  %v4585_v47 = vunpack.i.h.bf16 %v4583_v1  ;;  %v4584_v55 = vunpack.i.l.bf16 %v4583_v1 }
 0x12e   :  { %v2546_v61 = vsel %vm343_vm7, %v4579_v59, %v4580_v34  ;;  %4281 = vmatpush1.bf16.msk.msra.mxu1 %vm5339_vm9, %v4280_v3  ;;  %v2547_v19 = vsel %vm343_vm7, %v4584_v55, %v4585_v47 }
 0x12f   :  { %v4588_v5 = vpop.permute.xlu1 %4587  ;;  %v4593_v7 = vpop.permute.xlu0 %4592  ;;  %2974 = vmatprep.subr.bf16.mxu1 %v5006_v10  ;;  %v4283_v11 = vpack.c.bf16 %v2546_v61, %v2545_v60  ;;  %v5477_v60 = vld [vmem:[%s7104_s1] ss:$16 sps:$4 sm:$0xff]  }
 0x130   :  { %v4590_v62 = vunpack.i.h.bf16 %v4588_v5  ;;  %v4589_v63 = vunpack.i.l.bf16 %v4588_v5  ;;  %v4595_v21 = vunpack.i.h.bf16 %v4593_v7  ;;  %v4594_v33 = vunpack.i.l.bf16 %v4593_v7 }
 0x132   :  { %v2548_v20 = vsel %vm343_vm7, %v4589_v63, %v4590_v62  ;;  %4284 = vmatpush1.bf16.msk.msra.mxu1 %vm5339_vm9, %v4283_v11  ;;  %v2615_v52 = vsel %vm418_vm10, %v4594_v33, %v4595_v21 }
 0x133   :  { %v4598_v24 = vpop.permute.xlu1 %4597  ;;  %v4603_v25 = vpop.permute.xlu0 %4602  ;;  %2976 = vmatprep.subr.bf16.mxu1 %v5006_v10  ;;  %v4286_v28 = vpack.c.bf16 %v2548_v20, %v2547_v19 }
 0x134   :  { %v4600_v29 = vunpack.i.h.bf16 %v4598_v24  ;;  %v4599_v32 = vunpack.i.l.bf16 %v4598_v24  ;;  %v4605_v37 = vunpack.i.h.bf16 %v4603_v25  ;;  %v4604_v43 = vunpack.i.l.bf16 %v4603_v25 }
 0x136   :  { %v2616_v36 = vsel %vm418_vm10, %v4599_v32, %v4600_v29  ;;  %4287 = vmatpush1.bf16.msk.msra.mxu1 %vm5339_vm9, %v4286_v28  ;;  %v2617_v54 = vsel %vm418_vm10, %v4604_v43, %v4605_v37  ;;  %v46_v28 = vadd.s32 2, %v5122_v23  ;;  %vm1232_vm9 = vcmask 392192  }
 0x137   :  { %v4608_v38 = vpop.permute.xlu1 %4607  ;;  %v4613_v39 = vpop.permute.xlu0 %4612  ;;  %2978 = vmatprep.subr.bf16.mxu1 %v5006_v10  ;;  %v4289_v40 = vpack.c.bf16 %v2616_v36, %v2615_v52  ;;  %v5503_v52 = vld [vmem:[%s7104_s1 + $0x20] ss:$16 sps:$4 sm:$0xff]  }
 0x138   :  { %v4610_v41 = vunpack.i.h.bf16 %v4608_v38  ;;  %v4609_v42 = vunpack.i.l.bf16 %v4608_v38  ;;  %v4615_v44 = vunpack.i.h.bf16 %v4613_v39  ;;  %v4614_v46 = vunpack.i.l.bf16 %v4613_v39 }
 0x139   :  { %vm48_vm1 = vcmp.lt.s32.totalorder %v46_v28, 16 }
 0x13a   :  { %v2618_v22 = vsel %vm418_vm10, %v4609_v42, %v4610_v41  ;;  %4290 = vmatpush1.bf16.msk.msra.mxu1 %vm5371_vm12, %v4289_v40  ;;  %v2619_v6 = vsel %vm418_vm10, %v4614_v46, %v4615_v44  ;;  %vm5530_vm2 = vmpackc.low %vm48_vm1, %vm48_vm1  ;;  %v4884_v46 = vld [vmem:[%s7104_s1 + $0xe0] ss:$16 sps:$4 sm:$0xff]  }
 0x13b   :  { %v4618_v26 = vpop.permute.xlu1 %4617  ;;  %v4623_v48 = vpop.permute.xlu0 %4622  ;;  %2980 = vmatprep.subr.bf16.mxu1 %v5006_v10  ;;  %v4292_v50 = vpack.c.bf16 %v2618_v22, %v2617_v54 }
 0x13c   :  { %v4620_v2 = vunpack.i.h.bf16 %v4618_v26  ;;  %v4619_v4 = vunpack.i.l.bf16 %v4618_v26  ;;  %v4625_v49 = vunpack.i.h.bf16 %v4623_v48  ;;  %v4624_v51 = vunpack.i.l.bf16 %v4623_v48 }
 0x13e   :  { %v2620_v35 = vsel %vm418_vm10, %v4619_v4, %v4620_v2  ;;  %4293 = vmatpush1.bf16.msk.msra.mxu1 %vm5371_vm12, %v4292_v50  ;;  %v500_v58 = vsel %vm499_vm13, %v4624_v51, %v4625_v49  ;;  %v4869_v4 = vld [vmem:[%s7104_s1 + $0x40] ss:$16 sps:$4 sm:$0xff]   ;;  %vm1851_vm10 = vcmask 1047680  }
 0x13f   :  { %v4628_v30 = vpop.permute.xlu1 %4627  ;;  %v4633_v31 = vpop.permute.xlu0 %4632  ;;  %2982 = vmatprep.subr.bf16.mxu1 %v5006_v10  ;;  %v4295_v53 = vpack.c.bf16 %v2620_v35, %v2619_v6  ;;  %v4870_v6 = vld [vmem:[%s7104_s1 + $0x64] ss:$16 sps:$4 sm:$0xff]  }
 0x140   :  { %v4630_v56 = vunpack.i.h.bf16 %v4628_v30  ;;  %v4629_v57 = vunpack.i.l.bf16 %v4628_v30  ;;  %v4634_v21 = vunpack.i.l.bf16 %v4633_v31 }
 0x142   :  { %v501_v0 = vsel %vm499_vm13, %v4629_v57, %v4630_v56  ;;  %4296 = vmatpush1.bf16.msk.msra.mxu1 %vm5371_vm12, %v4295_v53  ;;  %vm2096_vm12 = vcmask 793600  }
 0x143   :  { %v4638_v3 = vpop.permute.xlu1 %4637  ;;  %v4643_v34 = vpop.permute.xlu0 %4642  ;;  %2984 = vmatprep.subr.bf16.mxu1 %v5006_v10  ;;  %v4226_v59 = vpack.c.bf16 %v501_v0, %v500_v58 }
 0x144   :  { %v4645_v61 = vunpack.i.h.bf16 %v4643_v34  ;;  %v4644_v47 = vunpack.i.l.bf16 %v4643_v34  ;;  %v4640_v62 = vunpack.i.h.bf16 %v4638_v3  ;;  %v4639_v63 = vunpack.i.l.bf16 %v4638_v3 }
 0x145   :  { %4227 = vmatpush1.bf16.msk.msra.mxu0 %vm5469_vm15, %v4226_v59 }
 0x146   :  { %2985 = vmatpush1.bf16.msra.mxu1 %v2639_v12  ;;  %1530 = vmatprep.subr.bf16.mxu0 %v5006_v10  ;;  %v502_v19 = vsel %vm499_vm13, %v4644_v47, %v4645_v61  ;;  %v4635_v12 = vunpack.i.h.bf16 %v4633_v31  ;;  %v2694_v36 = vsel %vm499_vm13, %v4639_v63, %v4640_v62 }
 0x147   :  { %v4648_v55 = vpop.permute.xlu1 %4647  ;;  %v4653_v5 = vpop.permute.xlu0 %4652  ;;  %2986 = vmatprep.subr.bf16.mxu1 %v5006_v10 }
 0x148   :  { %v4650_v7 = vunpack.i.h.bf16 %v4648_v55  ;;  %v4649_v11 = vunpack.i.l.bf16 %v4648_v55  ;;  %1338 = vmatmul.mubr.bf16.vlgmr.msra.gmra.mrb[0].mxu0 %v5477_v60  ;;  %v4655_v8 = vunpack.i.h.bf16 %v4653_v5  ;;  %v4654_v9 = vunpack.i.l.bf16 %v4653_v5  ;;  %v4872_v5 = vld [vmem:[%s7104_s1 + $0x60] ss:$16 sps:$4 sm:$0xff]  }
 0x149   :  { %1345 = vmatprep.mubr.bf16.mxu0 %v5484_v45  ;;  %v2693_v38 = vsel %vm499_vm13, %v4634_v21, %v4635_v12 }
 0x14a   :  { %v503_v20 = vsel %vm499_vm13, %v4649_v11, %v4650_v7  ;;  %2987 = vmatpush1.bf16.msra.mxu1 %v2640_v15  ;;  %v504_v14 = vsel %vm499_vm13, %v4654_v9, %v4655_v8  ;;  %v4298_v22 = vpack.c.bf16 %v2694_v36, %v2693_v38  ;;  %v5562_v7 = vld [vmem:[%s7104_s1 + $0x84] ss:$16 sps:$4 sm:$0xff]   ;;  %v50_v36 = vadd.s32 3, %v5122_v23 }
 0x14b   :  { %v4229_v33 = vpack.c.bf16 %v503_v20, %v502_v19  ;;  %v4658_v24 = vpop.permute.xlu1 %4657  ;;  %v4663_v25 = vpop.permute.xlu0 %4662  ;;  %2988 = vmatprep.subr.bf16.mxu1 %v5006_v10 }
 0x14c   :  { %v4660_v29 = vunpack.i.h.bf16 %v4658_v24  ;;  %v4659_v32 = vunpack.i.l.bf16 %v4658_v24  ;;  %v4665_v37 = vunpack.i.h.bf16 %v4663_v25  ;;  %v4664_v43 = vunpack.i.l.bf16 %v4663_v25 }
 0x14d   :  { %4230 = vmatpush1.bf16.msk.msra.mxu0 %vm5469_vm15, %v4229_v33  ;;  %vm52_vm4 = vcmp.lt.s32.totalorder %v50_v36, 16 }
 0x14e   :  { %v505_v15 = vsel %vm499_vm13, %v4659_v32, %v4660_v29  ;;  %2989 = vmatpush1.bf16.msra.mxu1 %v2641_v18  ;;  %1532 = vmatprep.subr.bf16.mxu0 %v5006_v10  ;;  %v575_v16 = vsel %vm574_vm0, %v4664_v43, %v4665_v37  ;;  %v5581_v37 = vld [vmem:[%s7104_s1 + $0xa4] ss:$16 sps:$4 sm:$0xff]   ;;  %vm5593_vm5 = vmpackc.low %vm52_vm4, %vm52_vm4 }
 0x14f   :  { %v4232_v39 = vpack.c.bf16 %v505_v15, %v504_v14  ;;  %v4668_v40 = vpop.permute.xlu1 %4667  ;;  %v4673_v41 = vpop.permute.xlu0 %4672  ;;  %2990 = vmatprep.subr.bf16.mxu1 %v5006_v10  ;;  %v4875_v15 = vld [vmem:[%s7104_s1 + $0x80] ss:$16 sps:$4 sm:$0xff]  }
 0x150   :  { %v4670_v42 = vunpack.i.h.bf16 %v4668_v40  ;;  %v4669_v54 = vunpack.i.l.bf16 %v4668_v40  ;;  %1346 = vmatmul.mubr.bf16.gmra.mrb[4].mxu0 %v5503_v52  ;;  %v4675_v18 = vunpack.i.h.bf16 %v4673_v41  ;;  %v4674_v44 = vunpack.i.l.bf16 %v4673_v41 }
 0x151   :  { %4233 = vmatpush1.bf16.msk.msra.mxu0 %vm5469_vm15, %v4232_v39  ;;  %1353 = vmatprep.mubr.bf16.mxu0 %v5511_v13 }
 0x152   :  { %v576_v17 = vsel %vm574_vm0, %v4669_v54, %v4670_v42  ;;  %4299 = vmatpush1.bf16.msk.msra.mxu1 %vm5469_vm15, %v4298_v22  ;;  %1534 = vmatprep.subr.bf16.mxu0 %v5006_v10  ;;  %v577_v35 = vsel %vm574_vm0, %v4674_v44, %v4675_v18 }
 0x153   :  { %v4235_v26 = vpack.c.bf16 %v576_v17, %v575_v16  ;;  %v4678_v48 = vpop.permute.xlu1 %4677  ;;  %v4683_v50 = vpop.permute.xlu0 %4682  ;;  %3185 = vmatprep.subr.bf16.mxu1 %v5006_v10 }
 0x154   :  { %v4680_v27 = vunpack.i.h.bf16 %v4678_v48  ;;  %v4679_v2 = vunpack.i.l.bf16 %v4678_v48  ;;  %v4685_v51 = vunpack.i.h.bf16 %v4683_v50  ;;  %v4684_v30 = vunpack.i.l.bf16 %v4683_v50 }
 0x155   :  { %2993 = vmatmul.mubr.bf16.vlgmr.msra.gmra.mrb[0].mxu1 %v5477_v60  ;;  %4236 = vmatpush1.bf16.msk.msra.mxu0 %vm5530_vm2, %v4235_v26  ;;  %v4894_v26 = vld [vmem:[%s7104_s1 + $0x164] ss:$16 sps:$4 sm:$0xff]  }
 0x156   :  { %v578_v49 = vsel %vm574_vm0, %v4679_v2, %v4680_v27  ;;  %1536 = vmatprep.subr.bf16.mxu0 %v5006_v10  ;;  %3000 = vmatprep.mubr.bf16.mxu1 %v5484_v45  ;;  %v579_v0 = vsel %vm574_vm0, %v4684_v30, %v4685_v51 }
 0x157   :  { %v4238_v31 = vpack.c.bf16 %v578_v49, %v577_v35  ;;  %v4688_v53 = vpop.permute.xlu1 %4687  ;;  %v4698_v56 = vpop.permute.xlu0 %4697  ;;  %v4879_v35 = vld [vmem:[%s7104_s1 + $0xc4] ss:$16 sps:$4 sm:$0xff]  }
 0x158   :  { %v4690_v57 = vunpack.i.h.bf16 %v4688_v53  ;;  %v4689_v58 = vunpack.i.l.bf16 %v4688_v53  ;;  %1354 = vmatmul.mubr.bf16.gmra.mrb[8].mxu0 %v4869_v4  ;;  %v4700_v34 = vunpack.i.h.bf16 %v4698_v56  ;;  %v4699_v59 = vunpack.i.l.bf16 %v4698_v56 }
 0x159   :  { %4239 = vmatpush1.bf16.msk.msra.mxu0 %vm5530_vm2, %v4238_v31  ;;  %1361 = vmatprep.mubr.bf16.mxu0 %v4870_v6 }
 0x15a   :  { %v580_v3 = vsel %vm574_vm0, %v4689_v58, %v4690_v57  ;;  %1538 = vmatprep.subr.bf16.mxu0 %v5006_v10  ;;  %v2696_v11 = vsel %vm499_vm13, %v4699_v59, %v4700_v34 }
 0x15b   :  { %v4241_v60 = vpack.c.bf16 %v580_v3, %v579_v0  ;;  %v4693_v45 = vpop.permute.xlu1 %4692  ;;  %v4703_v61 = vpop.permute.xlu0 %4702 }
 0x15c   :  { %v4695_v47 = vunpack.i.h.bf16 %v4693_v45  ;;  %v4694_v55 = vunpack.i.l.bf16 %v4693_v45  ;;  %v4705_v63 = vunpack.i.h.bf16 %v4703_v61  ;;  %v4704_v19 = vunpack.i.l.bf16 %v4703_v61 }
 0x15d   :  { %3001 = vmatmul.mubr.bf16.gmra.mrb[4].mxu1 %v5503_v52  ;;  %4242 = vmatpush1.bf16.msk.msra.mxu0 %vm5530_vm2, %v4241_v60 }
 0x15e   :  { %v2695_v62 = vsel %vm499_vm13, %v4694_v55, %v4695_v47  ;;  %3008 = vmatprep.mubr.bf16.mxu1 %v5511_v13  ;;  %1540 = vmatprep.subr.bf16.mxu0 %v5006_v10  ;;  %v2697_v33 = vsel %vm499_vm13, %v4704_v19, %v4705_v63 }
 0x15f   :  { %v4301_v20 = vpack.c.bf16 %v2696_v11, %v2695_v62  ;;  %v4708_v8 = vpop.permute.xlu1 %4707  ;;  %v4713_v9 = vpop.permute.xlu0 %4712  ;;  %v5623_v11 = vld [vmem:[%s7104_s1 + $0xe4] ss:$16 sps:$4 sm:$0xff]  }
 0x160   :  { %v4710_v12 = vunpack.i.h.bf16 %v4708_v8  ;;  %v4709_v21 = vunpack.i.l.bf16 %v4708_v8  ;;  %1362 = vmatmul.mubr.bf16.gmra.mrb[12].mxu0 %v4872_v5  ;;  %v4715_v25 = vunpack.i.h.bf16 %v4713_v9  ;;  %v4714_v28 = vunpack.i.l.bf16 %v4713_v9 }
 0x161   :  { %4302 = vmatpush1.bf16.msk.msra.mxu1 %vm5469_vm15, %v4301_v20  ;;  %1369 = vmatprep.mubr.bf16.mxu0 %v5562_v7 }
 0x162   :  { %v2698_v24 = vsel %vm499_vm13, %v4709_v21, %v4710_v12  ;;  %3187 = vmatprep.subr.bf16.mxu1 %v5006_v10  ;;  %v2765_v43 = vsel %vm574_vm0, %v4714_v28, %v4715_v25  ;;  %vm2241_vm13 = vcmask 924672  }
 0x163   :  { %v4304_v29 = vpack.c.bf16 %v2698_v24, %v2697_v33  ;;  %v4723_v32 = vpop.permute.xlu1 %4722  ;;  %v4718_v52 = vpop.permute.xlu0 %4717 }
 0x164   :  { %v4725_v13 = vunpack.i.h.bf16 %v4723_v32  ;;  %v4724_v14 = vunpack.i.l.bf16 %v4723_v32  ;;  %v4720_v39 = vunpack.i.h.bf16 %v4718_v52  ;;  %v4719_v40 = vunpack.i.l.bf16 %v4718_v52 }
 0x165   :  { %3009 = vmatmul.mubr.bf16.gmra.mrb[8].mxu1 %v4869_v4 }
 0x166   :  { %v2766_v38 = vsel %vm574_vm0, %v4724_v14, %v4725_v13  ;;  %4305 = vmatpush1.bf16.msk.msra.mxu1 %vm5469_vm15, %v4304_v29  ;;  %3016 = vmatprep.mubr.bf16.mxu1 %v4870_v6  ;;  %v650_v17 = vsel %vm649_vm3, %v4719_v40, %v4720_v39  ;;  %v4878_v6 = vld [vmem:[%s7104_s1 + $0xa0] ss:$16 sps:$4 sm:$0xff]   ;;  %v54_v13 = vadd.s32 4, %v5122_v23 }
 0x167   :  { %v4307_v41 = vpack.c.bf16 %v2766_v38, %v2765_v43  ;;  %v4728_v42 = vpop.permute.xlu1 %4727  ;;  %v4733_v54 = vpop.permute.xlu0 %4732  ;;  %3189 = vmatprep.subr.bf16.mxu1 %v5006_v10 }
 0x168   :  { %v4730_v22 = vunpack.i.h.bf16 %v4728_v42  ;;  %v4729_v16 = vunpack.i.l.bf16 %v4728_v42  ;;  %1370 = vmatmul.mubr.bf16.gmra.mrb[16].mxu0 %v4875_v15  ;;  %v4735_v44 = vunpack.i.h.bf16 %v4733_v54  ;;  %v4734_v1 = vunpack.i.l.bf16 %v4733_v54 }
 0x169   :  { %1377 = vmatprep.mubr.bf16.mxu0 %v5581_v37  ;;  %vm56_vm7 = vcmp.lt.s32.totalorder %v54_v13, 16 }
 0x16a   :  { %v651_v18 = vsel %vm649_vm3, %v4729_v16, %v4730_v22  ;;  %4308 = vmatpush1.bf16.msk.msra.mxu1 %vm5530_vm2, %v4307_v41  ;;  %v2767_v49 = vsel %vm574_vm0, %v4734_v1, %v4735_v44  ;;  %vm5654_vm8 = vmpackc.low %vm56_vm7, %vm56_vm7 }
 0x16b   :  { %v4244_v48 = vpack.c.bf16 %v651_v18, %v650_v17  ;;  %v4738_v50 = vpop.permute.xlu1 %4737  ;;  %v4743_v27 = vpop.permute.xlu0 %4742  ;;  %3191 = vmatprep.subr.bf16.mxu1 %v5006_v10 }
 0x16c   :  { %v4740_v2 = vunpack.i.h.bf16 %v4738_v50  ;;  %v4739_v4 = vunpack.i.l.bf16 %v4738_v50  ;;  %v4745_v30 = vunpack.i.h.bf16 %v4743_v27  ;;  %v4744_v31 = vunpack.i.l.bf16 %v4743_v27 }
 0x16d   :  { %3017 = vmatmul.mubr.bf16.gmra.mrb[12].mxu1 %v4872_v5  ;;  %4245 = vmatpush1.bf16.msk.msra.mxu0 %vm5593_vm5, %v4244_v48  ;;  %v4903_v48 = vld [vmem:[%s7104_s1 + $0x1c4] ss:$16 sps:$4 sm:$0xff]  }
 0x16e   :  { %v2768_v51 = vsel %vm574_vm0, %v4739_v4, %v4740_v2  ;;  %3024 = vmatprep.mubr.bf16.mxu1 %v5562_v7  ;;  %1542 = vmatprep.subr.bf16.mxu0 %v5006_v10  ;;  %v652_v3 = vsel %vm649_vm3, %v4744_v31, %v4745_v30  ;;  %v4881_v7 = vld [vmem:[%s7104_s1 + $0xc0] ss:$16 sps:$4 sm:$0xff]  }
 0x16f   :  { %v4310_v53 = vpack.c.bf16 %v2768_v51, %v2767_v49  ;;  %v4748_v56 = vpop.permute.xlu1 %4747  ;;  %v4753_v57 = vpop.permute.xlu0 %4752  ;;  %v4888_v49 = vld [vmem:[%s7104_s1 + $0x124] ss:$16 sps:$4 sm:$0xff]  }
 0x170   :  { %v4750_v58 = vunpack.i.h.bf16 %v4748_v56  ;;  %v4749_v0 = vunpack.i.l.bf16 %v4748_v56  ;;  %1378 = vmatmul.mubr.bf16.gmra.mrb[20].mxu0 %v4878_v6  ;;  %v4755_v59 = vunpack.i.h.bf16 %v4753_v57  ;;  %v4754_v60 = vunpack.i.l.bf16 %v4753_v57 }
 0x171   :  { %4311 = vmatpush1.bf16.msk.msra.mxu1 %vm5530_vm2, %v4310_v53  ;;  %1385 = vmatprep.mubr.bf16.mxu0 %v4879_v35 }
 0x172   :  { %v653_v34 = vsel %vm649_vm3, %v4749_v0, %v4750_v58  ;;  %3193 = vmatprep.subr.bf16.mxu1 %v5006_v10  ;;  %v2769_v62 = vsel %vm574_vm0, %v4754_v60, %v4755_v59 }
 0x173   :  { %v4247_v45 = vpack.c.bf16 %v653_v34, %v652_v3  ;;  %v4758_v61 = vpop.permute.xlu1 %4757  ;;  %v4763_v47 = vpop.permute.xlu0 %4762 }
 0x174   :  { %v4760_v55 = vunpack.i.h.bf16 %v4758_v61  ;;  %v4759_v5 = vunpack.i.l.bf16 %v4758_v61  ;;  %v4765_v19 = vunpack.i.h.bf16 %v4763_v47  ;;  %v4764_v20 = vunpack.i.l.bf16 %v4763_v47 }
 0x175   :  { %3025 = vmatmul.mubr.bf16.gmra.mrb[16].mxu1 %v4875_v15  ;;  %4248 = vmatpush1.bf16.msk.msra.mxu0 %vm5593_vm5, %v4247_v45 }
 0x176   :  { %v2770_v63 = vsel %vm574_vm0, %v4759_v5, %v4760_v55  ;;  %3032 = vmatprep.mubr.bf16.mxu1 %v5581_v37  ;;  %1544 = vmatprep.subr.bf16.mxu0 %v5006_v10  ;;  %v654_v24 = vsel %vm649_vm3, %v4764_v20, %v4765_v19  ;;  %v5644_v37 = vld [vmem:[%s7104_s1 + $0x104] ss:$16 sps:$4 sm:$0xff]  }
 0x177   :  { %v4313_v8 = vpack.c.bf16 %v2770_v63, %v2769_v62  ;;  %v4768_v9 = vpop.permute.xlu1 %4767  ;;  %v4773_v12 = vpop.permute.xlu0 %4772  ;;  %v4891_v62 = vld [vmem:[%s7104_s1 + $0x144] ss:$16 sps:$4 sm:$0xff]  }
 0x178   :  { %v4770_v21 = vunpack.i.h.bf16 %v4768_v9  ;;  %v4769_v33 = vunpack.i.l.bf16 %v4768_v9  ;;  %1386 = vmatmul.mubr.bf16.gmra.mrb[24].mxu0 %v4881_v7  ;;  %v4775_v28 = vunpack.i.h.bf16 %v4773_v12  ;;  %v4774_v29 = vunpack.i.l.bf16 %v4773_v12 }
 0x179   :  { %4314 = vmatpush1.bf16.msk.msra.mxu1 %vm5530_vm2, %v4313_v8  ;;  %1393 = vmatprep.mubr.bf16.mxu0 %v5623_v11 }
 0x17a   :  { %v655_v25 = vsel %vm649_vm3, %v4769_v33, %v4770_v21  ;;  %3195 = vmatprep.subr.bf16.mxu1 %v5006_v10  ;;  %v2837_v43 = vsel %vm649_vm3, %v4774_v29, %v4775_v28 }
 0x17b   :  { %v4250_v32 = vpack.c.bf16 %v655_v25, %v654_v24  ;;  %v4778_v52 = vpop.permute.xlu1 %4777  ;;  %v4783_v36 = vpop.permute.xlu0 %4782 }
 0x17c   :  { %v4780_v14 = vunpack.i.h.bf16 %v4778_v52  ;;  %v4779_v15 = vunpack.i.l.bf16 %v4778_v52  ;;  %v4785_v39 = vunpack.i.h.bf16 %v4783_v36  ;;  %v4784_v40 = vunpack.i.l.bf16 %v4783_v36 }
 0x17d   :  { %3033 = vmatmul.mubr.bf16.gmra.mrb[20].mxu1 %v4878_v6  ;;  %4251 = vmatpush1.bf16.msk.msra.mxu0 %vm5593_vm5, %v4250_v32 }
 0x17e   :  { %v2838_v38 = vsel %vm649_vm3, %v4779_v15, %v4780_v14  ;;  %3040 = vmatprep.mubr.bf16.mxu1 %v4879_v35  ;;  %1546 = vmatprep.subr.bf16.mxu0 %v5006_v10  ;;  %v725_v17 = vsel %vm724_vm6, %v4784_v40, %v4785_v39  ;;  %v4887_v35 = vld [vmem:[%s7104_s1 + $0x100] ss:$16 sps:$4 sm:$0xff]  }
 0x17f   :  { %v4316_v41 = vpack.c.bf16 %v2838_v38, %v2837_v43  ;;  %v4788_v42 = vpop.permute.xlu1 %4787  ;;  %v4793_v54 = vpop.permute.xlu0 %4792 }
 0x180   :  { %v4790_v22 = vunpack.i.h.bf16 %v4788_v42  ;;  %v4789_v16 = vunpack.i.l.bf16 %v4788_v42  ;;  %1394 = vmatmul.mubr.bf16.gmra.mrb[28].mxu0 %v4884_v46  ;;  %v4795_v44 = vunpack.i.h.bf16 %v4793_v54  ;;  %v4794_v1 = vunpack.i.l.bf16 %v4793_v54 }
 0x181   :  { %4317 = vmatpush1.bf16.msk.msra.mxu1 %vm5593_vm5, %v4316_v41  ;;  %1401 = vmatprep.mubr.bf16.mxu0 %v5644_v37 }
 0x182   :  { %v726_v18 = vsel %vm724_vm6, %v4789_v16, %v4790_v22  ;;  %3197 = vmatprep.subr.bf16.mxu1 %v5006_v10  ;;  %v2839_v51 = vsel %vm649_vm3, %v4794_v1, %v4795_v44 }
 0x183   :  { %v4253_v50 = vpack.c.bf16 %v726_v18, %v725_v17  ;;  %v4798_v27 = vpop.permute.xlu1 %4797  ;;  %v4803_v2 = vpop.permute.xlu0 %4802 }
 0x184   :  { %v4800_v4 = vunpack.i.h.bf16 %v4798_v27  ;;  %v4799_v6 = vunpack.i.l.bf16 %v4798_v27  ;;  %v4805_v31 = vunpack.i.h.bf16 %v4803_v2  ;;  %v4804_v53 = vunpack.i.l.bf16 %v4803_v2 }
 0x185   :  { %3041 = vmatmul.mubr.bf16.gmra.mrb[24].mxu1 %v4881_v7  ;;  %4254 = vmatpush1.bf16.msk.msra.mxu0 %vm5654_vm8, %v4253_v50 }
 0x186   :  { %v2840_v30 = vsel %vm649_vm3, %v4799_v6, %v4800_v4  ;;  %3048 = vmatprep.mubr.bf16.mxu1 %v5623_v11  ;;  %1548 = vmatprep.subr.bf16.mxu0 %v5006_v10  ;;  %v727_v34 = vsel %vm724_vm6, %v4804_v53, %v4805_v31  ;;  %v4890_v11 = vld [vmem:[%s7104_s1 + $0x120] ss:$16 sps:$4 sm:$0xff]   ;;  %v4897_v6 = vld [vmem:[%s7104_s1 + $0x184] ss:$16 sps:$4 sm:$0xff]  }
 0x187   :  { %v4319_v56 = vpack.c.bf16 %v2840_v30, %v2839_v51  ;;  %v4808_v57 = vpop.permute.xlu1 %4807  ;;  %v4813_v58 = vpop.permute.xlu0 %4812  ;;  %v4896_v4 = vld [vmem:[%s7104_s1 + $0x160] ss:$16 sps:$4 sm:$0xff]   ;;  %v4900_v31 = vld [vmem:[%s7104_s1 + $0x1a4] ss:$16 sps:$4 sm:$0xff]  }
 0x188   :  { %v4810_v0 = vunpack.i.h.bf16 %v4808_v57  ;;  %v4809_v3 = vunpack.i.l.bf16 %v4808_v57  ;;  %1402 = vmatmul.mubr.bf16.gmra.mrb[32].mxu0 %v4887_v35  ;;  %v4815_v60 = vunpack.i.h.bf16 %v4813_v58  ;;  %v4814_v45 = vunpack.i.l.bf16 %v4813_v58  ;;  %v4899_v30 = vld [vmem:[%s7104_s1 + $0x180] ss:$16 sps:$4 sm:$0xff]   ;;  %v4909_v58 = vld [vmem:[%s7104_s1 + $0x204] ss:$16 sps:$4 sm:$0xff]  }
 0x189   :  { %4320 = vmatpush1.bf16.msk.msra.mxu1 %vm5593_vm5, %v4319_v56  ;;  %1409 = vmatprep.mubr.bf16.mxu0 %v4888_v49  ;;  %v4905_v53 = vld [vmem:[%s7104_s1 + $0x1c0] ss:$16 sps:$4 sm:$0xff]   ;;  %v4906_v56 = vld [vmem:[%s7104_s1 + $0x1e4] ss:$16 sps:$4 sm:$0xff]  }
 0x18a   :  { %v728_v59 = vsel %vm724_vm6, %v4809_v3, %v4810_v0  ;;  %3199 = vmatprep.subr.bf16.mxu1 %v5006_v10  ;;  %v2841_v63 = vsel %vm649_vm3, %v4814_v45, %v4815_v60  ;;  %v4908_v57 = vld [vmem:[%s7104_s1 + $0x1e0] ss:$16 sps:$4 sm:$0xff]   ;;  %v4912_v3 = vld [vmem:[%s7104_s1 + $0x224] ss:$16 sps:$4 sm:$0xff]  }
 0x18b   :  { %v4256_v61 = vpack.c.bf16 %v728_v59, %v727_v34  ;;  %v4818_v47 = vpop.permute.xlu1 %4817  ;;  %v4823_v55 = vpop.permute.xlu0 %4822  ;;  %v4911_v0 = vld [vmem:[%s7104_s1 + $0x200] ss:$16 sps:$4 sm:$0xff]   ;;  %v4915_v59 = vld [vmem:[%s7104_s1 + $0x244] ss:$16 sps:$4 sm:$0xff]  }
 0x18c   :  { %v4820_v5 = vunpack.i.h.bf16 %v4818_v47  ;;  %v4819_v7 = vunpack.i.l.bf16 %v4818_v47  ;;  %v4825_v20 = vunpack.i.h.bf16 %v4823_v55  ;;  %v4824_v8 = vunpack.i.l.bf16 %v4823_v55  ;;  %v4914_v34 = vld [vmem:[%s7104_s1 + $0x220] ss:$16 sps:$4 sm:$0xff]   ;;  %v4918_v45 = vld [vmem:[%s7104_s1 + $0x264] ss:$16 sps:$4 sm:$0xff]  }
 0x18d   :  { %3049 = vmatmul.mubr.bf16.gmra.mrb[28].mxu1 %v4884_v46  ;;  %4257 = vmatpush1.bf16.msk.msra.mxu0 %vm5654_vm8, %v4256_v61  ;;  %v4893_v46 = vld [vmem:[%s7104_s1 + $0x140] ss:$16 sps:$4 sm:$0xff]   ;;  %v4921_v47 = vld [vmem:[%s7104_s1 + $0x284] ss:$16 sps:$4 sm:$0xff]  }
 0x18e   :  { %v2842_v19 = vsel %vm649_vm3, %v4819_v7, %v4820_v5  ;;  %3056 = vmatprep.mubr.bf16.mxu1 %v5644_v37  ;;  %1550 = vmatprep.subr.bf16.mxu0 %v5006_v10  ;;  %v729_v25 = vsel %vm724_vm6, %v4824_v8, %v4825_v20  ;;  %v4917_v60 = vld [vmem:[%s7104_s1 + $0x240] ss:$16 sps:$4 sm:$0xff]   ;;  %v4924_v5 = vld [vmem:[%s7104_s1 + $0x2a4] ss:$16 sps:$4 sm:$0xff]   ;;  %v4935_v20 = vld [vmem:[%s7104_s1 + $0xc] ss:$16 sps:$4 sm:$0xff]  }
 0x18f   :  { %v4322_v9 = vpack.c.bf16 %v2842_v19, %v2841_v63  ;;  %v4828_v12 = vpop.permute.xlu1 %4827  ;;  %v4833_v21 = vpop.permute.xlu0 %4832  ;;  %v4920_v61 = vld [vmem:[%s7104_s1 + $0x260] ss:$16 sps:$4 sm:$0xff]   ;;  %v4930_v63 = vld [vmem:[%s7104_s1 + $0x2e4] ss:$16 sps:$4 sm:$0xff]   ;;  %v4933_v8 = vld [vmem:[%s7104_s1 + $0x8] ss:$16 sps:$4 sm:$0xff]  }
 0x190   :  { %v4830_v33 = vunpack.i.h.bf16 %v4828_v12  ;;  %v4829_v24 = vunpack.i.l.bf16 %v4828_v12  ;;  %1410 = vmatmul.mubr.bf16.gmra.mrb[36].mxu0 %v4890_v11  ;;  %v4835_v29 = vunpack.i.h.bf16 %v4833_v21  ;;  %v4834_v32 = vunpack.i.l.bf16 %v4833_v21  ;;  %v4923_v55 = vld [vmem:[%s7104_s1 + $0x280] ss:$16 sps:$4 sm:$0xff]   ;;  %v4938_v12 = vld [vmem:[%s7104_s1 + $0x28] ss:$16 sps:$4 sm:$0xff]   ;;  %v4939_v21 = vld [vmem:[%s7104_s1 + $0x4c] ss:$16 sps:$4 sm:$0xff]  }
 0x191   :  { %4323 = vmatpush1.bf16.msk.msra.mxu1 %vm5593_vm5, %v4322_v9  ;;  %1417 = vmatprep.mubr.bf16.mxu0 %v4891_v62  ;;  %v4926_v7 = vld [vmem:[%s7104_s1 + $0x2a0] ss:$16 sps:$4 sm:$0xff]   ;;  %v4936_v9 = vld [vmem:[%s7104_s1 + $0x2c] ss:$16 sps:$4 sm:$0xff]  }
 0x192   :  { %v730_v28 = vsel %vm724_vm6, %v4829_v24, %v4830_v33  ;;  %3201 = vmatprep.subr.bf16.mxu1 %v5006_v10  ;;  %v2909_v37 = vsel %vm724_vm6, %v4834_v32, %v4835_v29  ;;  %v4932_v19 = vld [vmem:[%s7104_s1 + $0x2e0] ss:$16 sps:$4 sm:$0xff]   ;;  %v4941_v33 = vld [vmem:[%s7104_s1 + $0x48] ss:$16 sps:$4 sm:$0xff]   ;;  %v4942_v24 = vld [vmem:[%s7104_s1 + $0x6c] ss:$16 sps:$4 sm:$0xff]  }
 0x193   :  { %v4259_v52 = vpack.c.bf16 %v730_v28, %v729_v25  ;;  %v4838_v36 = vpop.permute.xlu1 %4837  ;;  %v4843_v13 = vpop.permute.xlu0 %4842  ;;  %v4944_v29 = vld [vmem:[%s7104_s1 + $0x68] ss:$16 sps:$4 sm:$0xff]  }
 0x194   :  { %v4840_v14 = vunpack.i.h.bf16 %v4838_v36  ;;  %v4839_v15 = vunpack.i.l.bf16 %v4838_v36  ;;  %v4845_v38 = vunpack.i.h.bf16 %v4843_v13  ;;  %v4844_v39 = vunpack.i.l.bf16 %v4843_v13 }
 0x195   :  { %3057 = vmatmul.mubr.bf16.gmra.mrb[32].mxu1 %v4887_v35  ;;  %4260 = vmatpush1.bf16.msk.msra.mxu0 %vm5654_vm8, %v4259_v52  ;;  %v4945_v52 = vld [vmem:[%s7104_s1 + $0x8c] ss:$16 sps:$4 sm:$0xff]  }
 0x196   :  { %v2910_v43 = vsel %vm724_vm6, %v4839_v15, %v4840_v14  ;;  %3064 = vmatprep.mubr.bf16.mxu1 %v4888_v49  ;;  %v2911_v16 = vsel %vm724_vm6, %v4844_v39, %v4845_v38  ;;  %v4947_v15 = vld [vmem:[%s7104_s1 + $0x88] ss:$16 sps:$4 sm:$0xff]  }
 0x197   :  { %v4325_v40 = vpack.c.bf16 %v2910_v43, %v2909_v37  ;;  %v4848_v41 = vpop.permute.xlu1 %4847  ;;  %v4853_v42 = vpop.permute.xlu0 %4852 }
 0x198   :  { %v4850_v54 = vunpack.i.h.bf16 %v4848_v41  ;;  %v4849_v22 = vunpack.i.l.bf16 %v4848_v41  ;;  %1418 = vmatmul.mubr.bf16.gmra.mrb[40].mxu0 %v4893_v46  ;;  %v4855_v18 = vunpack.i.h.bf16 %v4853_v42  ;;  %v4854_v44 = vunpack.i.l.bf16 %v4853_v42 }
 0x199   :  { %4326 = vmatpush1.bf16.msk.msra.mxu1 %vm5654_vm8, %v4325_v40  ;;  %1425 = vmatprep.mubr.bf16.mxu0 %v4894_v26 }
 0x19a   :  { %v2912_v17 = vsel %vm724_vm6, %v4849_v22, %v4850_v54  ;;  %3203 = vmatprep.subr.bf16.mxu1 %v5006_v10  ;;  %v2913_v35 = vsel %vm724_vm6, %v4854_v44, %v4855_v18  ;;  %v4950_v54 = vld [vmem:[%s7104_s1 + $0xa8] ss:$16 sps:$4 sm:$0xff]  }
 0x19b   :  { %v4328_v1 = vpack.c.bf16 %v2912_v17, %v2911_v16  ;;  %v4858_v50 = vpop.permute.xlu1 %4857  ;;  %v4951_v16 = vld [vmem:[%s7104_s1 + $0xcc] ss:$16 sps:$4 sm:$0xff]  }
 0x19c   :  { %v4860_v27 = vunpack.i.h.bf16 %v4858_v50  ;;  %v4859_v2 = vunpack.i.l.bf16 %v4858_v50 }
 0x19d   :  { %3065 = vmatmul.mubr.bf16.gmra.mrb[36].mxu1 %v4890_v11  ;;  %v4927_v11 = vld [vmem:[%s7104_s1 + $0x2c4] ss:$16 sps:$4 sm:$0xff]  }
 0x19e   :  { %v2914_v49 = vsel %vm724_vm6, %v4859_v2, %v4860_v27  ;;  %4329 = vmatpush1.bf16.msk.msra.mxu1 %vm5654_vm8, %v4328_v1  ;;  %3072 = vmatprep.mubr.bf16.mxu1 %v4891_v62  ;;  %v4929_v62 = vld [vmem:[%s7104_s1 + $0x2c0] ss:$16 sps:$4 sm:$0xff]  }
 0x19f   :  { %v4331_v51 = vpack.c.bf16 %v2914_v49, %v2913_v35  ;;  %3205 = vmatprep.subr.bf16.mxu1 %v5006_v10  ;;  %v4902_v10 = vld [vmem:[%s7104_s1 + $0x1a0] ss:$16 sps:$4 sm:$0xff]   ;;  %v4954_v35 = vld [vmem:[%s7104_s1 + $0xec] ss:$16 sps:$4 sm:$0xff]  }
 0x1a0   :  { %1426 = vmatmul.mubr.bf16.gmra.mrb[44].mxu0 %v4896_v4 }
 0x1a1   :  { %1433 = vmatprep.mubr.bf16.mxu0 %v4897_v6 }
 0x1a2   :  { %4332 = vmatpush1.bf16.msk.msra.mxu1 %vm5654_vm8, %v4331_v51 }
 0x1a5   :  { %3073 = vmatmul.mubr.bf16.gmra.mrb[40].mxu1 %v4893_v46 }
 0x1a6   :  { %3080 = vmatprep.mubr.bf16.mxu1 %v4894_v26  ;;  %v4948_v26 = vld [vmem:[%s7104_s1 + $0xac] ss:$16 sps:$4 sm:$0xff]  }
 0x1a8   :  { %1434 = vmatmul.mubr.bf16.gmra.mrb[48].mxu0 %v4899_v30 }
 0x1a9   :  { %1441 = vmatprep.mubr.bf16.mxu0 %v4900_v31 }
 0x1ad   :  { %3081 = vmatmul.mubr.bf16.gmra.mrb[44].mxu1 %v4896_v4  ;;  %v4953_v4 = vld [vmem:[%s7104_s1 + $0xc8] ss:$16 sps:$4 sm:$0xff]  }
 0x1ae   :  { %3088 = vmatprep.mubr.bf16.mxu1 %v4897_v6 }
 0x1b0   :  { %1442 = vmatmul.mubr.bf16.gmra.mrb[52].mxu0 %v4902_v10 }
 0x1b1   :  { %1449 = vmatprep.mubr.bf16.mxu0 %v4903_v48 }
 0x1b5   :  { %3089 = vmatmul.mubr.bf16.gmra.mrb[48].mxu1 %v4899_v30 }
 0x1b6   :  { %3096 = vmatprep.mubr.bf16.mxu1 %v4900_v31 }
 0x1b8   :  { %1450 = vmatmul.mubr.bf16.gmra.mrb[56].mxu0 %v4905_v53 }
 0x1b9   :  { %1457 = vmatprep.mubr.bf16.mxu0 %v4906_v56 }
 0x1bd   :  { %3097 = vmatmul.mubr.bf16.gmra.mrb[52].mxu1 %v4902_v10 }
 0x1be   :  { %3104 = vmatprep.mubr.bf16.mxu1 %v4903_v48 }
 0x1c0   :  { %1458 = vmatmul.mubr.bf16.gmra.mrb[60].mxu0 %v4908_v57 }
 0x1c1   :  { %1465 = vmatprep.mubr.bf16.mxu0 %v4909_v58 }
 0x1c5   :  { %3105 = vmatmul.mubr.bf16.gmra.mrb[56].mxu1 %v4905_v53 }
 0x1c6   :  { %3112 = vmatprep.mubr.bf16.mxu1 %v4906_v56  ;;  %v4956_v56 = vld [vmem:[%s7104_s1 + $0xe8] ss:$16 sps:$4 sm:$0xff]  }
 0x1c8   :  { %1466 = vmatmul.mubr.bf16.gmra.mrb[64].mxu0 %v4911_v0 }
 0x1c9   :  { %1473 = vmatprep.mubr.bf16.mxu0 %v4912_v3 }
 0x1cd   :  { %3113 = vmatmul.mubr.bf16.gmra.mrb[60].mxu1 %v4908_v57 }
 0x1ce   :  { %3120 = vmatprep.mubr.bf16.mxu1 %v4909_v58  ;;  %v4957_v58 = vld [vmem:[%s7104_s1 + $0x10c] ss:$16 sps:$4 sm:$0xff]  }
 0x1d0   :  { %1474 = vmatmul.mubr.bf16.gmra.mrb[68].mxu0 %v4914_v34 }
 0x1d1   :  { %1481 = vmatprep.mubr.bf16.mxu0 %v4915_v59 }
 0x1d5   :  { %3121 = vmatmul.mubr.bf16.gmra.mrb[64].mxu1 %v4911_v0 }
 0x1d6   :  { %3128 = vmatprep.mubr.bf16.mxu1 %v4912_v3 }
 0x1d8   :  { %1482 = vmatmul.mubr.bf16.gmra.mrb[72].mxu0 %v4917_v60 }
 0x1d9   :  { %1489 = vmatprep.mubr.bf16.mxu0 %v4918_v45 }
 0x1dd   :  { %3129 = vmatmul.mubr.bf16.gmra.mrb[68].mxu1 %v4914_v34 }
 0x1de   :  { %3136 = vmatprep.mubr.bf16.mxu1 %v4915_v59 }
 0x1e0   :  { %1490 = vmatmul.mubr.bf16.gmra.mrb[76].mxu0 %v4920_v61 }
 0x1e1   :  { %1497 = vmatprep.mubr.bf16.mxu0 %v4921_v47 }
 0x1e5   :  { %3137 = vmatmul.mubr.bf16.gmra.mrb[72].mxu1 %v4917_v60 }
 0x1e6   :  { %3144 = vmatprep.mubr.bf16.mxu1 %v4918_v45 }
 0x1e8   :  { %1498 = vmatmul.mubr.bf16.gmra.mrb[80].mxu0 %v4923_v55 }
 0x1e9   :  { %1505 = vmatprep.mubr.bf16.mxu0 %v4924_v5 }
 0x1ed   :  { %3145 = vmatmul.mubr.bf16.gmra.mrb[76].mxu1 %v4920_v61 }
 0x1ee   :  { %3152 = vmatprep.mubr.bf16.mxu1 %v4921_v47  ;;  %v4959_v47 = vld [vmem:[%s7104_s1 + $0x108] ss:$16 sps:$4 sm:$0xff]  }
 0x1f0   :  { %1506 = vmatmul.mubr.bf16.gmra.mrb[84].mxu0 %v4926_v7 }
 0x1f1   :  { %1513 = vmatprep.mubr.bf16.mxu0 %v4927_v11 }
 0x1f5   :  { %3153 = vmatmul.mubr.bf16.gmra.mrb[80].mxu1 %v4923_v55 }
 0x1f6   :  { %3160 = vmatprep.mubr.bf16.mxu1 %v4924_v5  ;;  %v4960_v5 = vld [vmem:[%s7104_s1 + $0x12c] ss:$16 sps:$4 sm:$0xff]  }
 0x1f8   :  { %1514 = vmatmul.mubr.bf16.gmra.mrb[88].mxu0 %v4929_v62 }
 0x1f9   :  { %1521 = vmatprep.mubr.bf16.mxu0 %v4930_v63 }
 0x1fd   :  { %3161 = vmatmul.mubr.bf16.gmra.mrb[84].mxu1 %v4926_v7 }
 0x1fe   :  { %3168 = vmatprep.mubr.bf16.mxu1 %v4927_v11 }
 0x200   :  { %1522 = vmatmul.mubr.bf16.gmra.mrb[92].mxu0 %v4932_v19 }
 0x201   :  { %4111 = vmatprep.mubr.msk.bf16.mxu0 %vm1232_vm9, %v4935_v20 }
 0x205   :  { %3169 = vmatmul.mubr.bf16.gmra.mrb[88].mxu1 %v4929_v62 }
 0x206   :  { %3176 = vmatprep.mubr.bf16.mxu1 %v4930_v63 }
 0x208   :  { %1563 = vmatmul.mubr.bf16.vlgmr.msra.gmra.mrb[96].mxu0 %v4933_v8 }
 0x209   :  { %4112 = vmatprep.mubr.msk.bf16.mxu0 %vm1232_vm9, %v4936_v9 }
 0x20d   :  { %3177 = vmatmul.mubr.bf16.gmra.mrb[92].mxu1 %v4932_v19 }
 0x20e   :  { %4141 = vmatprep.mubr.msk.bf16.mxu1 %vm1232_vm9, %v4935_v20 }
 0x210   :  { %1571 = vmatmul.mubr.bf16.gmra.mrb[100].mxu0 %v4938_v12 }
 0x211   :  { %4113 = vmatprep.mubr.msk.bf16.mxu0 %vm1232_vm9, %v4939_v21 }
 0x215   :  { %3218 = vmatmul.mubr.bf16.vlgmr.msra.gmra.mrb[96].mxu1 %v4933_v8 }
 0x216   :  { %4142 = vmatprep.mubr.msk.bf16.mxu1 %vm1232_vm9, %v4936_v9  ;;  %v4962_v9 = vld [vmem:[%s7104_s1 + $0x128] ss:$16 sps:$4 sm:$0xff]  }
 0x218   :  { %1579 = vmatmul.mubr.bf16.gmra.mrb[104].mxu0 %v4941_v33 }
 0x219   :  { %4114 = vmatprep.mubr.msk.bf16.mxu0 %vm1232_vm9, %v4942_v24 }
 0x21b   :  { %v5817_v25 = vpop.f32.mrb[0].mxu0 }
 0x21c   :  { %v1341_v28 = vpop.f32.mrb[1].mxu0 }
 0x21d   :  { %3226 = vmatmul.mubr.bf16.gmra.mrb[100].mxu1 %v4938_v12  ;;  %v5822_v32 = vpop.f32.mrb[2].mxu0 }
 0x21e   :  { %v1344_v36 = vpop.f32.mrb[3].mxu0  ;;  %4143 = vmatprep.mubr.msk.bf16.mxu1 %vm1232_vm9, %v4939_v21  ;;  %v4963_v21 = vld [vmem:[%s7104_s1 + $0x14c] ss:$16 sps:$4 sm:$0xff]  }
 0x220   :  { %1587 = vmatmul.mubr.bf16.gmra.mrb[108].mxu0 %v4944_v29 }
 0x221   :  { %4115 = vmatprep.mubr.msk.bf16.mxu0 %vm1232_vm9, %v4945_v52 }
 0x223   :  { %v5829_v13 = vpop.f32.mrb[4].mxu0 }
 0x224   :  { %v1349_v14 = vpop.f32.mrb[5].mxu0 }
 0x225   :  { %3234 = vmatmul.mubr.bf16.gmra.mrb[104].mxu1 %v4941_v33  ;;  %v5834_v46 = vpop.f32.mrb[6].mxu0 }
 0x226   :  { %v1352_v37 = vpop.f32.mrb[7].mxu0  ;;  %4144 = vmatprep.mubr.msk.bf16.mxu1 %vm1232_vm9, %v4942_v24 }
 0x227   :  { %v4966_v37 = vld [vmem:[%s7104_s1 + $0x16c] ss:$16 sps:$4 sm:$0xff]  }
 0x228   :  { %1595 = vmatmul.mubr.bf16.gmra.mrb[112].mxu0 %v4947_v15  ;;  %v5840_v43 = vpop.f32.mrb[0].mxu1 }
 0x229   :  { %4116 = vmatprep.mubr.msk.bf16.mxu0 %vm1232_vm9, %v4948_v26  ;;  %v2996_v38 = vpop.f32.mrb[1].mxu1 }
 0x22a   :  { %v5843_v39 = vpop.f32.mrb[2].mxu1 }
 0x22b   :  { %v5845_v40 = vpop.f32.mrb[8].mxu0  ;;  %v2999_v41 = vpop.f32.mrb[3].mxu1 }
 0x22c   :  { %v1357_v42 = vpop.f32.mrb[9].mxu0 }
 0x22d   :  { %3242 = vmatmul.mubr.bf16.gmra.mrb[108].mxu1 %v4944_v29  ;;  %v5850_v22 = vpop.f32.mrb[10].mxu0 }
 0x22e   :  { %v1360_v17 = vpop.f32.mrb[11].mxu0  ;;  %4145 = vmatprep.mubr.msk.bf16.mxu1 %vm1232_vm9, %v4945_v52 }
 0x230   :  { %1603 = vmatmul.mubr.bf16.gmra.mrb[116].mxu0 %v4950_v54  ;;  %v5856_v18 = vpop.f32.mrb[4].mxu1 }
 0x231   :  { %4117 = vmatprep.mubr.msk.bf16.mxu0 %vm1232_vm9, %v4951_v16  ;;  %v3004_v44 = vpop.f32.mrb[5].mxu1 }
 0x232   :  { %v5859_v1 = vpop.f32.mrb[6].mxu1 }
 0x233   :  { %v5861_v50 = vpop.f32.mrb[12].mxu0  ;;  %v3007_v27 = vpop.f32.mrb[7].mxu1 }
 0x234   :  { %v1365_v2 = vpop.f32.mrb[13].mxu0  ;;  %v4968_v27 = vld [vmem:[%s7104_s1 + $0x168] ss:$16 sps:$4 sm:$0xff]  }
 0x235   :  { %3250 = vmatmul.mubr.bf16.gmra.mrb[112].mxu1 %v4947_v15  ;;  %v5866_v6 = vpop.f32.mrb[14].mxu0  ;;  %v4965_v15 = vld [vmem:[%s7104_s1 + $0x148] ss:$16 sps:$4 sm:$0xff]  }
 0x236   :  { %v1368_v49 = vpop.f32.mrb[15].mxu0  ;;  %4146 = vmatprep.mubr.msk.bf16.mxu1 %vm1232_vm9, %v4948_v26 }
 0x238   :  { %1611 = vmatmul.mubr.bf16.gmra.mrb[120].mxu0 %v4953_v4  ;;  %v5872_v51 = vpop.f32.mrb[8].mxu1 }
 0x239   :  { %4118 = vmatprep.mubr.msk.bf16.mxu0 %vm1232_vm9, %v4954_v35  ;;  %v3012_v30 = vpop.f32.mrb[9].mxu1 }
 0x23a   :  { %v5875_v31 = vpop.f32.mrb[10].mxu1 }
 0x23b   :  { %v5877_v10 = vpop.f32.mrb[16].mxu0  ;;  %v3015_v48 = vpop.f32.mrb[11].mxu1 }
 0x23c   :  { %v1373_v53 = vpop.f32.mrb[17].mxu0 }
 0x23d   :  { %3258 = vmatmul.mubr.bf16.gmra.mrb[116].mxu1 %v4950_v54  ;;  %v5882_v57 = vpop.f32.mrb[18].mxu0 }
 0x23e   :  { %v1376_v0 = vpop.f32.mrb[19].mxu0  ;;  %4147 = vmatprep.mubr.msk.bf16.mxu1 %vm1232_vm9, %v4951_v16 }
 0x23f   :  { %v4971_v0 = vld [vmem:[%s7104_s1 + $0x188] ss:$16 sps:$4 sm:$0xff]  }
 0x240   :  { %1619 = vmatmul.mubr.bf16.gmra.mrb[124].mxu0 %v4956_v56  ;;  %v5888_v3 = vpop.f32.mrb[12].mxu1 }
 0x241   :  { %4119 = vmatprep.mubr.msk.bf16.mxu0 %vm1232_vm9, %v4957_v58  ;;  %v3020_v34 = vpop.f32.mrb[13].mxu1 }
 0x242   :  { %v5891_v59 = vpop.f32.mrb[14].mxu1 }
 0x243   :  { %v5893_v60 = vpop.f32.mrb[20].mxu0  ;;  %v3023_v45 = vpop.f32.mrb[15].mxu1 }
 0x244   :  { %v1381_v61 = vpop.f32.mrb[21].mxu0  ;;  %v4972_v45 = vld [vmem:[%s7104_s1 + $0x1ac] ss:$16 sps:$4 sm:$0xff]  }
 0x245   :  { %3266 = vmatmul.mubr.bf16.gmra.mrb[120].mxu1 %v4953_v4  ;;  %v5898_v55 = vpop.f32.mrb[22].mxu0  ;;  %v4969_v4 = vld [vmem:[%s7104_s1 + $0x18c] ss:$16 sps:$4 sm:$0xff]  }
 0x246   :  { %v1384_v7 = vpop.f32.mrb[23].mxu0  ;;  %4148 = vmatprep.mubr.msk.bf16.mxu1 %vm1232_vm9, %v4954_v35 }
 0x248   :  { %1627 = vmatmul.mubr.bf16.gmra.mrb[128].mxu0 %v4959_v47  ;;  %v5904_v11 = vpop.f32.mrb[16].mxu1 }
 0x249   :  { %4120 = vmatprep.mubr.msk.bf16.mxu0 %vm1232_vm9, %v4960_v5  ;;  %v3028_v62 = vpop.f32.mrb[17].mxu1 }
 0x24a   :  { %v5907_v63 = vpop.f32.mrb[18].mxu1 }
 0x24b   :  { %v5909_v19 = vpop.f32.mrb[24].mxu0  ;;  %v3031_v20 = vpop.f32.mrb[19].mxu1 }
 0x24c   :  { %v1389_v8 = vpop.f32.mrb[25].mxu0 }
 0x24d   :  { %3274 = vmatmul.mubr.bf16.gmra.mrb[124].mxu1 %v4956_v56  ;;  %v5914_v12 = vpop.f32.mrb[26].mxu0 }
 0x24e   :  { %v1392_v33 = vpop.f32.mrb[27].mxu0  ;;  %4149 = vmatprep.mubr.msk.bf16.mxu1 %vm1232_vm9, %v4957_v58 }
 0x24f   :  { %v4975_v33 = vld [vmem:[%s7104_s1 + $0x1cc] ss:$16 sps:$4 sm:$0xff]  }
 0x250   :  { %1635 = vmatmul.mubr.bf16.gmra.mrb[132].mxu0 %v4962_v9  ;;  %v5920_v24 = vpop.f32.mrb[20].mxu1 }
 0x251   :  { %4121 = vmatprep.mubr.msk.bf16.mxu0 %vm1232_vm9, %v4963_v21  ;;  %v3036_v28 = vpop.f32.mrb[21].mxu1 }
 0x252   :  { %v5923_v29 = vpop.f32.mrb[22].mxu1 }
 0x253   :  { %v5925_v52 = vpop.f32.mrb[28].mxu0  ;;  %v3039_v36 = vpop.f32.mrb[23].mxu1 }
 0x254   :  { %v1397_v14 = vpop.f32.mrb[29].mxu0 }
 0x255   :  { %3282 = vmatmul.mubr.bf16.gmra.mrb[128].mxu1 %v4959_v47  ;;  %v5930_v26 = vpop.f32.mrb[30].mxu0 }
 0x256   :  { %v1400_v38 = vpop.f32.mrb[31].mxu0  ;;  %4150 = vmatprep.mubr.msk.bf16.mxu1 %vm1232_vm9, %v4960_v5 }
 0x258   :  { %1643 = vmatmul.mubr.bf16.gmra.mrb[136].mxu0 %v4965_v15  ;;  %v5936_v41 = vpop.f32.mrb[24].mxu1 }
 0x259   :  { %4122 = vmatprep.mubr.msk.bf16.mxu0 %vm1232_vm9, %v4966_v37  ;;  %v3044_v42 = vpop.f32.mrb[25].mxu1 }
 0x25a   :  { %v5939_v54 = vpop.f32.mrb[26].mxu1 }
 0x25b   :  { %v5941_v16 = vpop.f32.mrb[32].mxu0  ;;  %v3047_v17 = vpop.f32.mrb[27].mxu1 }
 0x25c   :  { %v1405_v44 = vpop.f32.mrb[33].mxu0  ;;  %v4977_v17 = vld [vmem:[%s7104_s1 + $0x1c8] ss:$16 sps:$4 sm:$0xff]  }
 0x25d   :  { %3290 = vmatmul.mubr.bf16.gmra.mrb[132].mxu1 %v4962_v9  ;;  %v5946_v2 = vpop.f32.mrb[34].mxu0  ;;  %v4974_v9 = vld [vmem:[%s7104_s1 + $0x1a8] ss:$16 sps:$4 sm:$0xff]  }
 0x25e   :  { %v1408_v35 = vpop.f32.mrb[35].mxu0  ;;  %4151 = vmatprep.mubr.msk.bf16.mxu1 %vm1232_vm9, %v4963_v21 }
 0x260   :  { %1651 = vmatmul.mubr.bf16.gmra.mrb[140].mxu0 %v4968_v27  ;;  %v5952_v49 = vpop.f32.mrb[28].mxu1 }
 0x261   :  { %4123 = vmatprep.mubr.msk.bf16.mxu0 %vm1232_vm9, %v4969_v4  ;;  %v3052_v30 = vpop.f32.mrb[29].mxu1 }
 0x262   :  { %v5955_v48 = vpop.f32.mrb[30].mxu1 }
 0x263   :  { %v5957_v53 = vpop.f32.mrb[36].mxu0  ;;  %v3055_v56 = vpop.f32.mrb[31].mxu1 }
 0x264   :  { %v1413_v58 = vpop.f32.mrb[37].mxu0 }
 0x265   :  { %3298 = vmatmul.mubr.bf16.gmra.mrb[136].mxu1 %v4965_v15  ;;  %v5962_v34 = vpop.f32.mrb[38].mxu0 }
 0x266   :  { %v1416_v61 = vpop.f32.mrb[39].mxu0  ;;  %4152 = vmatprep.mubr.msk.bf16.mxu1 %vm1232_vm9, %v4966_v37 }
 0x267   :  { %v4981_v61 = vld [vmem:[%s7104_s1 + $0x20c] ss:$16 sps:$4 sm:$0xff]  }
 0x268   :  { %1659 = vmatmul.mubr.bf16.gmra.mrb[48].mxu0 %v4971_v0  ;;  %v5968_v47 = vpop.f32.mrb[32].mxu1 }
 0x269   :  { %4124 = vmatprep.mubr.msk.bf16.mxu0 %vm1232_vm9, %v4972_v45  ;;  %v3060_v5 = vpop.f32.mrb[33].mxu1 }
 0x26a   :  { %v5971_v7 = vpop.f32.mrb[34].mxu1 }
 0x26b   :  { %v5973_v62 = vpop.f32.mrb[40].mxu0  ;;  %v3063_v20 = vpop.f32.mrb[35].mxu1 }
 0x26c   :  { %v1421_v8 = vpop.f32.mrb[41].mxu0 }
 0x26d   :  { %3306 = vmatmul.mubr.bf16.gmra.mrb[140].mxu1 %v4968_v27  ;;  %v5978_v21 = vpop.f32.mrb[42].mxu0  ;;  %v4978_v27 = vld [vmem:[%s7104_s1 + $0x1ec] ss:$16 sps:$4 sm:$0xff]  }
 0x26e   :  { %v1424_v28 = vpop.f32.mrb[43].mxu0  ;;  %4153 = vmatprep.mubr.msk.bf16.mxu1 %vm1232_vm9, %v4969_v4 }
 0x26f   :  { %v4983_v28 = vld [vmem:[%s7104_s1 + $0x208] ss:$16 sps:$4 sm:$0xff]  }
 0x270   :  { %1667 = vmatmul.mubr.bf16.gmra.mrb[52].mxu0 %v4974_v9  ;;  %v5984_v36 = vpop.f32.mrb[36].mxu1 }
 0x271   :  { %4125 = vmatprep.mubr.msk.bf16.mxu0 %vm1232_vm9, %v4975_v33  ;;  %v3068_v14 = vpop.f32.mrb[37].mxu1 }
 0x272   :  { %v5987_v15 = vpop.f32.mrb[38].mxu1  ;;  %v4987_v14 = vld [vmem:[%s7104_s1 + $0x24c] ss:$16 sps:$4 sm:$0xff]  }
 0x273   :  { %v5989_v37 = vpop.f32.mrb[44].mxu0  ;;  %v3071_v38 = vpop.f32.mrb[39].mxu1 }
 0x274   :  { %v1429_v42 = vpop.f32.mrb[45].mxu0  ;;  %v4989_v38 = vld [vmem:[%s7104_s1 + $0x248] ss:$16 sps:$4 sm:$0xff]  }
 0x275   :  { %3314 = vmatmul.mubr.bf16.gmra.mrb[48].mxu1 %v4971_v0  ;;  %v5994_v44 = vpop.f32.mrb[46].mxu0  ;;  %v4980_v0 = vld [vmem:[%s7104_s1 + $0x1e8] ss:$16 sps:$4 sm:$0xff]   ;;  %v4990_v42 = vld [vmem:[%s7104_s1 + $0x26c] ss:$16 sps:$4 sm:$0xff]  }
 0x276   :  { %v1432_v4 = vpop.f32.mrb[47].mxu0  ;;  %4154 = vmatprep.mubr.msk.bf16.mxu1 %vm1232_vm9, %v4972_v45 }
 0x277   :  { %v4995_v4 = vld [vmem:[%s7104_s1 + $0x288] ss:$16 sps:$4 sm:$0xff]  }
 0x278   :  { %1675 = vmatmul.mubr.bf16.gmra.mrb[56].mxu0 %v4977_v17  ;;  %v6000_v35 = vpop.f32.mrb[40].mxu1 }
 0x279   :  { %4126 = vmatprep.mubr.msk.bf16.mxu0 %vm1232_vm9, %v4978_v27  ;;  %v3076_v30 = vpop.f32.mrb[41].mxu1 }
 0x27a   :  { %v6003_v56 = vpop.f32.mrb[42].mxu1  ;;  %v4996_v30 = vld [vmem:[%s7104_s1 + $0x2ac] ss:$16 sps:$4 sm:$0xff]  }
 0x27b   :  { %v3079_v58 = vpop.f32.mrb[43].mxu1 }
 0x27c   :  { %v4998_v58 = vld [vmem:[%s7104_s1 + $0x2a8] ss:$16 sps:$4 sm:$0xff]  }
 0x27d   :  { %3322 = vmatmul.mubr.bf16.gmra.mrb[52].mxu1 %v4974_v9  ;;  %v4984_v9 = vld [vmem:[%s7104_s1 + $0x22c] ss:$16 sps:$4 sm:$0xff]  }
 0x27e   :  { %4155 = vmatprep.mubr.msk.bf16.mxu1 %vm1232_vm9, %v4975_v33  ;;  %v4986_v33 = vld [vmem:[%s7104_s1 + $0x228] ss:$16 sps:$4 sm:$0xff]  }
 0x280   :  { %1683 = vmatmul.mubr.bf16.gmra.mrb[60].mxu0 %v4980_v0  ;;  %v6012_v45 = vpop.f32.mrb[44].mxu1 }
 0x281   :  { %4127 = vmatprep.mubr.msk.bf16.mxu0 %vm1232_vm9, %v4981_v61  ;;  %v3084_v5 = vpop.f32.mrb[45].mxu1 }
 0x282   :  { %v6015_v20 = vpop.f32.mrb[46].mxu1  ;;  %v5002_v5 = vld [vmem:[%s7104_s1 + $0x2ec] ss:$16 sps:$4 sm:$0xff]  }
 0x283   :  { %v3087_v8 = vpop.f32.mrb[47].mxu1 }
 0x284   :  { %v5004_v8 = vld [vmem:[%s7104_s1 + $0x2e8] ss:$16 sps:$4 sm:$0xff]  }
 0x285   :  { %3330 = vmatmul.mubr.bf16.gmra.mrb[56].mxu1 %v4977_v17  ;;  %v4992_v17 = vld [vmem:[%s7104_s1 + $0x268] ss:$16 sps:$4 sm:$0xff]  }
 0x286   :  { %4156 = vmatprep.mubr.msk.bf16.mxu1 %vm1232_vm9, %v4978_v27  ;;  %v4993_v27 = vld [vmem:[%s7104_s1 + $0x28c] ss:$16 sps:$4 sm:$0xff]  }
 0x288   :  { %1691 = vmatmul.mubr.bf16.gmra.mrb[64].mxu0 %v4983_v28 }
 0x289   :  { %4128 = vmatprep.mubr.msk.bf16.mxu0 %vm1232_vm9, %v4984_v9 }
 0x28d   :  { %3338 = vmatmul.mubr.bf16.gmra.mrb[60].mxu1 %v4980_v0  ;;  %v4999_v0 = vld [vmem:[%s7104_s1 + $0x2cc] ss:$16 sps:$4 sm:$0xff]  }
 0x28e   :  { %4157 = vmatprep.mubr.msk.bf16.mxu1 %vm1232_vm9, %v4981_v61  ;;  %v5001_v61 = vld [vmem:[%s7104_s1 + $0x2c8] ss:$16 sps:$4 sm:$0xff]   ;;  %s5014_s1 = smov 16  }
 0x290   :  { %1699 = vmatmul.mubr.bf16.gmra.mrb[68].mxu0 %v4986_v33 }
 0x291   :  { %4129 = vmatprep.mubr.msk.bf16.mxu0 %vm1232_vm9, %v4987_v14 }
 0x295   :  { %3346 = vmatmul.mubr.bf16.gmra.mrb[64].mxu1 %v4983_v28 }
 0x296   :  { %4158 = vmatprep.mubr.msk.bf16.mxu1 %vm1232_vm9, %v4984_v9 }
 0x298   :  { %1707 = vmatmul.mubr.bf16.gmra.mrb[72].mxu0 %v4989_v38 }
 0x299   :  { %4130 = vmatprep.mubr.msk.bf16.mxu0 %vm1232_vm9, %v4990_v42 }
 0x29d   :  { %3354 = vmatmul.mubr.bf16.gmra.mrb[68].mxu1 %v4986_v33 }
 0x29e   :  { %4159 = vmatprep.mubr.msk.bf16.mxu1 %vm1232_vm9, %v4987_v14 }
 0x2a0   :  { %1715 = vmatmul.mubr.bf16.gmra.mrb[76].mxu0 %v4992_v17 }
 0x2a1   :  { %4131 = vmatprep.mubr.msk.bf16.mxu0 %vm1232_vm9, %v4993_v27 }
 0x2a5   :  { %3362 = vmatmul.mubr.bf16.gmra.mrb[72].mxu1 %v4989_v38 }
 0x2a6   :  { %4160 = vmatprep.mubr.msk.bf16.mxu1 %vm1232_vm9, %v4990_v42 }
 0x2a8   :  { %1723 = vmatmul.mubr.bf16.gmra.mrb[80].mxu0 %v4995_v4 }
 0x2a9   :  { %4132 = vmatprep.mubr.msk.bf16.mxu0 %vm1232_vm9, %v4996_v30 }
 0x2ad   :  { %3370 = vmatmul.mubr.bf16.gmra.mrb[76].mxu1 %v4992_v17 }
 0x2ae   :  { %4161 = vmatprep.mubr.msk.bf16.mxu1 %vm1232_vm9, %v4993_v27 }
 0x2b0   :  { %1731 = vmatmul.mubr.bf16.gmra.mrb[84].mxu0 %v4998_v58 }
 0x2b1   :  { %4133 = vmatprep.mubr.msk.bf16.mxu0 %vm1232_vm9, %v4999_v0 }
 0x2b5   :  { %3378 = vmatmul.mubr.bf16.gmra.mrb[80].mxu1 %v4995_v4 }
 0x2b6   :  { %4162 = vmatprep.mubr.msk.bf16.mxu1 %vm1232_vm9, %v4996_v30 }
 0x2b8   :  { %1739 = vmatmul.mubr.bf16.gmra.mrb[88].mxu0 %v5001_v61 }
 0x2b9   :  { %4134 = vmatprep.mubr.msk.bf16.mxu0 %vm1232_vm9, %v5002_v5 }
 0x2bd   :  { %3386 = vmatmul.mubr.bf16.gmra.mrb[84].mxu1 %v4998_v58 }
 0x2be   :  { %4163 = vmatprep.mubr.msk.bf16.mxu1 %vm1232_vm9, %v4999_v0 }
 0x2c0   :  { %1747 = vmatmul.mubr.bf16.gmra.mrb[92].mxu0 %v5004_v8 }
 0x2c5   :  { %3394 = vmatmul.mubr.bf16.gmra.mrb[88].mxu1 %v5001_v61 }
 0x2c6   :  { %4164 = vmatprep.mubr.msk.bf16.mxu1 %vm1232_vm9, %v5002_v5 }
 0x2cd   :  { %3402 = vmatmul.mubr.bf16.gmra.mrb[92].mxu1 %v5004_v8 }
 0x2db   :  { %v1564_v28 = vpop.f32.mrb[96].mxu0 }
 0x2dc   :  { %v6079_v9 = vadd.f32 %v1564_v28, %v5817_v25  ;;  %v1566_v33 = vpop.f32.mrb[97].mxu0 }
 0x2dd   :  { %v1567_v14 = vpop.f32.mrb[98].mxu0 }
 0x2de   :  { %v6082_v38 = vadd.f32 %v1567_v14, %v5822_v32  ;;  %v1569_v42 = vpop.f32.mrb[99].mxu0 }
 0x2e3   :  { %v1572_v17 = vpop.f32.mrb[100].mxu0 }
 0x2e4   :  { %v6085_v27 = vadd.f32 %v1572_v17, %v5829_v13  ;;  %v1574_v4 = vpop.f32.mrb[101].mxu0 }
 0x2e5   :  { %v1575_v30 = vpop.f32.mrb[102].mxu0 }
 0x2e6   :  { %v6088_v58 = vadd.f32 %v1575_v30, %v5834_v46  ;;  %v1577_v0 = vpop.f32.mrb[103].mxu0 }
 0x2e8   :  { %v3219_v61 = vpop.f32.mrb[96].mxu1 }
 0x2e9   :  { %v6091_v25 = vadd.f32 %v3219_v61, %v5840_v43  ;;  %v3221_v5 = vpop.f32.mrb[97].mxu1 }
 0x2ea   :  { %v3222_v8 = vpop.f32.mrb[98].mxu1 }
 0x2eb   :  { %v6094_v32 = vadd.f32 %v3222_v8, %v5843_v39  ;;  %v1580_v28 = vpop.f32.mrb[104].mxu0  ;;  %v3224_v33 = vpop.f32.mrb[99].mxu1 }
 0x2ec   :  { %v6097_v13 = vadd.f32 %v1580_v28, %v5845_v40  ;;  %v1582_v14 = vpop.f32.mrb[105].mxu0 }
 0x2ed   :  { %v1583_v42 = vpop.f32.mrb[106].mxu0 }
 0x2ee   :  { %v6100_v46 = vadd.f32 %v1583_v42, %v5850_v22  ;;  %v1585_v17 = vpop.f32.mrb[107].mxu0 }
 0x2f0   :  { %v3227_v4 = vpop.f32.mrb[100].mxu1 }
 0x2f1   :  { %v6103_v43 = vadd.f32 %v3227_v4, %v5856_v18  ;;  %v3229_v30 = vpop.f32.mrb[101].mxu1 }
 0x2f2   :  { %v3230_v0 = vpop.f32.mrb[102].mxu1 }
 0x2f3   :  { %v6106_v39 = vadd.f32 %v3230_v0, %v5859_v1  ;;  %v1588_v61 = vpop.f32.mrb[108].mxu0  ;;  %v3232_v5 = vpop.f32.mrb[103].mxu1 }
 0x2f4   :  { %v6109_v40 = vadd.f32 %v1588_v61, %v5861_v50  ;;  %v1590_v8 = vpop.f32.mrb[109].mxu0 }
 0x2f5   :  { %v1591_v28 = vpop.f32.mrb[110].mxu0 }
 0x2f6   :  { %v6112_v22 = vadd.f32 %v1591_v28, %v5866_v6  ;;  %v1593_v33 = vpop.f32.mrb[111].mxu0 }
 0x2f8   :  { %v3235_v14 = vpop.f32.mrb[104].mxu1 }
 0x2f9   :  { %v6115_v18 = vadd.f32 %v3235_v14, %v5872_v51  ;;  %v3237_v42 = vpop.f32.mrb[105].mxu1 }
 0x2fa   :  { %v3238_v17 = vpop.f32.mrb[106].mxu1 }
 0x2fb   :  { %v6118_v1 = vadd.f32 %v3238_v17, %v5875_v31  ;;  %v1596_v4 = vpop.f32.mrb[112].mxu0  ;;  %v3240_v30 = vpop.f32.mrb[107].mxu1 }
 0x2fc   :  { %v6121_v50 = vadd.f32 %v1596_v4, %v5877_v10  ;;  %v1598_v0 = vpop.f32.mrb[113].mxu0 }
 0x2fd   :  { %v1599_v61 = vpop.f32.mrb[114].mxu0 }
 0x2fe   :  { %v6124_v6 = vadd.f32 %v1599_v61, %v5882_v57  ;;  %v1601_v5 = vpop.f32.mrb[115].mxu0 }
 0x300   :  { %v3243_v8 = vpop.f32.mrb[108].mxu1 }
 0x301   :  { %v6127_v51 = vadd.f32 %v3243_v8, %v5888_v3  ;;  %v3245_v28 = vpop.f32.mrb[109].mxu1 }
 0x302   :  { %v3246_v33 = vpop.f32.mrb[110].mxu1 }
 0x303   :  { %v6130_v31 = vadd.f32 %v3246_v33, %v5891_v59  ;;  %v1604_v14 = vpop.f32.mrb[116].mxu0  ;;  %v3248_v42 = vpop.f32.mrb[111].mxu1 }
 0x304   :  { %v6133_v10 = vadd.f32 %v1604_v14, %v5893_v60  ;;  %v1606_v17 = vpop.f32.mrb[117].mxu0 }
 0x305   :  { %v1607_v4 = vpop.f32.mrb[118].mxu0 }
 0x306   :  { %v6136_v57 = vadd.f32 %v1607_v4, %v5898_v55  ;;  %v1609_v30 = vpop.f32.mrb[119].mxu0 }
 0x308   :  { %v3251_v0 = vpop.f32.mrb[112].mxu1 }
 0x309   :  { %v6139_v3 = vadd.f32 %v3251_v0, %v5904_v11  ;;  %v3253_v61 = vpop.f32.mrb[113].mxu1 }
 0x30a   :  { %v3254_v5 = vpop.f32.mrb[114].mxu1 }
 0x30b   :  { %v6142_v59 = vadd.f32 %v3254_v5, %v5907_v63  ;;  %v1612_v8 = vpop.f32.mrb[120].mxu0  ;;  %v3256_v28 = vpop.f32.mrb[115].mxu1 }
 0x30c   :  { %v6145_v60 = vadd.f32 %v1612_v8, %v5909_v19  ;;  %v1614_v33 = vpop.f32.mrb[121].mxu0 }
 0x30d   :  { %v1615_v14 = vpop.f32.mrb[122].mxu0 }
 0x30e   :  { %v6148_v55 = vadd.f32 %v1615_v14, %v5914_v12  ;;  %v1617_v42 = vpop.f32.mrb[123].mxu0 }
 0x310   :  { %v3259_v17 = vpop.f32.mrb[116].mxu1 }
 0x311   :  { %v6151_v11 = vadd.f32 %v3259_v17, %v5920_v24  ;;  %v3261_v4 = vpop.f32.mrb[117].mxu1 }
 0x312   :  { %v3262_v30 = vpop.f32.mrb[118].mxu1 }
 0x313   :  { %v6154_v63 = vadd.f32 %v3262_v30, %v5923_v29  ;;  %v1620_v0 = vpop.f32.mrb[124].mxu0  ;;  %v3264_v61 = vpop.f32.mrb[119].mxu1 }
 0x314   :  { %v6157_v19 = vadd.f32 %v1620_v0, %v5925_v52  ;;  %v1622_v5 = vpop.f32.mrb[125].mxu0 }
 0x315   :  { %7126 = vst [vmem:[#allocation5_spill] sm:$0xff] %v6154_v63  ;;  %v1623_v8 = vpop.f32.mrb[126].mxu0 }
 0x316   :  { %7127 = vst [vmem:[#allocation6_spill] sm:$0xff] %v6157_v19  ;;  %v6160_v12 = vadd.f32 %v1623_v8, %v5930_v26  ;;  %v1625_v28 = vpop.f32.mrb[127].mxu0 }
 0x318   :  { %7128 = vst [vmem:[#allocation7_spill] sm:$0xff] %v6160_v12  ;;  %v3267_v33 = vpop.f32.mrb[120].mxu1 }
 0x319   :  { %v6163_v24 = vadd.f32 %v3267_v33, %v5936_v41  ;;  %v3269_v14 = vpop.f32.mrb[121].mxu1 }
 0x31a   :  { %v3270_v42 = vpop.f32.mrb[122].mxu1 }
 0x31b   :  { %7129 = vst [vmem:[#allocation8_spill] sm:$0xff] %v6163_v24  ;;  %v6166_v29 = vadd.f32 %v3270_v42, %v5939_v54  ;;  %v1628_v17 = vpop.f32.mrb[128].mxu0  ;;  %v3272_v4 = vpop.f32.mrb[123].mxu1 }
 0x31c   :  { %v6169_v52 = vadd.f32 %v1628_v17, %v5941_v16  ;;  %v1630_v30 = vpop.f32.mrb[129].mxu0 }
 0x31d   :  { %7130 = vst [vmem:[#allocation9_spill] sm:$0xff] %v6166_v29  ;;  %v1631_v0 = vpop.f32.mrb[130].mxu0 }
 0x31e   :  { %7131 = vst [vmem:[#allocation10_spill] sm:$0xff] %v6169_v52  ;;  %v6172_v26 = vadd.f32 %v1631_v0, %v5946_v2  ;;  %v1633_v61 = vpop.f32.mrb[131].mxu0 }
 0x320   :  { %7132 = vst [vmem:[#allocation11_spill] sm:$0xff] %v6172_v26  ;;  %v3275_v5 = vpop.f32.mrb[124].mxu1 }
 0x321   :  { %v6175_v41 = vadd.f32 %v3275_v5, %v5952_v49  ;;  %v3277_v8 = vpop.f32.mrb[125].mxu1 }
 0x322   :  { %v3278_v28 = vpop.f32.mrb[126].mxu1 }
 0x323   :  { %7133 = vst [vmem:[#allocation12_spill] sm:$0xff] %v6175_v41  ;;  %v6178_v54 = vadd.f32 %v3278_v28, %v5955_v48  ;;  %v1636_v33 = vpop.f32.mrb[132].mxu0  ;;  %v3280_v14 = vpop.f32.mrb[127].mxu1 }
 0x324   :  { %v6181_v16 = vadd.f32 %v1636_v33, %v5957_v53  ;;  %v1638_v42 = vpop.f32.mrb[133].mxu0 }
 0x325   :  { %7134 = vst [vmem:[#allocation13_spill] sm:$0xff] %v6178_v54  ;;  %v1639_v17 = vpop.f32.mrb[134].mxu0 }
 0x326   :  { %7135 = vst [vmem:[#allocation14_spill] sm:$0xff] %v6181_v16  ;;  %v6184_v2 = vadd.f32 %v1639_v17, %v5962_v34  ;;  %v1641_v4 = vpop.f32.mrb[135].mxu0 }
 0x328   :  { %7136 = vst [vmem:[#allocation15_spill] sm:$0xff] %v6184_v2  ;;  %v3283_v30 = vpop.f32.mrb[128].mxu1 }
 0x329   :  { %v6187_v49 = vadd.f32 %v3283_v30, %v5968_v47  ;;  %v3285_v0 = vpop.f32.mrb[129].mxu1 }
 0x32a   :  { %v3286_v61 = vpop.f32.mrb[130].mxu1 }
 0x32b   :  { %7137 = vst [vmem:[#allocation16_spill] sm:$0xff] %v6187_v49  ;;  %v6190_v48 = vadd.f32 %v3286_v61, %v5971_v7  ;;  %v1644_v5 = vpop.f32.mrb[136].mxu0  ;;  %v3288_v8 = vpop.f32.mrb[131].mxu1 }
 0x32c   :  { %v6193_v53 = vadd.f32 %v1644_v5, %v5973_v62  ;;  %v1646_v28 = vpop.f32.mrb[137].mxu0 }
 0x32d   :  { %7138 = vst [vmem:[#allocation17_spill] sm:$0xff] %v6190_v48  ;;  %v1647_v33 = vpop.f32.mrb[138].mxu0 }
 0x32e   :  { %7139 = vst [vmem:[#allocation18_spill] sm:$0xff] %v6193_v53  ;;  %v6196_v34 = vadd.f32 %v1647_v33, %v5978_v21  ;;  %v1649_v14 = vpop.f32.mrb[139].mxu0 }
 0x330   :  { %7140 = vst [vmem:[#allocation19_spill] sm:$0xff] %v6196_v34  ;;  %v3291_v42 = vpop.f32.mrb[132].mxu1 }
 0x331   :  { %v6199_v47 = vadd.f32 %v3291_v42, %v5984_v36  ;;  %v3293_v17 = vpop.f32.mrb[133].mxu1 }
 0x332   :  { %v3294_v4 = vpop.f32.mrb[134].mxu1 }
 0x333   :  { %7141 = vst [vmem:[#allocation20_spill] sm:$0xff] %v6199_v47  ;;  %v6202_v7 = vadd.f32 %v3294_v4, %v5987_v15  ;;  %v1652_v30 = vpop.f32.mrb[140].mxu0  ;;  %v3296_v0 = vpop.f32.mrb[135].mxu1 }
 0x334   :  { %v6205_v62 = vadd.f32 %v1652_v30, %v5989_v37  ;;  %v1654_v61 = vpop.f32.mrb[141].mxu0 }
 0x335   :  { %7142 = vst [vmem:[#allocation21_spill] sm:$0xff] %v6202_v7  ;;  %v1655_v5 = vpop.f32.mrb[142].mxu0 }
 0x336   :  { %7143 = vst [vmem:[#allocation22_spill] sm:$0xff] %v6205_v62  ;;  %v6208_v21 = vadd.f32 %v1655_v5, %v5994_v44  ;;  %v1657_v8 = vpop.f32.mrb[143].mxu0 }
 0x338   :  { %7144 = vst [vmem:[#allocation23_spill] sm:$0xff] %v6208_v21  ;;  %v3299_v28 = vpop.f32.mrb[136].mxu1 }
 0x339   :  { %v6211_v36 = vadd.f32 %v3299_v28, %v6000_v35  ;;  %v3301_v33 = vpop.f32.mrb[137].mxu1 }
 0x33a   :  { %v3302_v14 = vpop.f32.mrb[138].mxu1 }
 0x33b   :  { %7145 = vst [vmem:[#allocation24_spill] sm:$0xff] %v6211_v36  ;;  %v6214_v15 = vadd.f32 %v3302_v14, %v6003_v56  ;;  %v1660_v42 = vpop.f32.mrb[48].mxu0  ;;  %v3304_v17 = vpop.f32.mrb[139].mxu1 }
 0x33c   :  { %1779 = vrot.lane.b32.xlu0 %v1660_v42, %s5014_s1  ;;  %v1662_v37 = vpop.f32.mrb[49].mxu0 }
 0x33d   :  { %7146 = vst [vmem:[#allocation25_spill] sm:$0xff] %v6214_v15  ;;  %v1663_v4 = vpop.f32.mrb[50].mxu0 }
 0x33e   :  { %1781 = vrot.lane.b32.xlu1 %v1663_v4, %s5014_s1  ;;  %v1665_v44 = vpop.f32.mrb[51].mxu0 }
 0x340   :  { %v3307_v30 = vpop.f32.mrb[140].mxu1 }
 0x341   :  { %v6219_v0 = vadd.f32 %v3307_v30, %v6012_v45  ;;  %v3309_v35 = vpop.f32.mrb[141].mxu1 }
 0x342   :  { %v3310_v61 = vpop.f32.mrb[142].mxu1 }
 0x343   :  { %7147 = vst [vmem:[#allocation26_spill] sm:$0xff] %v6219_v0  ;;  %v6222_v5 = vadd.f32 %v3310_v61, %v6015_v20  ;;  %v1668_v56 = vpop.f32.mrb[52].mxu0  ;;  %v3312_v8 = vpop.f32.mrb[143].mxu1 }
 0x344   :  { %1783 = vrot.lane.b32.xlu0 %v1668_v56, %s5014_s1  ;;  %v1670_v28 = vpop.f32.mrb[53].mxu0 }
 0x345   :  { %7148 = vst [vmem:[#allocation27_spill] sm:$0xff] %v6222_v5  ;;  %v1671_v33 = vpop.f32.mrb[54].mxu0 }
 0x346   :  { %1785 = vrot.lane.b32.xlu1 %v1671_v33, %s5014_s1  ;;  %v1673_v14 = vpop.f32.mrb[55].mxu0 }
 0x348   :  { %v3315_v42 = vpop.f32.mrb[48].mxu1 }
 0x349   :  { %v3317_v17 = vpop.f32.mrb[49].mxu1  ;;  %3434 = vrot.lane.b32.xlu0 %v3315_v42, %s5014_s1 }
 0x34a   :  { %v3318_v45 = vpop.f32.mrb[50].mxu1 }
 0x34b   :  { %v3320_v37 = vpop.f32.mrb[51].mxu1  ;;  %3436 = vrot.lane.b32.xlu1 %v3318_v45, %s5014_s1  ;;  %v1676_v4 = vpop.f32.mrb[56].mxu0 }
 0x34c   :  { %v1678_v20 = vpop.f32.mrb[57].mxu0 }
 0x34d   :  { %1787 = vrot.lane.b32.xlu0 %v1676_v4, %s5014_s1  ;;  %v1679_v44 = vpop.f32.mrb[58].mxu0 }
 0x34e   :  { %v1681_v30 = vpop.f32.mrb[59].mxu0 }
 0x34f   :  { %1789 = vrot.lane.b32.xlu1 %v1679_v44, %s5014_s1 }
 0x350   :  { %v3323_v35 = vpop.f32.mrb[52].mxu1 }
 0x351   :  { %v3325_v61 = vpop.f32.mrb[53].mxu1  ;;  %3438 = vrot.lane.b32.xlu0 %v3323_v35, %s5014_s1 }
 0x352   :  { %v3326_v56 = vpop.f32.mrb[54].mxu1 }
 0x353   :  { %v3328_v8 = vpop.f32.mrb[55].mxu1  ;;  %3440 = vrot.lane.b32.xlu1 %v3326_v56, %s5014_s1  ;;  %v1684_v28 = vpop.f32.mrb[60].mxu0 }
 0x354   :  { %v1686_v33 = vpop.f32.mrb[61].mxu0 }
 0x355   :  { %1791 = vrot.lane.b32.xlu0 %v1684_v28, %s5014_s1  ;;  %v1687_v14 = vpop.f32.mrb[62].mxu0 }
 0x356   :  { %v1689_v42 = vpop.f32.mrb[63].mxu0 }
 0x357   :  { %1793 = vrot.lane.b32.xlu1 %v1687_v14, %s5014_s1 }
 0x358   :  { %v3331_v17 = vpop.f32.mrb[56].mxu1 }
 0x359   :  { %v3333_v45 = vpop.f32.mrb[57].mxu1  ;;  %3442 = vrot.lane.b32.xlu0 %v3331_v17, %s5014_s1 }
 0x35a   :  { %v3334_v37 = vpop.f32.mrb[58].mxu1 }
 0x35b   :  { %v3336_v4 = vpop.f32.mrb[59].mxu1  ;;  %3444 = vrot.lane.b32.xlu1 %v3334_v37, %s5014_s1  ;;  %v1692_v20 = vpop.f32.mrb[64].mxu0 }
 0x35c   :  { %v1694_v44 = vpop.f32.mrb[65].mxu0 }
 0x35d   :  { %1795 = vrot.lane.b32.xlu0 %v1692_v20, %s5014_s1  ;;  %v1695_v30 = vpop.f32.mrb[66].mxu0 }
 0x35e   :  { %v1697_v35 = vpop.f32.mrb[67].mxu0 }
 0x35f   :  { %1797 = vrot.lane.b32.xlu1 %v1695_v30, %s5014_s1 }
 0x360   :  { %v3339_v61 = vpop.f32.mrb[60].mxu1 }
 0x361   :  { %v3341_v56 = vpop.f32.mrb[61].mxu1  ;;  %3446 = vrot.lane.b32.xlu0 %v3339_v61, %s5014_s1 }
 0x362   :  { %v3342_v8 = vpop.f32.mrb[62].mxu1 }
 0x363   :  { %v3344_v28 = vpop.f32.mrb[63].mxu1  ;;  %3448 = vrot.lane.b32.xlu1 %v3342_v8, %s5014_s1  ;;  %v1700_v33 = vpop.f32.mrb[68].mxu0 }
 0x364   :  { %v1702_v14 = vpop.f32.mrb[69].mxu0 }
 0x365   :  { %1799 = vrot.lane.b32.xlu0 %v1700_v33, %s5014_s1  ;;  %v1703_v42 = vpop.f32.mrb[70].mxu0 }
 0x366   :  { %v1705_v17 = vpop.f32.mrb[71].mxu0 }
 0x367   :  { %1801 = vrot.lane.b32.xlu1 %v1703_v42, %s5014_s1 }
 0x368   :  { %v3347_v45 = vpop.f32.mrb[64].mxu1 }
 0x369   :  { %v3349_v37 = vpop.f32.mrb[65].mxu1  ;;  %3450 = vrot.lane.b32.xlu0 %v3347_v45, %s5014_s1 }
 0x36a   :  { %v3350_v4 = vpop.f32.mrb[66].mxu1 }
 0x36b   :  { %v3352_v20 = vpop.f32.mrb[67].mxu1  ;;  %3452 = vrot.lane.b32.xlu1 %v3350_v4, %s5014_s1  ;;  %v1708_v44 = vpop.f32.mrb[72].mxu0 }
 0x36c   :  { %v1710_v30 = vpop.f32.mrb[73].mxu0 }
 0x36d   :  { %1803 = vrot.lane.b32.xlu0 %v1708_v44, %s5014_s1  ;;  %v1711_v35 = vpop.f32.mrb[74].mxu0 }
 0x36e   :  { %v1713_v61 = vpop.f32.mrb[75].mxu0 }
 0x36f   :  { %1805 = vrot.lane.b32.xlu1 %v1711_v35, %s5014_s1 }
 0x370   :  { %v3355_v56 = vpop.f32.mrb[68].mxu1 }
 0x371   :  { %v3357_v8 = vpop.f32.mrb[69].mxu1  ;;  %3454 = vrot.lane.b32.xlu0 %v3355_v56, %s5014_s1 }
 0x372   :  { %v3358_v28 = vpop.f32.mrb[70].mxu1 }
 0x373   :  { %v3360_v33 = vpop.f32.mrb[71].mxu1  ;;  %3456 = vrot.lane.b32.xlu1 %v3358_v28, %s5014_s1  ;;  %v1716_v14 = vpop.f32.mrb[76].mxu0 }
 0x374   :  { %v1718_v42 = vpop.f32.mrb[77].mxu0 }
 0x375   :  { %1807 = vrot.lane.b32.xlu0 %v1716_v14, %s5014_s1  ;;  %v1719_v17 = vpop.f32.mrb[78].mxu0 }
 0x376   :  { %v1721_v45 = vpop.f32.mrb[79].mxu0 }
 0x377   :  { %1809 = vrot.lane.b32.xlu1 %v1719_v17, %s5014_s1 }
 0x378   :  { %v3363_v37 = vpop.f32.mrb[72].mxu1 }
 0x379   :  { %v3365_v4 = vpop.f32.mrb[73].mxu1  ;;  %3458 = vrot.lane.b32.xlu0 %v3363_v37, %s5014_s1 }
 0x37a   :  { %v3366_v20 = vpop.f32.mrb[74].mxu1 }
 0x37b   :  { %v3368_v44 = vpop.f32.mrb[75].mxu1  ;;  %3460 = vrot.lane.b32.xlu1 %v3366_v20, %s5014_s1  ;;  %v1724_v30 = vpop.f32.mrb[80].mxu0 }
 0x37c   :  { %v1726_v35 = vpop.f32.mrb[81].mxu0 }
 0x37d   :  { %1811 = vrot.lane.b32.xlu0 %v1724_v30, %s5014_s1  ;;  %v1727_v61 = vpop.f32.mrb[82].mxu0 }
 0x37e   :  { %v1729_v56 = vpop.f32.mrb[83].mxu0 }
 0x37f   :  { %1813 = vrot.lane.b32.xlu1 %v1727_v61, %s5014_s1 }
 0x380   :  { %v3371_v8 = vpop.f32.mrb[76].mxu1 }
 0x381   :  { %v3373_v28 = vpop.f32.mrb[77].mxu1  ;;  %3462 = vrot.lane.b32.xlu0 %v3371_v8, %s5014_s1 }
 0x382   :  { %v3374_v33 = vpop.f32.mrb[78].mxu1 }
 0x383   :  { %v3376_v14 = vpop.f32.mrb[79].mxu1  ;;  %3464 = vrot.lane.b32.xlu1 %v3374_v33, %s5014_s1  ;;  %v1732_v42 = vpop.f32.mrb[84].mxu0 }
 0x384   :  { %v1734_v17 = vpop.f32.mrb[85].mxu0 }
 0x385   :  { %1815 = vrot.lane.b32.xlu0 %v1732_v42, %s5014_s1  ;;  %v1735_v45 = vpop.f32.mrb[86].mxu0 }
 0x386   :  { %v1737_v37 = vpop.f32.mrb[87].mxu0 }
 0x387   :  { %1817 = vrot.lane.b32.xlu1 %v1735_v45, %s5014_s1 }
 0x388   :  { %v3379_v4 = vpop.f32.mrb[80].mxu1 }
 0x389   :  { %v3381_v20 = vpop.f32.mrb[81].mxu1  ;;  %3466 = vrot.lane.b32.xlu0 %v3379_v4, %s5014_s1 }
 0x38a   :  { %v3382_v44 = vpop.f32.mrb[82].mxu1 }
 0x38b   :  { %v3384_v30 = vpop.f32.mrb[83].mxu1  ;;  %3468 = vrot.lane.b32.xlu1 %v3382_v44, %s5014_s1  ;;  %v1740_v35 = vpop.f32.mrb[88].mxu0 }
 0x38c   :  { %v1742_v61 = vpop.f32.mrb[89].mxu0 }
 0x38d   :  { %1819 = vrot.lane.b32.xlu0 %v1740_v35, %s5014_s1  ;;  %v1743_v56 = vpop.f32.mrb[90].mxu0 }
 0x38e   :  { %v1745_v8 = vpop.f32.mrb[91].mxu0 }
 0x38f   :  { %1821 = vrot.lane.b32.xlu1 %v1743_v56, %s5014_s1 }
 0x390   :  { %v3387_v28 = vpop.f32.mrb[84].mxu1 }
 0x391   :  { %v3389_v33 = vpop.f32.mrb[85].mxu1  ;;  %3470 = vrot.lane.b32.xlu0 %v3387_v28, %s5014_s1 }
 0x392   :  { %v3390_v14 = vpop.f32.mrb[86].mxu1 }
 0x393   :  { %v3392_v42 = vpop.f32.mrb[87].mxu1  ;;  %3472 = vrot.lane.b32.xlu1 %v3390_v14, %s5014_s1  ;;  %v1748_v17 = vpop.f32.mrb[92].mxu0 }
 0x394   :  { %v1750_v45 = vpop.f32.mrb[93].mxu0 }
 0x395   :  { %1823 = vrot.lane.b32.xlu0 %v1748_v17, %s5014_s1  ;;  %v1751_v37 = vpop.f32.mrb[94].mxu0 }
 0x396   :  { %v1753_v4 = vpop.f32.mrb[95].mxu0 }
 0x397   :  { %1825 = vrot.lane.b32.xlu1 %v1751_v37, %s5014_s1 }
 0x398   :  { %v3395_v20 = vpop.f32.mrb[88].mxu1 }
 0x399   :  { %v3397_v44 = vpop.f32.mrb[89].mxu1  ;;  %3474 = vrot.lane.b32.xlu0 %v3395_v20, %s5014_s1 }
 0x39a   :  { %v3398_v30 = vpop.f32.mrb[90].mxu1 }
 0x39b   :  { %v3400_v35 = vpop.f32.mrb[91].mxu1  ;;  %3476 = vrot.lane.b32.xlu1 %v3398_v30, %s5014_s1 }
 0x3a0   :  { %v3403_v61 = vpop.f32.mrb[92].mxu1 }
 0x3a1   :  { %v3405_v56 = vpop.f32.mrb[93].mxu1  ;;  %3478 = vrot.lane.b32.xlu0 %v3403_v61, %s5014_s1 }
 0x3a2   :  { %v3406_v8 = vpop.f32.mrb[94].mxu1 }
 0x3a3   :  { %v3408_v28 = vpop.f32.mrb[95].mxu1  ;;  %3480 = vrot.lane.b32.xlu1 %v3406_v8, %s5014_s1 }
 0x3ae   :  { %v1780_v33 = vpop.permute.xlu0 %1779 }
 0x3af   :  { %1852 = vst.msk [vmem:[#allocation4] sm:$0xff] %vm1851_vm10, %v1780_v33 }
 0x3b0   :  { %1854 = vst.msk [vmem:[#allocation4 + $0x8] sm:$0xff] %vm1853_vm11, %v1780_v33  ;;  %v1782_v14 = vpop.permute.xlu1 %1781 }
 0x3b1   :  { %1855 = vst.msk [vmem:[#allocation4 + $0x10] sm:$0xff] %vm1851_vm10, %v1782_v14 }
 0x3b2   :  { %1856 = vst.msk [vmem:[#allocation4 + $0x18] sm:$0xff] %vm1853_vm11, %v1782_v14 }
 0x3b6   :  { %v1784_v42 = vpop.permute.xlu0 %1783  ;;  %v1901_v17 = vld [vmem:[#allocation4] sm:$0xff] }
 0x3b7   :  { %v1902_v45 = vld [vmem:[#allocation4 + $0x8] sm:$0xff]  ;;  %1857 = vst.msk [vmem:[#allocation4 + $0x20] sm:$0xff] %vm1851_vm10, %v1784_v42  ;;  %2000 = vrot.lane.b32.xlu0 %v1901_v17, %s5015_s30 }
 0x3b8   :  { %1858 = vst.msk [vmem:[#allocation4 + $0x28] sm:$0xff] %vm1853_vm11, %v1784_v42  ;;  %2002 = vrot.lane.b32.xlu1 %v1902_v45, %s5015_s30  ;;  %v1786_v37 = vpop.permute.xlu1 %1785  ;;  %v1903_v20 = vld [vmem:[#allocation4 + $0x10] sm:$0xff] }
 0x3b9   :  { %1859 = vst.msk [vmem:[#allocation4 + $0x30] sm:$0xff] %vm1851_vm10, %v1786_v37  ;;  %v1904_v44 = vld [vmem:[#allocation4 + $0x18] sm:$0xff] }
 0x3ba   :  { %1860 = vst.msk [vmem:[#allocation4 + $0x38] sm:$0xff] %vm1853_vm11, %v1786_v37 }
 0x3bb   :  { %v3435_v4 = vpop.permute.xlu0 %3434  ;;  %2145 = vrot.lane.b32.xlu0 %v1901_v17, %s5016_s3 }
 0x3bc   :  { %2147 = vrot.lane.b32.xlu1 %v1902_v45, %s5016_s3  ;;  %3506 = vst.msk [vmem:[#allocation4] sm:$0xff] %vm1851_vm10, %v3435_v4 }
 0x3bd   :  { %3507 = vst.msk [vmem:[#allocation4 + $0x8] sm:$0xff] %vm1853_vm11, %v3435_v4  ;;  %v3437_v30 = vpop.permute.xlu1 %3436 }
 0x3be   :  { %3508 = vst.msk [vmem:[#allocation4 + $0x10] sm:$0xff] %vm1851_vm10, %v3437_v30  ;;  %v1905_v56 = vld [vmem:[#allocation4 + $0x20] sm:$0xff] }
 0x3bf   :  { %3509 = vst.msk [vmem:[#allocation4 + $0x18] sm:$0xff] %vm1853_vm11, %v3437_v30  ;;  %v1788_v35 = vpop.permute.xlu0 %1787  ;;  %2004 = vrot.lane.b32.xlu0 %v1903_v20, %s5015_s30  ;;  %v1906_v8 = vld [vmem:[#allocation4 + $0x28] sm:$0xff] }
 0x3c0   :  { %2006 = vrot.lane.b32.xlu1 %v1904_v44, %s5015_s30  ;;  %1861 = vst.msk [vmem:[#allocation4 + $0x40] sm:$0xff] %vm1851_vm10, %v1788_v35  ;;  %v1907_v33 = vld [vmem:[#allocation4 + $0x30] sm:$0xff] }
 0x3c1   :  { %1862 = vst.msk [vmem:[#allocation4 + $0x48] sm:$0xff] %vm1853_vm11, %v1788_v35  ;;  %v1790_v61 = vpop.permute.xlu1 %1789  ;;  %v1908_v14 = vld [vmem:[#allocation4 + $0x38] sm:$0xff] }
 0x3c2   :  { %1863 = vst.msk [vmem:[#allocation4 + $0x50] sm:$0xff] %vm1851_vm10, %v1790_v61 }
 0x3c3   :  { %1864 = vst.msk [vmem:[#allocation4 + $0x58] sm:$0xff] %vm1853_vm11, %v1790_v61  ;;  %v3439_v28 = vpop.permute.xlu0 %3438  ;;  %2149 = vrot.lane.b32.xlu0 %v1903_v20, %s5016_s3  ;;  %v3554_v61 = vld [vmem:[#allocation4] sm:$0xff] }
 0x3c4   :  { %2151 = vrot.lane.b32.xlu1 %v1904_v44, %s5016_s3  ;;  %3510 = vst.msk [vmem:[#allocation4 + $0x20] sm:$0xff] %vm1851_vm10, %v3439_v28 }
 0x3c5   :  { %3511 = vst.msk [vmem:[#allocation4 + $0x28] sm:$0xff] %vm1853_vm11, %v3439_v28  ;;  %v3441_v42 = vpop.permute.xlu1 %3440  ;;  %v3555_v28 = vld [vmem:[#allocation4 + $0x8] sm:$0xff] }
 0x3c6   :  { %3512 = vst.msk [vmem:[#allocation4 + $0x30] sm:$0xff] %vm1851_vm10, %v3441_v42  ;;  %v3557_v15 = vld [vmem:[#allocation4 + $0x18] sm:$0xff] }
 0x3c7   :  { %3513 = vst.msk [vmem:[#allocation4 + $0x38] sm:$0xff] %vm1853_vm11, %v3441_v42  ;;  %v1792_v17 = vpop.permute.xlu0 %1791  ;;  %2008 = vrot.lane.b32.xlu0 %v1905_v56, %s5015_s30  ;;  %v6304_v37 = vld [vmem:[#allocation4 + $0x40] sm:$0xff] }
 0x3c8   :  { %2010 = vrot.lane.b32.xlu1 %v1906_v8, %s5015_s30  ;;  %1865 = vst.msk [vmem:[#allocation4 + $0x60] sm:$0xff] %vm1851_vm10, %v1792_v17  ;;  %v6306_v4 = vld [vmem:[#allocation4 + $0x48] sm:$0xff] }
 0x3c9   :  { %1866 = vst.msk [vmem:[#allocation4 + $0x68] sm:$0xff] %vm1853_vm11, %v1792_v17  ;;  %v1794_v45 = vpop.permute.xlu1 %1793  ;;  %v6312_v44 = vld [vmem:[#allocation4 + $0x50] sm:$0xff] }
 0x3ca   :  { %1867 = vst.msk [vmem:[#allocation4 + $0x70] sm:$0xff] %vm1851_vm10, %v1794_v45  ;;  %v6314_v30 = vld [vmem:[#allocation4 + $0x58] sm:$0xff] }
 0x3cb   :  { %1868 = vst.msk [vmem:[#allocation4 + $0x78] sm:$0xff] %vm1853_vm11, %v1794_v45  ;;  %v3443_v20 = vpop.permute.xlu0 %3442  ;;  %2153 = vrot.lane.b32.xlu0 %v1905_v56, %s5016_s3  ;;  %v3558_v34 = vld [vmem:[#allocation4 + $0x20] sm:$0xff] }
 0x3cc   :  { %2155 = vrot.lane.b32.xlu1 %v1906_v8, %s5016_s3  ;;  %3514 = vst.msk [vmem:[#allocation4 + $0x40] sm:$0xff] %vm1851_vm10, %v3443_v20  ;;  %v3559_v47 = vld [vmem:[#allocation4 + $0x28] sm:$0xff] }
 0x3cd   :  { %3515 = vst.msk [vmem:[#allocation4 + $0x48] sm:$0xff] %vm1853_vm11, %v3443_v20  ;;  %v3445_v35 = vpop.permute.xlu1 %3444  ;;  %v3560_v16 = vld [vmem:[#allocation4 + $0x30] sm:$0xff] }
 0x3ce   :  { %3516 = vst.msk [vmem:[#allocation4 + $0x50] sm:$0xff] %vm1851_vm10, %v3445_v35  ;;  %v3561_v54 = vld [vmem:[#allocation4 + $0x38] sm:$0xff] }
 0x3cf   :  { %3517 = vst.msk [vmem:[#allocation4 + $0x58] sm:$0xff] %vm1853_vm11, %v3445_v35  ;;  %v1796_v42 = vpop.permute.xlu0 %1795  ;;  %3650 = vrot.lane.b32.xlu0 %v3554_v61, %s5015_s30  ;;  %v6324_v8 = vld [vmem:[#allocation4 + $0x60] sm:$0xff] }
 0x3d0   :  { %3652 = vrot.lane.b32.xlu1 %v3555_v28, %s5015_s30  ;;  %1869 = vst.msk [vmem:[#allocation4 + $0x80] sm:$0xff] %vm1851_vm10, %v1796_v42  ;;  %v6326_v17 = vld [vmem:[#allocation4 + $0x68] sm:$0xff] }
 0x3d1   :  { %1870 = vst.msk [vmem:[#allocation4 + $0x88] sm:$0xff] %vm1853_vm11, %v1796_v42  ;;  %v1798_v56 = vpop.permute.xlu1 %1797  ;;  %v6332_v20 = vld [vmem:[#allocation4 + $0x70] sm:$0xff] }
 0x3d2   :  { %1871 = vst.msk [vmem:[#allocation4 + $0x90] sm:$0xff] %vm1851_vm10, %v1798_v56  ;;  %v6334_v35 = vld [vmem:[#allocation4 + $0x78] sm:$0xff] }
 0x3d3   :  { %1872 = vst.msk [vmem:[#allocation4 + $0x98] sm:$0xff] %vm1853_vm11, %v1798_v56  ;;  %v3447_v45 = vpop.permute.xlu0 %3446  ;;  %3794 = vrot.lane.b32.xlu0 %v3554_v61, %s5016_s3  ;;  %v3562_v12 = vld [vmem:[#allocation4 + $0x40] sm:$0xff] }
 0x3d4   :  { %3796 = vrot.lane.b32.xlu1 %v3555_v28, %s5016_s3  ;;  %3518 = vst.msk [vmem:[#allocation4 + $0x60] sm:$0xff] %vm1851_vm10, %v3447_v45  ;;  %v3563_v24 = vld [vmem:[#allocation4 + $0x48] sm:$0xff] }
 0x3d5   :  { %3519 = vst.msk [vmem:[#allocation4 + $0x68] sm:$0xff] %vm1853_vm11, %v3447_v45  ;;  %v3449_v42 = vpop.permute.xlu1 %3448 }
 0x3d6   :  { %3520 = vst.msk [vmem:[#allocation4 + $0x70] sm:$0xff] %vm1851_vm10, %v3449_v42 }
 0x3d7   :  { %3521 = vst.msk [vmem:[#allocation4 + $0x78] sm:$0xff] %vm1853_vm11, %v3449_v42  ;;  %v1800_v56 = vpop.permute.xlu0 %1799  ;;  %2012 = vrot.lane.b32.xlu0 %v1907_v33, %s5015_s30  ;;  %v6344_v28 = vld [vmem:[#allocation4 + $0x80] sm:$0xff] }
 0x3d8   :  { %2014 = vrot.lane.b32.xlu1 %v1908_v14, %s5015_s30  ;;  %1873 = vst.msk [vmem:[#allocation4 + $0xa0] sm:$0xff] %vm1851_vm10, %v1800_v56  ;;  %v6346_v45 = vld [vmem:[#allocation4 + $0x88] sm:$0xff] }
 0x3d9   :  { %1874 = vst.msk [vmem:[#allocation4 + $0xa8] sm:$0xff] %vm1853_vm11, %v1800_v56  ;;  %v1802_v61 = vpop.permute.xlu1 %1801  ;;  %v6352_v42 = vld [vmem:[#allocation4 + $0x90] sm:$0xff] }
 0x3da   :  { %1875 = vst.msk [vmem:[#allocation4 + $0xb0] sm:$0xff] %vm1851_vm10, %v1802_v61  ;;  %v6354_v56 = vld [vmem:[#allocation4 + $0x98] sm:$0xff] }
 0x3db   :  { %1876 = vst.msk [vmem:[#allocation4 + $0xb8] sm:$0xff] %vm1853_vm11, %v1802_v61  ;;  %v3451_v5 = vpop.permute.xlu0 %3450  ;;  %2157 = vrot.lane.b32.xlu0 %v1907_v33, %s5016_s3  ;;  %v3556_v61 = vld [vmem:[#allocation4 + $0x10] sm:$0xff] }
 0x3dc   :  { %2159 = vrot.lane.b32.xlu1 %v1908_v14, %s5016_s3  ;;  %3522 = vst.msk [vmem:[#allocation4 + $0x80] sm:$0xff] %vm1851_vm10, %v3451_v5 }
 0x3dd   :  { %3523 = vst.msk [vmem:[#allocation4 + $0x88] sm:$0xff] %vm1853_vm11, %v3451_v5  ;;  %v3453_v0 = vpop.permute.xlu1 %3452 }
 0x3de   :  { %3524 = vst.msk [vmem:[#allocation4 + $0x90] sm:$0xff] %vm1851_vm10, %v3453_v0 }
 0x3df   :  { %3525 = vst.msk [vmem:[#allocation4 + $0x98] sm:$0xff] %vm1853_vm11, %v3453_v0  ;;  %v1804_v21 = vpop.permute.xlu0 %1803  ;;  %3654 = vrot.lane.b32.xlu0 %v3556_v61, %s5015_s30  ;;  %v6364_v33 = vld [vmem:[#allocation4 + $0xa0] sm:$0xff] }
 0x3e0   :  { %3656 = vrot.lane.b32.xlu1 %v3557_v15, %s5015_s30  ;;  %1877 = vst.msk [vmem:[#allocation4 + $0xc0] sm:$0xff] %vm1851_vm10, %v1804_v21  ;;  %v6366_v14 = vld [vmem:[#allocation4 + $0xa8] sm:$0xff] }
 0x3e1   :  { %1878 = vst.msk [vmem:[#allocation4 + $0xc8] sm:$0xff] %vm1853_vm11, %v1804_v21  ;;  %v1806_v5 = vpop.permute.xlu1 %1805  ;;  %v6372_v36 = vld [vmem:[#allocation4 + $0xb0] sm:$0xff] }
 0x3e2   :  { %1879 = vst.msk [vmem:[#allocation4 + $0xd0] sm:$0xff] %vm1851_vm10, %v1806_v5  ;;  %v6374_v21 = vld [vmem:[#allocation4 + $0xb8] sm:$0xff] }
 0x3e3   :  { %1880 = vst.msk [vmem:[#allocation4 + $0xd8] sm:$0xff] %vm1853_vm11, %v1806_v5  ;;  %v3455_v0 = vpop.permute.xlu0 %3454  ;;  %3798 = vrot.lane.b32.xlu0 %v3556_v61, %s5016_s3 }
 0x3e4   :  { %3800 = vrot.lane.b32.xlu1 %v3557_v15, %s5016_s3  ;;  %3526 = vst.msk [vmem:[#allocation4 + $0xa0] sm:$0xff] %vm1851_vm10, %v3455_v0 }
 0x3e5   :  { %3527 = vst.msk [vmem:[#allocation4 + $0xa8] sm:$0xff] %vm1853_vm11, %v3455_v0  ;;  %v3457_v62 = vpop.permute.xlu1 %3456 }
 0x3e6   :  { %3528 = vst.msk [vmem:[#allocation4 + $0xb0] sm:$0xff] %vm1851_vm10, %v3457_v62 }
 0x3e7   :  { %3529 = vst.msk [vmem:[#allocation4 + $0xb8] sm:$0xff] %vm1853_vm11, %v3457_v62  ;;  %v1808_v5 = vpop.permute.xlu0 %1807  ;;  %2016 = vrot.lane.b32.xlu0 %v6304_v37, %s5015_s30  ;;  %v6386_v61 = vld [vmem:[#allocation4 + $0xc0] sm:$0xff] }
 0x3e8   :  { %2018 = vrot.lane.b32.xlu1 %v6306_v4, %s5015_s30  ;;  %1881 = vst.msk [vmem:[#allocation4 + $0xe0] sm:$0xff] %vm1851_vm10, %v1808_v5  ;;  %v6388_v0 = vld [vmem:[#allocation4 + $0xc8] sm:$0xff] }
 0x3e9   :  { %1882 = vst.msk [vmem:[#allocation4 + $0xe8] sm:$0xff] %vm1853_vm11, %v1808_v5  ;;  %v1810_v15 = vpop.permute.xlu1 %1809  ;;  %v6396_v5 = vld [vmem:[#allocation4 + $0xd0] sm:$0xff] }
 0x3ea   :  { %1883 = vst.msk [vmem:[#allocation4 + $0xf0] sm:$0xff] %vm1851_vm10, %v1810_v15  ;;  %v6398_v7 = vld [vmem:[#allocation4 + $0xd8] sm:$0xff] }
 0x3eb   :  { %1884 = vst.msk [vmem:[#allocation4 + $0xf8] sm:$0xff] %vm1853_vm11, %v1810_v15  ;;  %v3459_v62 = vpop.permute.xlu0 %3458  ;;  %2161 = vrot.lane.b32.xlu0 %v6304_v37, %s5016_s3 }
 0x3ec   :  { %2163 = vrot.lane.b32.xlu1 %v6306_v4, %s5016_s3  ;;  %3530 = vst.msk [vmem:[#allocation4 + $0xc0] sm:$0xff] %vm1851_vm10, %v3459_v62 }
 0x3ed   :  { %3531 = vst.msk [vmem:[#allocation4 + $0xc8] sm:$0xff] %vm1853_vm11, %v3459_v62  ;;  %v3461_v15 = vpop.permute.xlu1 %3460 }
 0x3ee   :  { %3532 = vst.msk [vmem:[#allocation4 + $0xd0] sm:$0xff] %vm1851_vm10, %v3461_v15 }
 0x3ef   :  { %3533 = vst.msk [vmem:[#allocation4 + $0xd8] sm:$0xff] %vm1853_vm11, %v3461_v15  ;;  %v1812_v53 = vpop.permute.xlu0 %1811  ;;  %3658 = vrot.lane.b32.xlu0 %v3558_v34, %s5015_s30  ;;  %v6408_v4 = vld [vmem:[#allocation4 + $0xe0] sm:$0xff] }
 0x3f0   :  { %3660 = vrot.lane.b32.xlu1 %v3559_v47, %s5015_s30  ;;  %1885 = vst.msk [vmem:[#allocation4 + $0x100] sm:$0xff] %vm1851_vm10, %v1812_v53  ;;  %v6410_v62 = vld [vmem:[#allocation4 + $0xe8] sm:$0xff] }
 0x3f1   :  { %1886 = vst.msk [vmem:[#allocation4 + $0x108] sm:$0xff] %vm1853_vm11, %v1812_v53  ;;  %v1814_v37 = vpop.permute.xlu1 %1813  ;;  %v6416_v48 = vld [vmem:[#allocation4 + $0xf0] sm:$0xff] }
 0x3f2   :  { %1887 = vst.msk [vmem:[#allocation4 + $0x110] sm:$0xff] %vm1851_vm10, %v1814_v37  ;;  %v6418_v53 = vld [vmem:[#allocation4 + $0xf8] sm:$0xff] }
 0x3f3   :  { %1888 = vst.msk [vmem:[#allocation4 + $0x118] sm:$0xff] %vm1853_vm11, %v1814_v37  ;;  %v3463_v15 = vpop.permute.xlu0 %3462  ;;  %3802 = vrot.lane.b32.xlu0 %v3558_v34, %s5016_s3 }
 0x3f4   :  { %3804 = vrot.lane.b32.xlu1 %v3559_v47, %s5016_s3  ;;  %3534 = vst.msk [vmem:[#allocation4 + $0xe0] sm:$0xff] %vm1851_vm10, %v3463_v15 }
 0x3f5   :  { %3535 = vst.msk [vmem:[#allocation4 + $0xe8] sm:$0xff] %vm1853_vm11, %v3463_v15  ;;  %v3465_v2 = vpop.permute.xlu1 %3464 }
 0x3f6   :  { %3536 = vst.msk [vmem:[#allocation4 + $0xf0] sm:$0xff] %vm1851_vm10, %v3465_v2 }
 0x3f7   :  { %3537 = vst.msk [vmem:[#allocation4 + $0xf8] sm:$0xff] %vm1853_vm11, %v3465_v2  ;;  %v1816_v37 = vpop.permute.xlu0 %1815  ;;  %2020 = vrot.lane.b32.xlu0 %v6312_v44, %s5015_s30  ;;  %v6430_v47 = vld [vmem:[#allocation4 + $0x100] sm:$0xff] }
 0x3f8   :  { %2022 = vrot.lane.b32.xlu1 %v6314_v30, %s5015_s30  ;;  %1889 = vst.msk [vmem:[#allocation4 + $0x120] sm:$0xff] %vm1851_vm10, %v1816_v37  ;;  %v6432_v15 = vld [vmem:[#allocation4 + $0x108] sm:$0xff] }
 0x3f9   :  { %1890 = vst.msk [vmem:[#allocation4 + $0x128] sm:$0xff] %vm1853_vm11, %v1816_v37  ;;  %v1818_v34 = vpop.permute.xlu1 %1817  ;;  %v6440_v37 = vld [vmem:[#allocation4 + $0x110] sm:$0xff] }
 0x3fa   :  { %1891 = vst.msk [vmem:[#allocation4 + $0x130] sm:$0xff] %vm1851_vm10, %v1818_v34  ;;  %v6442_v49 = vld [vmem:[#allocation4 + $0x118] sm:$0xff] }
 0x3fb   :  { %1892 = vst.msk [vmem:[#allocation4 + $0x138] sm:$0xff] %vm1853_vm11, %v1818_v34  ;;  %v3467_v2 = vpop.permute.xlu0 %3466  ;;  %2165 = vrot.lane.b32.xlu0 %v6312_v44, %s5016_s3 }
 0x3fc   :  { %2167 = vrot.lane.b32.xlu1 %v6314_v30, %s5016_s3  ;;  %3538 = vst.msk [vmem:[#allocation4 + $0x100] sm:$0xff] %vm1851_vm10, %v3467_v2 }
 0x3fd   :  { %3539 = vst.msk [vmem:[#allocation4 + $0x108] sm:$0xff] %vm1853_vm11, %v3467_v2  ;;  %v3469_v34 = vpop.permute.xlu1 %3468 }
 0x3fe   :  { %3540 = vst.msk [vmem:[#allocation4 + $0x110] sm:$0xff] %vm1851_vm10, %v3469_v34 }
 0x3ff   :  { %3541 = vst.msk [vmem:[#allocation4 + $0x118] sm:$0xff] %vm1853_vm11, %v3469_v34  ;;  %v1820_v26 = vpop.permute.xlu0 %1819  ;;  %3662 = vrot.lane.b32.xlu0 %v3560_v16, %s5015_s30  ;;  %v6452_v30 = vld [vmem:[#allocation4 + $0x120] sm:$0xff] }
 0x400   :  { %3664 = vrot.lane.b32.xlu1 %v3561_v54, %s5015_s30  ;;  %1893 = vst.msk [vmem:[#allocation4 + $0x140] sm:$0xff] %vm1851_vm10, %v1820_v26  ;;  %v6454_v2 = vld [vmem:[#allocation4 + $0x128] sm:$0xff] }
 0x401   :  { %1894 = vst.msk [vmem:[#allocation4 + $0x148] sm:$0xff] %vm1853_vm11, %v1820_v26  ;;  %v1822_v44 = vpop.permute.xlu1 %1821  ;;  %v6460_v41 = vld [vmem:[#allocation4 + $0x130] sm:$0xff] }
 0x402   :  { %1895 = vst.msk [vmem:[#allocation4 + $0x150] sm:$0xff] %vm1851_vm10, %v1822_v44  ;;  %v6462_v26 = vld [vmem:[#allocation4 + $0x138] sm:$0xff] }
 0x403   :  { %1896 = vst.msk [vmem:[#allocation4 + $0x158] sm:$0xff] %vm1853_vm11, %v1822_v44  ;;  %v3471_v34 = vpop.permute.xlu0 %3470  ;;  %3806 = vrot.lane.b32.xlu0 %v3560_v16, %s5016_s3 }
 0x404   :  { %3808 = vrot.lane.b32.xlu1 %v3561_v54, %s5016_s3  ;;  %3542 = vst.msk [vmem:[#allocation4 + $0x120] sm:$0xff] %vm1851_vm10, %v3471_v34 }
 0x405   :  { %3543 = vst.msk [vmem:[#allocation4 + $0x128] sm:$0xff] %vm1853_vm11, %v3471_v34  ;;  %v3473_v52 = vpop.permute.xlu1 %3472 }
 0x406   :  { %3544 = vst.msk [vmem:[#allocation4 + $0x130] sm:$0xff] %vm1851_vm10, %v3473_v52 }
 0x407   :  { %3545 = vst.msk [vmem:[#allocation4 + $0x138] sm:$0xff] %vm1853_vm11, %v3473_v52  ;;  %v1824_v44 = vpop.permute.xlu0 %1823  ;;  %2024 = vrot.lane.b32.xlu0 %v6324_v8, %s5015_s30  ;;  %v6474_v16 = vld [vmem:[#allocation4 + $0x140] sm:$0xff] }
 0x408   :  { %2026 = vrot.lane.b32.xlu1 %v6326_v17, %s5015_s30  ;;  %1897 = vst.msk [vmem:[#allocation4 + $0x160] sm:$0xff] %vm1851_vm10, %v1824_v44  ;;  %v6476_v34 = vld [vmem:[#allocation4 + $0x148] sm:$0xff] }
 0x409   :  { %1898 = vst.msk [vmem:[#allocation4 + $0x168] sm:$0xff] %vm1853_vm11, %v1824_v44  ;;  %v1826_v54 = vpop.permute.xlu1 %1825  ;;  %v6484_v44 = vld [vmem:[#allocation4 + $0x150] sm:$0xff] }
 0x40a   :  { %1899 = vst.msk [vmem:[#allocation4 + $0x170] sm:$0xff] %vm1851_vm10, %v1826_v54  ;;  %v6486_v29 = vld [vmem:[#allocation4 + $0x158] sm:$0xff] }
 0x40b   :  { %1900 = vst.msk [vmem:[#allocation4 + $0x178] sm:$0xff] %vm1853_vm11, %v1826_v54  ;;  %v3475_v52 = vpop.permute.xlu0 %3474  ;;  %2169 = vrot.lane.b32.xlu0 %v6324_v8, %s5016_s3 }
 0x40c   :  { %2171 = vrot.lane.b32.xlu1 %v6326_v17, %s5016_s3  ;;  %3546 = vst.msk [vmem:[#allocation4 + $0x140] sm:$0xff] %vm1851_vm10, %v3475_v52 }
 0x40d   :  { %3547 = vst.msk [vmem:[#allocation4 + $0x148] sm:$0xff] %vm1853_vm11, %v3475_v52  ;;  %v3477_v54 = vpop.permute.xlu1 %3476 }
 0x40e   :  { %3548 = vst.msk [vmem:[#allocation4 + $0x150] sm:$0xff] %vm1851_vm10, %v3477_v54 }
 0x40f   :  { %3549 = vst.msk [vmem:[#allocation4 + $0x158] sm:$0xff] %vm1853_vm11, %v3477_v54  ;;  %3666 = vrot.lane.b32.xlu0 %v3562_v12, %s5015_s30  ;;  %v6492_v8 = vld [vmem:[#allocation4 + $0x160] sm:$0xff] }
 0x410   :  { %3668 = vrot.lane.b32.xlu1 %v3563_v24, %s5015_s30  ;;  %7149 = vst [vmem:[#allocation28_spill] sm:$0xff] %v6492_v8  ;;  %v6494_v17 = vld [vmem:[#allocation4 + $0x168] sm:$0xff] }
 0x411   :  { %7150 = vst [vmem:[#allocation29_spill] sm:$0xff] %v6494_v17  ;;  %v6500_v54 = vld [vmem:[#allocation4 + $0x170] sm:$0xff] }
 0x412   :  { %7151 = vst [vmem:[#allocation30_spill] sm:$0xff] %v6500_v54  ;;  %v6502_v19 = vld [vmem:[#allocation4 + $0x178] sm:$0xff]  ;;  %v3567_v54 = vld [vmem:[#allocation4 + $0x68] sm:$0xff] }
 0x413   :  { %v3479_v52 = vpop.permute.xlu0 %3478  ;;  %3810 = vrot.lane.b32.xlu0 %v3562_v12, %s5016_s3  ;;  %7152 = vst [vmem:[#allocation31_spill] sm:$0xff] %v6502_v19  ;;  %v3564_v12 = vld [vmem:[#allocation4 + $0x50] sm:$0xff]  ;;  %v3566_v19 = vld [vmem:[#allocation4 + $0x60] sm:$0xff] }
 0x414   :  { %3812 = vrot.lane.b32.xlu1 %v3563_v24, %s5016_s3  ;;  %3550 = vst.msk [vmem:[#allocation4 + $0x160] sm:$0xff] %vm1851_vm10, %v3479_v52  ;;  %v3565_v24 = vld [vmem:[#allocation4 + $0x58] sm:$0xff] }
 0x415   :  { %3551 = vst.msk [vmem:[#allocation4 + $0x168] sm:$0xff] %vm1853_vm11, %v3479_v52  ;;  %v3481_v63 = vpop.permute.xlu1 %3480 }
 0x416   :  { %3552 = vst.msk [vmem:[#allocation4 + $0x170] sm:$0xff] %vm1851_vm10, %v3481_v63 }
 0x417   :  { %3553 = vst.msk [vmem:[#allocation4 + $0x178] sm:$0xff] %vm1853_vm11, %v3481_v63  ;;  %2028 = vrot.lane.b32.xlu0 %v6332_v20, %s5015_s30 }
 0x418   :  { %2030 = vrot.lane.b32.xlu1 %v6334_v35, %s5015_s30 }
 0x41b   :  { %2173 = vrot.lane.b32.xlu0 %v6332_v20, %s5016_s3 }
 0x41c   :  { %2175 = vrot.lane.b32.xlu1 %v6334_v35, %s5016_s3 }
 0x41f   :  { %3670 = vrot.lane.b32.xlu0 %v3564_v12, %s5015_s30 }
 0x420   :  { %3672 = vrot.lane.b32.xlu1 %v3565_v24, %s5015_s30 }
 0x423   :  { %3814 = vrot.lane.b32.xlu0 %v3564_v12, %s5016_s3 }
 0x424   :  { %3816 = vrot.lane.b32.xlu1 %v3565_v24, %s5016_s3 }
 0x427   :  { %2032 = vrot.lane.b32.xlu0 %v6344_v28, %s5015_s30 }
 0x428   :  { %2034 = vrot.lane.b32.xlu1 %v6346_v45, %s5015_s30 }
 0x429   :  { %v2001_v63 = vpop.permute.xlu0 %2000 }
 0x42a   :  { %v2003_v20 = vpop.permute.xlu1 %2002 }
 0x42b   :  { %2177 = vrot.lane.b32.xlu0 %v6344_v28, %s5016_s3  ;;  %v2097_v12 = vsel %vm2096_vm12, %v2001_v63, %v2003_v20 }
 0x42c   :  { %2179 = vrot.lane.b32.xlu1 %v6346_v45, %s5016_s3 }
 0x42d   :  { %v2146_v35 = vpop.permute.xlu0 %2145 }
 0x42e   :  { %v2148_v52 = vpop.permute.xlu1 %2147 }
 0x42f   :  { %v2242_v24 = vsel %vm2241_vm13, %v2146_v35, %v2148_v52  ;;  %3674 = vrot.lane.b32.xlu0 %v3566_v19, %s5015_s30 }
 0x430   :  { %v2290_v17 = vsel %vm1949_vm14, %v2097_v12, %v2242_v24  ;;  %3676 = vrot.lane.b32.xlu1 %v3567_v54, %s5015_s30 }
 0x431   :  { %v2314_v28 = vadd.f32 %v2290_v17, %v6079_v9  ;;  %v2005_v45 = vpop.permute.xlu0 %2004 }
 0x432   :  { %v2007_v8 = vpop.permute.xlu1 %2006 }
 0x433   :  { %2338 = vst [vmem:[%s7105_s2] sm:$0xff] %v2314_v28  ;;  %3818 = vrot.lane.b32.xlu0 %v3566_v19, %s5016_s3  ;;  %v2098_v35 = vsel %vm2096_vm12, %v2005_v45, %v2007_v8  ;;  %v3568_v45 = vld [vmem:[#allocation4 + $0x70] sm:$0xff] }
 0x434   :  { %3820 = vrot.lane.b32.xlu1 %v3567_v54, %s5016_s3 }
 0x435   :  { %v2150_v63 = vpop.permute.xlu0 %2149 }
 0x436   :  { %v2152_v20 = vpop.permute.xlu1 %2151 }
 0x437   :  { %v2243_v52 = vsel %vm2241_vm13, %v2150_v63, %v2152_v20  ;;  %2036 = vrot.lane.b32.xlu0 %v6352_v42, %s5015_s30 }
 0x438   :  { %v2291_v12 = vsel %vm1949_vm14, %v2098_v35, %v2243_v52  ;;  %2038 = vrot.lane.b32.xlu1 %v6354_v56, %s5015_s30 }
 0x439   :  { %v2315_v9 = vadd.f32 %v2291_v12, %v6082_v38  ;;  %v2009_v19 = vpop.permute.xlu0 %2008  ;;  %v3569_v38 = vld [vmem:[#allocation4 + $0x78] sm:$0xff] }
 0x43a   :  { %v2011_v17 = vpop.permute.xlu1 %2010 }
 0x43b   :  { %2339 = vst [vmem:[%s7105_s2 + $0x8] sm:$0xff] %v2315_v9  ;;  %2181 = vrot.lane.b32.xlu0 %v6352_v42, %s5016_s3  ;;  %v2099_v24 = vsel %vm2096_vm12, %v2009_v19, %v2011_v17 }
 0x43c   :  { %2183 = vrot.lane.b32.xlu1 %v6354_v56, %s5016_s3 }
 0x43d   :  { %v2154_v8 = vpop.permute.xlu0 %2153 }
 0x43e   :  { %v2156_v54 = vpop.permute.xlu1 %2155 }
 0x43f   :  { %v2244_v28 = vsel %vm2241_vm13, %v2154_v8, %v2156_v54  ;;  %3678 = vrot.lane.b32.xlu0 %v3568_v45, %s5015_s30 }
 0x440   :  { %v2292_v63 = vsel %vm1949_vm14, %v2099_v24, %v2244_v28  ;;  %3680 = vrot.lane.b32.xlu1 %v3569_v38, %s5015_s30 }
 0x441   :  { %v2316_v42 = vadd.f32 %v2292_v63, %v6085_v27  ;;  %v3651_v20 = vpop.permute.xlu0 %3650 }
 0x442   :  { %v3653_v35 = vpop.permute.xlu1 %3652 }
 0x443   :  { %2340 = vst [vmem:[%s7105_s2 + $0x10] sm:$0xff] %v2316_v42  ;;  %3822 = vrot.lane.b32.xlu0 %v3568_v45, %s5016_s3  ;;  %v3746_v12 = vsel %vm2096_vm12, %v3651_v20, %v3653_v35 }
 0x444   :  { %3824 = vrot.lane.b32.xlu1 %v3569_v38, %s5016_s3  ;;  %v3570_v38 = vld [vmem:[#allocation4 + $0x80] sm:$0xff] }
 0x445   :  { %v3795_v56 = vpop.permute.xlu0 %3794 }
 0x446   :  { %v3797_v52 = vpop.permute.xlu1 %3796 }
 0x447   :  { %v3890_v9 = vsel %vm2241_vm13, %v3795_v56, %v3797_v52  ;;  %2040 = vrot.lane.b32.xlu0 %v6364_v33, %s5015_s30 }
 0x448   :  { %v3938_v19 = vsel %vm1949_vm14, %v3746_v12, %v3890_v9  ;;  %2042 = vrot.lane.b32.xlu1 %v6366_v14, %s5015_s30 }
 0x449   :  { %v3962_v27 = vadd.f32 %v3938_v19, %v6091_v25  ;;  %v2013_v17 = vpop.permute.xlu0 %2012  ;;  %v3571_v25 = vld [vmem:[#allocation4 + $0x88] sm:$0xff] }
 0x44a   :  { %v2015_v8 = vpop.permute.xlu1 %2014 }
 0x44b   :  { %4165 = vst [vmem:[%s7105_s2 + $0xc0] sm:$0xff] %v3962_v27  ;;  %2185 = vrot.lane.b32.xlu0 %v6364_v33, %s5016_s3  ;;  %v2100_v28 = vsel %vm2096_vm12, %v2013_v17, %v2015_v8 }
 0x44c   :  { %2187 = vrot.lane.b32.xlu1 %v6366_v14, %s5016_s3 }
 0x44d   :  { %v2158_v54 = vpop.permute.xlu0 %2157 }
 0x44e   :  { %v2160_v24 = vpop.permute.xlu1 %2159 }
 0x44f   :  { %v2245_v45 = vsel %vm2241_vm13, %v2158_v54, %v2160_v24  ;;  %3682 = vrot.lane.b32.xlu0 %v3570_v38, %s5015_s30  ;;  %v3572_v24 = vld [vmem:[#allocation4 + $0x90] sm:$0xff] }
 0x450   :  { %v2293_v63 = vsel %vm1949_vm14, %v2100_v28, %v2245_v45  ;;  %3684 = vrot.lane.b32.xlu1 %v3571_v25, %s5015_s30 }
 0x451   :  { %v2317_v33 = vadd.f32 %v2293_v63, %v6088_v58  ;;  %v3655_v42 = vpop.permute.xlu0 %3654 }
 0x452   :  { %v3657_v20 = vpop.permute.xlu1 %3656 }
 0x453   :  { %2341 = vst [vmem:[%s7105_s2 + $0x18] sm:$0xff] %v2317_v33  ;;  %3826 = vrot.lane.b32.xlu0 %v3570_v38, %s5016_s3  ;;  %v3747_v56 = vsel %vm2096_vm12, %v3655_v42, %v3657_v20 }
 0x454   :  { %3828 = vrot.lane.b32.xlu1 %v3571_v25, %s5016_s3 }
 0x455   :  { %v3799_v14 = vpop.permute.xlu0 %3798 }
 0x456   :  { %v3801_v35 = vpop.permute.xlu1 %3800 }
 0x457   :  { %v3891_v52 = vsel %vm2241_vm13, %v3799_v14, %v3801_v35  ;;  %2044 = vrot.lane.b32.xlu0 %v6372_v36, %s5015_s30 }
 0x458   :  { %v3939_v12 = vsel %vm1949_vm14, %v3747_v56, %v3891_v52  ;;  %2046 = vrot.lane.b32.xlu1 %v6374_v21, %s5015_s30 }
 0x459   :  { %v3963_v58 = vadd.f32 %v3939_v12, %v6094_v32  ;;  %v2017_v9 = vpop.permute.xlu0 %2016  ;;  %v3573_v32 = vld [vmem:[#allocation4 + $0x98] sm:$0xff] }
 0x45a   :  { %v2019_v19 = vpop.permute.xlu1 %2018 }
 0x45b   :  { %4166 = vst [vmem:[%s7105_s2 + $0xc8] sm:$0xff] %v3963_v58  ;;  %2189 = vrot.lane.b32.xlu0 %v6372_v36, %s5016_s3  ;;  %v2101_v8 = vsel %vm2096_vm12, %v2017_v9, %v2019_v19  ;;  %v3574_v58 = vld [vmem:[#allocation4 + $0xa0] sm:$0xff] }
 0x45c   :  { %2191 = vrot.lane.b32.xlu1 %v6374_v21, %s5016_s3 }
 0x45d   :  { %v2162_v27 = vpop.permute.xlu0 %2161 }
 0x45e   :  { %v2164_v17 = vpop.permute.xlu1 %2163 }
 0x45f   :  { %v2246_v54 = vsel %vm2241_vm13, %v2162_v27, %v2164_v17  ;;  %3686 = vrot.lane.b32.xlu0 %v3572_v24, %s5015_s30 }
 0x460   :  { %v2294_v28 = vsel %vm1949_vm14, %v2101_v8, %v2246_v54  ;;  %3688 = vrot.lane.b32.xlu1 %v3573_v32, %s5015_s30 }
 0x461   :  { %v2318_v36 = vadd.f32 %v2294_v28, %v6097_v13  ;;  %v3659_v45 = vpop.permute.xlu0 %3658 }
 0x462   :  { %v3661_v38 = vpop.permute.xlu1 %3660 }
 0x463   :  { %2342 = vst [vmem:[%s7105_s2 + $0x20] sm:$0xff] %v2318_v36  ;;  %3830 = vrot.lane.b32.xlu0 %v3572_v24, %s5016_s3  ;;  %v3748_v63 = vsel %vm2096_vm12, %v3659_v45, %v3661_v38 }
 0x464   :  { %3832 = vrot.lane.b32.xlu1 %v3573_v32, %s5016_s3 }
 0x465   :  { %v3803_v21 = vpop.permute.xlu0 %3802 }
 0x466   :  { %v3805_v25 = vpop.permute.xlu1 %3804 }
 0x467   :  { %v3892_v33 = vsel %vm2241_vm13, %v3803_v21, %v3805_v25  ;;  %2048 = vrot.lane.b32.xlu0 %v6386_v61, %s5015_s30  ;;  %v3576_v25 = vld [vmem:[#allocation4 + $0xb0] sm:$0xff] }
 0x468   :  { %v3940_v42 = vsel %vm1949_vm14, %v3748_v63, %v3892_v33  ;;  %2050 = vrot.lane.b32.xlu1 %v6388_v0, %s5015_s30 }
 0x469   :  { %v3964_v13 = vadd.f32 %v3940_v42, %v6103_v43  ;;  %v2021_v20 = vpop.permute.xlu0 %2020  ;;  %v3575_v43 = vld [vmem:[#allocation4 + $0xa8] sm:$0xff] }
 0x46a   :  { %v2023_v14 = vpop.permute.xlu1 %2022 }
 0x46b   :  { %4167 = vst [vmem:[%s7105_s2 + $0xd0] sm:$0xff] %v3964_v13  ;;  %2193 = vrot.lane.b32.xlu0 %v6386_v61, %s5016_s3  ;;  %v2102_v52 = vsel %vm2096_vm12, %v2021_v20, %v2023_v14 }
 0x46c   :  { %2195 = vrot.lane.b32.xlu1 %v6388_v0, %s5016_s3 }
 0x46d   :  { %v2166_v35 = vpop.permute.xlu0 %2165 }
 0x46e   :  { %v2168_v56 = vpop.permute.xlu1 %2167 }
 0x46f   :  { %v2247_v12 = vsel %vm2241_vm13, %v2166_v35, %v2168_v56  ;;  %3690 = vrot.lane.b32.xlu0 %v3574_v58, %s5015_s30 }
 0x470   :  { %v2295_v9 = vsel %vm1949_vm14, %v2102_v52, %v2247_v12  ;;  %3692 = vrot.lane.b32.xlu1 %v3575_v43, %s5015_s30 }
 0x471   :  { %v2319_v61 = vadd.f32 %v2295_v9, %v6100_v46  ;;  %v3663_v19 = vpop.permute.xlu0 %3662 }
 0x472   :  { %v3665_v27 = vpop.permute.xlu1 %3664 }
 0x473   :  { %2343 = vst [vmem:[%s7105_s2 + $0x28] sm:$0xff] %v2319_v61  ;;  %3834 = vrot.lane.b32.xlu0 %v3574_v58, %s5016_s3  ;;  %v3749_v8 = vsel %vm2096_vm12, %v3663_v19, %v3665_v27  ;;  %v3578_v61 = vld [vmem:[#allocation4 + $0xc0] sm:$0xff] }
 0x474   :  { %3836 = vrot.lane.b32.xlu1 %v3575_v43, %s5016_s3 }
 0x475   :  { %v3807_v0 = vpop.permute.xlu0 %3806 }
 0x476   :  { %v3809_v17 = vpop.permute.xlu1 %3808 }
 0x477   :  { %v3893_v54 = vsel %vm2241_vm13, %v3807_v0, %v3809_v17  ;;  %2052 = vrot.lane.b32.xlu0 %v6396_v5, %s5015_s30 }
 0x478   :  { %v3941_v24 = vsel %vm1949_vm14, %v3749_v8, %v3893_v54  ;;  %2054 = vrot.lane.b32.xlu1 %v6398_v7, %s5015_s30 }
 0x479   :  { %v3965_v46 = vadd.f32 %v3941_v24, %v6106_v39  ;;  %v2025_v32 = vpop.permute.xlu0 %2024  ;;  %v3577_v39 = vld [vmem:[#allocation4 + $0xb8] sm:$0xff] }
 0x47a   :  { %v2027_v28 = vpop.permute.xlu1 %2026 }
 0x47b   :  { %4168 = vst [vmem:[%s7105_s2 + $0xd8] sm:$0xff] %v3965_v46  ;;  %2197 = vrot.lane.b32.xlu0 %v6396_v5, %s5016_s3  ;;  %v2103_v38 = vsel %vm2096_vm12, %v2025_v32, %v2027_v28 }
 0x47c   :  { %2199 = vrot.lane.b32.xlu1 %v6398_v7, %s5016_s3 }
 0x47d   :  { %v2170_v36 = vpop.permute.xlu0 %2169 }
 0x47e   :  { %v2172_v45 = vpop.permute.xlu1 %2171 }
 0x47f   :  { %v2248_v21 = vsel %vm2241_vm13, %v2170_v36, %v2172_v45  ;;  %3694 = vrot.lane.b32.xlu0 %v3576_v25, %s5015_s30 }
 0x480   :  { %v2296_v63 = vsel %vm1949_vm14, %v2103_v38, %v2248_v21  ;;  %3696 = vrot.lane.b32.xlu1 %v3577_v39, %s5015_s30  ;;  %v3580_v21 = vld [vmem:[#allocation4 + $0xd0] sm:$0xff] }
 0x481   :  { %v2320_v5 = vadd.f32 %v2296_v63, %v6109_v40  ;;  %v3667_v33 = vpop.permute.xlu0 %3666 }
 0x482   :  { %v3669_v42 = vpop.permute.xlu1 %3668 }
 0x483   :  { %2344 = vst [vmem:[%s7105_s2 + $0x30] sm:$0xff] %v2320_v5  ;;  %3838 = vrot.lane.b32.xlu0 %v3576_v25, %s5016_s3  ;;  %v3750_v20 = vsel %vm2096_vm12, %v3667_v33, %v3669_v42 }
 0x484   :  { %3840 = vrot.lane.b32.xlu1 %v3577_v39, %s5016_s3 }
 0x485   :  { %v3811_v7 = vpop.permute.xlu0 %3810 }
 0x486   :  { %v3813_v13 = vpop.permute.xlu1 %3812 }
 0x487   :  { %v3894_v14 = vsel %vm2241_vm13, %v3811_v7, %v3813_v13  ;;  %2056 = vrot.lane.b32.xlu0 %v6408_v4, %s5015_s30 }
 0x488   :  { %v3942_v35 = vsel %vm1949_vm14, %v3750_v20, %v3894_v14  ;;  %2058 = vrot.lane.b32.xlu1 %v6410_v62, %s5015_s30 }
 0x489   :  { %v3966_v40 = vadd.f32 %v3942_v35, %v6115_v18  ;;  %v2029_v56 = vpop.permute.xlu0 %2028  ;;  %v3579_v18 = vld [vmem:[#allocation4 + $0xc8] sm:$0xff] }
 0x48a   :  { %v2031_v52 = vpop.permute.xlu1 %2030 }
 0x48b   :  { %4169 = vst [vmem:[%s7105_s2 + $0xe0] sm:$0xff] %v3966_v40  ;;  %2201 = vrot.lane.b32.xlu0 %v6408_v4, %s5016_s3  ;;  %v2104_v43 = vsel %vm2096_vm12, %v2029_v56, %v2031_v52  ;;  %v3582_v52 = vld [vmem:[#allocation4 + $0xe0] sm:$0xff] }
 0x48c   :  { %2203 = vrot.lane.b32.xlu1 %v6410_v62, %s5016_s3 }
 0x48d   :  { %v2174_v12 = vpop.permute.xlu0 %2173 }
 0x48e   :  { %v2176_v58 = vpop.permute.xlu1 %2175 }
 0x48f   :  { %v2249_v9 = vsel %vm2241_vm13, %v2174_v12, %v2176_v58  ;;  %3698 = vrot.lane.b32.xlu0 %v3578_v61, %s5015_s30 }
 0x490   :  { %v2297_v19 = vsel %vm1949_vm14, %v2104_v43, %v2249_v9  ;;  %3700 = vrot.lane.b32.xlu1 %v3579_v18, %s5015_s30 }
 0x491   :  { %v2321_v4 = vadd.f32 %v2297_v19, %v6112_v22  ;;  %v3671_v27 = vpop.permute.xlu0 %3670 }
 0x492   :  { %v3673_v0 = vpop.permute.xlu1 %3672 }
 0x493   :  { %2345 = vst [vmem:[%s7105_s2 + $0x38] sm:$0xff] %v2321_v4  ;;  %3842 = vrot.lane.b32.xlu0 %v3578_v61, %s5016_s3  ;;  %v3751_v8 = vsel %vm2096_vm12, %v3671_v27, %v3673_v0 }
 0x494   :  { %3844 = vrot.lane.b32.xlu1 %v3579_v18, %s5016_s3 }
 0x495   :  { %v3815_v62 = vpop.permute.xlu0 %3814 }
 0x496   :  { %v3817_v17 = vpop.permute.xlu1 %3816 }
 0x497   :  { %v3895_v54 = vsel %vm2241_vm13, %v3815_v62, %v3817_v17  ;;  %2060 = vrot.lane.b32.xlu0 %v6416_v48, %s5015_s30 }
 0x498   :  { %v3943_v24 = vsel %vm1949_vm14, %v3751_v8, %v3895_v54  ;;  %2062 = vrot.lane.b32.xlu1 %v6418_v53, %s5015_s30  ;;  %v3584_v54 = vld [vmem:[#allocation4 + $0xf0] sm:$0xff] }
 0x499   :  { %v3967_v22 = vadd.f32 %v3943_v24, %v6118_v1  ;;  %v2033_v46 = vpop.permute.xlu0 %2032  ;;  %v3581_v1 = vld [vmem:[#allocation4 + $0xd8] sm:$0xff] }
 0x49a   :  { %v2035_v32 = vpop.permute.xlu1 %2034 }
 0x49b   :  { %4170 = vst [vmem:[%s7105_s2 + $0xe8] sm:$0xff] %v3967_v22  ;;  %2205 = vrot.lane.b32.xlu0 %v6416_v48, %s5016_s3  ;;  %v2105_v45 = vsel %vm2096_vm12, %v2033_v46, %v2035_v32 }
 0x49c   :  { %2207 = vrot.lane.b32.xlu1 %v6418_v53, %s5016_s3 }
 0x49d   :  { %v2178_v28 = vpop.permute.xlu0 %2177 }
 0x49e   :  { %v2180_v36 = vpop.permute.xlu1 %2179 }
 0x49f   :  { %v2250_v38 = vsel %vm2241_vm13, %v2178_v28, %v2180_v36  ;;  %3702 = vrot.lane.b32.xlu0 %v3580_v21, %s5015_s30 }
 0x4a0   :  { %v2298_v25 = vsel %vm1949_vm14, %v2105_v45, %v2250_v38  ;;  %3704 = vrot.lane.b32.xlu1 %v3581_v1, %s5015_s30 }
 0x4a1   :  { %v2322_v48 = vadd.f32 %v2298_v25, %v6121_v50  ;;  %v3675_v39 = vpop.permute.xlu0 %3674 }
 0x4a2   :  { %v3677_v63 = vpop.permute.xlu1 %3676 }
 0x4a3   :  { %2346 = vst [vmem:[%s7105_s2 + $0x40] sm:$0xff] %v2322_v48  ;;  %3846 = vrot.lane.b32.xlu0 %v3580_v21, %s5016_s3  ;;  %v3752_v33 = vsel %vm2096_vm12, %v3675_v39, %v3677_v63  ;;  %v3586_v63 = vld [vmem:[#allocation4 + $0x100] sm:$0xff] }
 0x4a4   :  { %3848 = vrot.lane.b32.xlu1 %v3581_v1, %s5016_s3 }
 0x4a5   :  { %v3819_v53 = vpop.permute.xlu0 %3818 }
 0x4a6   :  { %v3821_v5 = vpop.permute.xlu1 %3820 }
 0x4a7   :  { %v3896_v42 = vsel %vm2241_vm13, %v3819_v53, %v3821_v5  ;;  %2064 = vrot.lane.b32.xlu0 %v6430_v47, %s5015_s30 }
 0x4a8   :  { %v3944_v7 = vsel %vm1949_vm14, %v3752_v33, %v3896_v42  ;;  %2066 = vrot.lane.b32.xlu1 %v6432_v15, %s5015_s30 }
 0x4a9   :  { %v3968_v50 = vadd.f32 %v3944_v7, %v6127_v51  ;;  %v2037_v13 = vpop.permute.xlu0 %2036  ;;  %v3583_v51 = vld [vmem:[#allocation4 + $0xe8] sm:$0xff] }
 0x4aa   :  { %v2039_v20 = vpop.permute.xlu1 %2038 }
 0x4ab   :  { %4171 = vst [vmem:[%s7105_s2 + $0xf0] sm:$0xff] %v3968_v50  ;;  %2209 = vrot.lane.b32.xlu0 %v6430_v47, %s5016_s3  ;;  %v2106_v40 = vsel %vm2096_vm12, %v2037_v13, %v2039_v20 }
 0x4ac   :  { %2211 = vrot.lane.b32.xlu1 %v6432_v15, %s5016_s3 }
 0x4ad   :  { %v2182_v14 = vpop.permute.xlu0 %2181 }
 0x4ae   :  { %v2184_v35 = vpop.permute.xlu1 %2183 }
 0x4af   :  { %v2251_v56 = vsel %vm2241_vm13, %v2182_v14, %v2184_v35  ;;  %3706 = vrot.lane.b32.xlu0 %v3582_v52, %s5015_s30 }
 0x4b0   :  { %v2299_v12 = vsel %vm1949_vm14, %v2106_v40, %v2251_v56  ;;  %3708 = vrot.lane.b32.xlu1 %v3583_v51, %s5015_s30 }
 0x4b1   :  { %v2323_v47 = vadd.f32 %v2299_v12, %v6124_v6  ;;  %v3679_v58 = vpop.permute.xlu0 %3678 }
 0x4b2   :  { %v3681_v43 = vpop.permute.xlu1 %3680 }
 0x4b3   :  { %2347 = vst [vmem:[%s7105_s2 + $0x48] sm:$0xff] %v2323_v47  ;;  %3850 = vrot.lane.b32.xlu0 %v3582_v52, %s5016_s3  ;;  %v3753_v61 = vsel %vm2096_vm12, %v3679_v58, %v3681_v43 }
 0x4b4   :  { %3852 = vrot.lane.b32.xlu1 %v3583_v51, %s5016_s3  ;;  %v3588_v51 = vld [vmem:[#allocation4 + $0x110] sm:$0xff] }
 0x4b5   :  { %v3823_v15 = vpop.permute.xlu0 %3822 }
 0x4b6   :  { %v3825_v9 = vpop.permute.xlu1 %3824 }
 0x4b7   :  { %v3897_v18 = vsel %vm2241_vm13, %v3823_v15, %v3825_v9  ;;  %2068 = vrot.lane.b32.xlu0 %v6440_v37, %s5015_s30 }
 0x4b8   :  { %v3945_v19 = vsel %vm1949_vm14, %v3753_v61, %v3897_v18  ;;  %2070 = vrot.lane.b32.xlu1 %v6442_v49, %s5015_s30 }
 0x4b9   :  { %v3969_v6 = vadd.f32 %v3945_v19, %v6130_v31  ;;  %v2041_v4 = vpop.permute.xlu0 %2040  ;;  %v3585_v31 = vld [vmem:[#allocation4 + $0xf8] sm:$0xff] }
 0x4ba   :  { %v2043_v27 = vpop.permute.xlu1 %2042 }
 0x4bb   :  { %4172 = vst [vmem:[%s7105_s2 + $0xf8] sm:$0xff] %v3969_v6  ;;  %2213 = vrot.lane.b32.xlu0 %v6440_v37, %s5016_s3  ;;  %v2107_v17 = vsel %vm2096_vm12, %v2041_v4, %v2043_v27 }
 0x4bc   :  { %2215 = vrot.lane.b32.xlu1 %v6442_v49, %s5016_s3 }
 0x4bd   :  { %v2186_v0 = vpop.permute.xlu0 %2185 }
 0x4be   :  { %v2188_v62 = vpop.permute.xlu1 %2187 }
 0x4bf   :  { %v2252_v8 = vsel %vm2241_vm13, %v2186_v0, %v2188_v62  ;;  %3710 = vrot.lane.b32.xlu0 %v3584_v54, %s5015_s30  ;;  %v3590_v62 = vld [vmem:[#allocation4 + $0x120] sm:$0xff] }
 0x4c0   :  { %v2300_v24 = vsel %vm1949_vm14, %v2107_v17, %v2252_v8  ;;  %3712 = vrot.lane.b32.xlu1 %v3585_v31, %s5015_s30 }
 0x4c1   :  { %v2324_v37 = vadd.f32 %v2300_v24, %v6133_v10  ;;  %v3683_v22 = vpop.permute.xlu0 %3682 }
 0x4c2   :  { %v3685_v46 = vpop.permute.xlu1 %3684 }
 0x4c3   :  { %2348 = vst [vmem:[%s7105_s2 + $0x50] sm:$0xff] %v2324_v37  ;;  %3854 = vrot.lane.b32.xlu0 %v3584_v54, %s5016_s3  ;;  %v3754_v28 = vsel %vm2096_vm12, %v3683_v22, %v3685_v46 }
 0x4c4   :  { %3856 = vrot.lane.b32.xlu1 %v3585_v31, %s5016_s3 }
 0x4c5   :  { %v3827_v49 = vpop.permute.xlu0 %3826 }
 0x4c6   :  { %v3829_v32 = vpop.permute.xlu1 %3828 }
 0x4c7   :  { %v3898_v36 = vsel %vm2241_vm13, %v3827_v49, %v3829_v32  ;;  %2072 = vrot.lane.b32.xlu0 %v6452_v30, %s5015_s30 }
 0x4c8   :  { %v3946_v45 = vsel %vm1949_vm14, %v3754_v28, %v3898_v36  ;;  %2074 = vrot.lane.b32.xlu1 %v6454_v2, %s5015_s30 }
 0x4c9   :  { %v3970_v10 = vadd.f32 %v3946_v45, %v6139_v3  ;;  %v2045_v38 = vpop.permute.xlu0 %2044  ;;  %v3587_v3 = vld [vmem:[#allocation4 + $0x108] sm:$0xff] }
 0x4ca   :  { %v2047_v21 = vpop.permute.xlu1 %2046 }
 0x4cb   :  { %4173 = vst [vmem:[%s7105_s2 + $0x100] sm:$0xff] %v3970_v10  ;;  %2217 = vrot.lane.b32.xlu0 %v6452_v30, %s5016_s3  ;;  %v2108_v48 = vsel %vm2096_vm12, %v2045_v38, %v2047_v21  ;;  %v3592_v38 = vld [vmem:[#allocation4 + $0x130] sm:$0xff]  ;;  %v3593_v21 = vld [vmem:[#allocation4 + $0x138] sm:$0xff] }
 0x4cc   :  { %2219 = vrot.lane.b32.xlu1 %v6454_v2, %s5016_s3 }
 0x4cd   :  { %v2190_v1 = vpop.permute.xlu0 %2189 }
 0x4ce   :  { %v2192_v25 = vpop.permute.xlu1 %2191 }
 0x4cf   :  { %v2253_v39 = vsel %vm2241_vm13, %v2190_v1, %v2192_v25  ;;  %3714 = vrot.lane.b32.xlu0 %v3586_v63, %s5015_s30  ;;  %v7154_v25 = vld [vmem:[#allocation6_spill] sm:$0xff] }
 0x4d0   :  { %v2301_v53 = vsel %vm1949_vm14, %v2108_v48, %v2253_v39  ;;  %3716 = vrot.lane.b32.xlu1 %v3587_v3, %s5015_s30 }
 0x4d1   :  { %v2325_v30 = vadd.f32 %v2301_v53, %v6136_v57  ;;  %v3687_v5 = vpop.permute.xlu0 %3686 }
 0x4d2   :  { %v3689_v33 = vpop.permute.xlu1 %3688 }
 0x4d3   :  { %2349 = vst [vmem:[%s7105_s2 + $0x58] sm:$0xff] %v2325_v30  ;;  %3858 = vrot.lane.b32.xlu0 %v3586_v63, %s5016_s3  ;;  %v3755_v7 = vsel %vm2096_vm12, %v3687_v5, %v3689_v33  ;;  %v7155_v5 = vld [vmem:[#allocation28_spill] sm:$0xff]  ;;  %v7156_v33 = vld [vmem:[#allocation29_spill] sm:$0xff] }
 0x4d4   :  { %3860 = vrot.lane.b32.xlu1 %v3587_v3, %s5016_s3 }
 0x4d5   :  { %v3831_v2 = vpop.permute.xlu0 %3830 }
 0x4d6   :  { %v3833_v42 = vpop.permute.xlu1 %3832 }
 0x4d7   :  { %v3899_v50 = vsel %vm2241_vm13, %v3831_v2, %v3833_v42  ;;  %2076 = vrot.lane.b32.xlu0 %v6460_v41, %s5015_s30  ;;  %v7157_v2 = vld [vmem:[#allocation8_spill] sm:$0xff] }
 0x4d8   :  { %v3947_v13 = vsel %vm1949_vm14, %v3755_v7, %v3899_v50  ;;  %2078 = vrot.lane.b32.xlu1 %v6462_v26, %s5015_s30 }
 0x4d9   :  { %v3971_v57 = vadd.f32 %v3947_v13, %v6142_v59  ;;  %v2049_v20 = vpop.permute.xlu0 %2048  ;;  %v3589_v59 = vld [vmem:[#allocation4 + $0x118] sm:$0xff] }
 0x4da   :  { %v2051_v14 = vpop.permute.xlu1 %2050 }
 0x4db   :  { %4174 = vst [vmem:[%s7105_s2 + $0x108] sm:$0xff] %v3971_v57  ;;  %2221 = vrot.lane.b32.xlu0 %v6460_v41, %s5016_s3  ;;  %v2109_v56 = vsel %vm2096_vm12, %v2049_v20, %v2051_v14 }
 0x4dc   :  { %2223 = vrot.lane.b32.xlu1 %v6462_v26, %s5016_s3 }
 0x4dd   :  { %v2194_v35 = vpop.permute.xlu0 %2193 }
 0x4de   :  { %v2196_v40 = vpop.permute.xlu1 %2195 }
 0x4df   :  { %v2254_v52 = vsel %vm2241_vm13, %v2194_v35, %v2196_v40  ;;  %3718 = vrot.lane.b32.xlu0 %v3588_v51, %s5015_s30  ;;  %v3594_v35 = vld [vmem:[#allocation4 + $0x140] sm:$0xff]  ;;  %v3595_v40 = vld [vmem:[#allocation4 + $0x148] sm:$0xff] }
 0x4e0   :  { %v2302_v12 = vsel %vm1949_vm14, %v2109_v56, %v2254_v52  ;;  %3720 = vrot.lane.b32.xlu1 %v3589_v59, %s5015_s30  ;;  %v7158_v52 = vld [vmem:[#allocation7_spill] sm:$0xff] }
 0x4e1   :  { %v2326_v41 = vadd.f32 %v2302_v12, %v6145_v60  ;;  %v3691_v47 = vpop.permute.xlu0 %3690 }
 0x4e2   :  { %v3693_v58 = vpop.permute.xlu1 %3692 }
 0x4e3   :  { %2350 = vst [vmem:[%s7105_s2 + $0x60] sm:$0xff] %v2326_v41  ;;  %3862 = vrot.lane.b32.xlu0 %v3588_v51, %s5016_s3  ;;  %v3756_v15 = vsel %vm2096_vm12, %v3691_v47, %v3693_v58 }
 0x4e4   :  { %3864 = vrot.lane.b32.xlu1 %v3589_v59, %s5016_s3 }
 0x4e5   :  { %v3835_v26 = vpop.permute.xlu0 %3834 }
 0x4e6   :  { %v3837_v43 = vpop.permute.xlu1 %3836 }
 0x4e7   :  { %v3900_v9 = vsel %vm2241_vm13, %v3835_v26, %v3837_v43  ;;  %2080 = vrot.lane.b32.xlu0 %v6474_v16, %s5015_s30 }
 0x4e8   :  { %v3948_v61 = vsel %vm1949_vm14, %v3756_v15, %v3900_v9  ;;  %2082 = vrot.lane.b32.xlu1 %v6476_v34, %s5015_s30  ;;  %v7159_v15 = vld [vmem:[#allocation30_spill] sm:$0xff]  ;;  %v7160_v9 = vld [vmem:[#allocation31_spill] sm:$0xff] }
 0x4e9   :  { %v3972_v60 = vadd.f32 %v3948_v61, %v6151_v11  ;;  %v2053_v18 = vpop.permute.xlu0 %2052  ;;  %v3591_v11 = vld [vmem:[#allocation4 + $0x128] sm:$0xff]  ;;  %v7161_v61 = vld [vmem:[#allocation9_spill] sm:$0xff] }
 0x4ea   :  { %v2055_v19 = vpop.permute.xlu1 %2054 }
 0x4eb   :  { %4175 = vst [vmem:[%s7105_s2 + $0x110] sm:$0xff] %v3972_v60  ;;  %2225 = vrot.lane.b32.xlu0 %v6474_v16, %s5016_s3  ;;  %v2110_v27 = vsel %vm2096_vm12, %v2053_v18, %v2055_v19 }
 0x4ec   :  { %2227 = vrot.lane.b32.xlu1 %v6476_v34, %s5016_s3 }
 0x4ed   :  { %v2198_v6 = vpop.permute.xlu0 %2197 }
 0x4ee   :  { %v2200_v4 = vpop.permute.xlu1 %2199 }
 0x4ef   :  { %v2255_v0 = vsel %vm2241_vm13, %v2198_v6, %v2200_v4  ;;  %3722 = vrot.lane.b32.xlu0 %v3590_v62, %s5015_s30 }
 0x4f0   :  { %v2303_v17 = vsel %vm1949_vm14, %v2110_v27, %v2255_v0  ;;  %3724 = vrot.lane.b32.xlu1 %v3591_v11, %s5015_s30 }
 0x4f1   :  { %v2327_v16 = vadd.f32 %v2303_v17, %v6148_v55  ;;  %v3695_v8 = vpop.permute.xlu0 %3694  ;;  %v7153_v55 = vld [vmem:[#allocation5_spill] sm:$0xff] }
 0x4f2   :  { %v3697_v54 = vpop.permute.xlu1 %3696 }
 0x4f3   :  { %2351 = vst [vmem:[%s7105_s2 + $0x68] sm:$0xff] %v2327_v16  ;;  %3866 = vrot.lane.b32.xlu0 %v3590_v62, %s5016_s3  ;;  %v3757_v24 = vsel %vm2096_vm12, %v3695_v8, %v3697_v54  ;;  %v3596_v62 = vld [vmem:[#allocation4 + $0x150] sm:$0xff]  ;;  %v7162_v16 = vld [vmem:[#allocation10_spill] sm:$0xff] }
 0x4f4   :  { %3868 = vrot.lane.b32.xlu1 %v3591_v11, %s5016_s3  ;;  %v3597_v11 = vld [vmem:[#allocation4 + $0x158] sm:$0xff] }
 0x4f5   :  { %v3839_v34 = vpop.permute.xlu0 %3838 }
 0x4f6   :  { %v3841_v31 = vpop.permute.xlu1 %3840 }
 0x4f7   :  { %v3901_v37 = vsel %vm2241_vm13, %v3839_v34, %v3841_v31  ;;  %2084 = vrot.lane.b32.xlu0 %v6484_v44, %s5015_s30 }
 0x4f8   :  { %v3949_v22 = vsel %vm1949_vm14, %v3757_v24, %v3901_v37  ;;  %2086 = vrot.lane.b32.xlu1 %v6486_v29, %s5015_s30 }
 0x4f9   :  { %v3973_v46 = vadd.f32 %v3949_v22, %v7153_v55  ;;  %v2057_v49 = vpop.permute.xlu0 %2056  ;;  %v3598_v55 = vld [vmem:[#allocation4 + $0x160] sm:$0xff] }
 0x4fa   :  { %v2059_v32 = vpop.permute.xlu1 %2058 }
 0x4fb   :  { %4176 = vst [vmem:[%s7105_s2 + $0x118] sm:$0xff] %v3973_v46  ;;  %2229 = vrot.lane.b32.xlu0 %v6484_v44, %s5016_s3  ;;  %v2111_v45 = vsel %vm2096_vm12, %v2057_v49, %v2059_v32  ;;  %v3599_v46 = vld [vmem:[#allocation4 + $0x168] sm:$0xff]  ;;  %v7163_v32 = vld [vmem:[#allocation12_spill] sm:$0xff] }
 0x4fc   :  { %2231 = vrot.lane.b32.xlu1 %v6486_v29, %s5016_s3 }
 0x4fd   :  { %v2202_v28 = vpop.permute.xlu0 %2201 }
 0x4fe   :  { %v2204_v36 = vpop.permute.xlu1 %2203 }
 0x4ff   :  { %v2256_v10 = vsel %vm2241_vm13, %v2202_v28, %v2204_v36  ;;  %3726 = vrot.lane.b32.xlu0 %v3592_v38, %s5015_s30 }
 0x500   :  { %v2304_v1 = vsel %vm1949_vm14, %v2111_v45, %v2256_v10  ;;  %3728 = vrot.lane.b32.xlu1 %v3593_v21, %s5015_s30 }
 0x501   :  { %v2328_v44 = vadd.f32 %v2304_v1, %v7154_v25  ;;  %v3699_v48 = vpop.permute.xlu0 %3698  ;;  %v3600_v25 = vld [vmem:[#allocation4 + $0x170] sm:$0xff] }
 0x502   :  { %v3701_v39 = vpop.permute.xlu1 %3700 }
 0x503   :  { %2352 = vst [vmem:[%s7105_s2 + $0x70] sm:$0xff] %v2328_v44  ;;  %3870 = vrot.lane.b32.xlu0 %v3592_v38, %s5016_s3  ;;  %v3758_v3 = vsel %vm2096_vm12, %v3699_v48, %v3701_v39  ;;  %v3601_v44 = vld [vmem:[#allocation4 + $0x178] sm:$0xff]  ;;  %v7164_v39 = vld [vmem:[#allocation11_spill] sm:$0xff] }
 0x504   :  { %3872 = vrot.lane.b32.xlu1 %v3593_v21, %s5016_s3 }
 0x505   :  { %v3843_v29 = vpop.permute.xlu0 %3842 }
 0x506   :  { %v3845_v63 = vpop.permute.xlu1 %3844 }
 0x507   :  { %v3902_v53 = vsel %vm2241_vm13, %v3843_v29, %v3845_v63  ;;  %2088 = vrot.lane.b32.xlu0 %v7155_v5, %s5015_s30 }
 0x508   :  { %v3950_v30 = vsel %vm1949_vm14, %v3758_v3, %v3902_v53  ;;  %2090 = vrot.lane.b32.xlu1 %v7156_v33, %s5015_s30 }
 0x509   :  { %v3974_v42 = vadd.f32 %v3950_v30, %v7157_v2  ;;  %v2061_v7 = vpop.permute.xlu0 %2060 }
 0x50a   :  { %v2063_v50 = vpop.permute.xlu1 %2062 }
 0x50b   :  { %4177 = vst [vmem:[%s7105_s2 + $0x120] sm:$0xff] %v3974_v42  ;;  %2233 = vrot.lane.b32.xlu0 %v7155_v5, %s5016_s3  ;;  %v2112_v20 = vsel %vm2096_vm12, %v2061_v7, %v2063_v50  ;;  %v7165_v42 = vld [vmem:[#allocation13_spill] sm:$0xff] }
 0x50c   :  { %2235 = vrot.lane.b32.xlu1 %v7156_v33, %s5016_s3 }
 0x50d   :  { %v2206_v13 = vpop.permute.xlu0 %2205 }
 0x50e   :  { %v2208_v57 = vpop.permute.xlu1 %2207 }
 0x50f   :  { %v2257_v14 = vsel %vm2241_vm13, %v2206_v13, %v2208_v57  ;;  %3730 = vrot.lane.b32.xlu0 %v3594_v35, %s5015_s30 }
 0x510   :  { %v2305_v56 = vsel %vm1949_vm14, %v2112_v20, %v2257_v14  ;;  %3732 = vrot.lane.b32.xlu1 %v3595_v40, %s5015_s30 }
 0x511   :  { %v2329_v51 = vadd.f32 %v2305_v56, %v7158_v52  ;;  %v3703_v59 = vpop.permute.xlu0 %3702  ;;  %v7166_v56 = vld [vmem:[#allocation14_spill] sm:$0xff] }
 0x512   :  { %v3705_v12 = vpop.permute.xlu1 %3704 }
 0x513   :  { %2353 = vst [vmem:[%s7105_s2 + $0x78] sm:$0xff] %v2329_v51  ;;  %3874 = vrot.lane.b32.xlu0 %v3594_v35, %s5016_s3  ;;  %v3759_v58 = vsel %vm2096_vm12, %v3703_v59, %v3705_v12 }
 0x514   :  { %3876 = vrot.lane.b32.xlu1 %v3595_v40, %s5016_s3 }
 0x515   :  { %v3847_v41 = vpop.permute.xlu0 %3846 }
 0x516   :  { %v3849_v47 = vpop.permute.xlu1 %3848 }
 0x517   :  { %v3903_v26 = vsel %vm2241_vm13, %v3847_v41, %v3849_v47  ;;  %2092 = vrot.lane.b32.xlu0 %v7159_v15, %s5015_s30 }
 0x518   :  { %v3951_v43 = vsel %vm1949_vm14, %v3759_v58, %v3903_v26  ;;  %2094 = vrot.lane.b32.xlu1 %v7160_v9, %s5015_s30 }
 0x519   :  { %v3975_v60 = vadd.f32 %v3951_v43, %v7161_v61  ;;  %v2065_v18 = vpop.permute.xlu0 %2064  ;;  %v7167_v43 = vld [vmem:[#allocation16_spill] sm:$0xff] }
 0x51a   :  { %v2067_v19 = vpop.permute.xlu1 %2066 }
 0x51b   :  { %4178 = vst [vmem:[%s7105_s2 + $0x128] sm:$0xff] %v3975_v60  ;;  %2237 = vrot.lane.b32.xlu0 %v7159_v15, %s5016_s3  ;;  %v2113_v27 = vsel %vm2096_vm12, %v2065_v18, %v2067_v19 }
 0x51c   :  { %2239 = vrot.lane.b32.xlu1 %v7160_v9, %s5016_s3 }
 0x51d   :  { %v2210_v6 = vpop.permute.xlu0 %2209 }
 0x51e   :  { %v2212_v4 = vpop.permute.xlu1 %2211 }
 0x51f   :  { %v2258_v0 = vsel %vm2241_vm13, %v2210_v6, %v2212_v4  ;;  %3734 = vrot.lane.b32.xlu0 %v3596_v62, %s5015_s30 }
 0x520   :  { %v2306_v17 = vsel %vm1949_vm14, %v2113_v27, %v2258_v0  ;;  %3736 = vrot.lane.b32.xlu1 %v3597_v11, %s5015_s30  ;;  %v7168_v27 = vld [vmem:[#allocation15_spill] sm:$0xff] }
 0x521   :  { %v2330_v8 = vadd.f32 %v2306_v17, %v7162_v16  ;;  %v3707_v54 = vpop.permute.xlu0 %3706 }
 0x522   :  { %v3709_v34 = vpop.permute.xlu1 %3708 }
 0x523   :  { %2354 = vst [vmem:[%s7105_s2 + $0x80] sm:$0xff] %v2330_v8  ;;  %3878 = vrot.lane.b32.xlu0 %v3596_v62, %s5016_s3  ;;  %v3760_v37 = vsel %vm2096_vm12, %v3707_v54, %v3709_v34 }
 0x524   :  { %3880 = vrot.lane.b32.xlu1 %v3597_v11, %s5016_s3 }
 0x525   :  { %v3851_v31 = vpop.permute.xlu0 %3850 }
 0x526   :  { %v3853_v24 = vpop.permute.xlu1 %3852 }
 0x527   :  { %v3904_v22 = vsel %vm2241_vm13, %v3851_v31, %v3853_v24  ;;  %3738 = vrot.lane.b32.xlu0 %v3598_v55, %s5015_s30  ;;  %v7169_v31 = vld [vmem:[#allocation17_spill] sm:$0xff] }
 0x528   :  { %v3952_v49 = vsel %vm1949_vm14, %v3760_v37, %v3904_v22  ;;  %3740 = vrot.lane.b32.xlu1 %v3599_v46, %s5015_s30 }
 0x529   :  { %v3976_v28 = vadd.f32 %v3952_v49, %v7163_v32  ;;  %v2069_v36 = vpop.permute.xlu0 %2068 }
 0x52a   :  { %v2071_v45 = vpop.permute.xlu1 %2070 }
 0x52b   :  { %4179 = vst [vmem:[%s7105_s2 + $0x130] sm:$0xff] %v3976_v28  ;;  %3882 = vrot.lane.b32.xlu0 %v3598_v55, %s5016_s3  ;;  %v2114_v21 = vsel %vm2096_vm12, %v2069_v36, %v2071_v45  ;;  %v7170_v36 = vld [vmem:[#allocation18_spill] sm:$0xff] }
 0x52c   :  { %3884 = vrot.lane.b32.xlu1 %v3599_v46, %s5016_s3 }
 0x52d   :  { %v2214_v10 = vpop.permute.xlu0 %2213 }
 0x52e   :  { %v2216_v38 = vpop.permute.xlu1 %2215 }
 0x52f   :  { %v2259_v1 = vsel %vm2241_vm13, %v2214_v10, %v2216_v38  ;;  %3742 = vrot.lane.b32.xlu0 %v3600_v25, %s5015_s30 }
 0x530   :  { %v2307_v48 = vsel %vm1949_vm14, %v2114_v21, %v2259_v1  ;;  %3744 = vrot.lane.b32.xlu1 %v3601_v44, %s5015_s30 }
 0x531   :  { %v2331_v29 = vadd.f32 %v2307_v48, %v7164_v39  ;;  %v3711_v63 = vpop.permute.xlu0 %3710  ;;  %v7171_v39 = vld [vmem:[#allocation20_spill] sm:$0xff] }
 0x532   :  { %v3713_v3 = vpop.permute.xlu1 %3712 }
 0x533   :  { %2355 = vst [vmem:[%s7105_s2 + $0x88] sm:$0xff] %v2331_v29  ;;  %3886 = vrot.lane.b32.xlu0 %v3600_v25, %s5016_s3  ;;  %v3761_v5 = vsel %vm2096_vm12, %v3711_v63, %v3713_v3 }
 0x534   :  { %3888 = vrot.lane.b32.xlu1 %v3601_v44, %s5016_s3 }
 0x535   :  { %v3855_v53 = vpop.permute.xlu0 %3854 }
 0x536   :  { %v3857_v30 = vpop.permute.xlu1 %3856 }
 0x537   :  { %v3905_v33 = vsel %vm2241_vm13, %v3855_v53, %v3857_v30 }
 0x538   :  { %v3953_v2 = vsel %vm1949_vm14, %v3761_v5, %v3905_v33 }
 0x539   :  { %v3977_v7 = vadd.f32 %v3953_v2, %v7165_v42  ;;  %v2073_v50 = vpop.permute.xlu0 %2072  ;;  %v7172_v42 = vld [vmem:[#allocation19_spill] sm:$0xff] }
 0x53a   :  { %v2075_v13 = vpop.permute.xlu1 %2074 }
 0x53b   :  { %4180 = vst [vmem:[%s7105_s2 + $0x138] sm:$0xff] %v3977_v7  ;;  %v2115_v14 = vsel %vm2096_vm12, %v2073_v50, %v2075_v13 }
 0x53d   :  { %v2218_v57 = vpop.permute.xlu0 %2217 }
 0x53e   :  { %v2220_v20 = vpop.permute.xlu1 %2219 }
 0x53f   :  { %v2260_v35 = vsel %vm2241_vm13, %v2218_v57, %v2220_v20 }
 0x540   :  { %v2308_v40 = vsel %vm1949_vm14, %v2115_v14, %v2260_v35 }
 0x541   :  { %v2332_v52 = vadd.f32 %v2308_v40, %v7166_v56  ;;  %v3715_v51 = vpop.permute.xlu0 %3714  ;;  %v7173_v56 = vld [vmem:[#allocation21_spill] sm:$0xff] }
 0x542   :  { %v3717_v59 = vpop.permute.xlu1 %3716 }
 0x543   :  { %2356 = vst [vmem:[%s7105_s2 + $0x90] sm:$0xff] %v2332_v52  ;;  %v3762_v47 = vsel %vm2096_vm12, %v3715_v51, %v3717_v59 }
 0x545   :  { %v3859_v12 = vpop.permute.xlu0 %3858 }
 0x546   :  { %v3861_v41 = vpop.permute.xlu1 %3860 }
 0x547   :  { %v3906_v58 = vsel %vm2241_vm13, %v3859_v12, %v3861_v41 }
 0x548   :  { %v3954_v26 = vsel %vm1949_vm14, %v3762_v47, %v3906_v58 }
 0x549   :  { %v3978_v15 = vadd.f32 %v3954_v26, %v7167_v43  ;;  %v2077_v9 = vpop.permute.xlu0 %2076  ;;  %v7174_v43 = vld [vmem:[#allocation22_spill] sm:$0xff] }
 0x54a   :  { %v2079_v61 = vpop.permute.xlu1 %2078 }
 0x54b   :  { %4181 = vst [vmem:[%s7105_s2 + $0x140] sm:$0xff] %v3978_v15  ;;  %v2116_v19 = vsel %vm2096_vm12, %v2077_v9, %v2079_v61 }
 0x54d   :  { %v2222_v60 = vpop.permute.xlu0 %2221 }
 0x54e   :  { %v2224_v18 = vpop.permute.xlu1 %2223 }
 0x54f   :  { %v2261_v6 = vsel %vm2241_vm13, %v2222_v60, %v2224_v18 }
 0x550   :  { %v2309_v4 = vsel %vm1949_vm14, %v2116_v19, %v2261_v6 }
 0x551   :  { %v2333_v0 = vadd.f32 %v2309_v4, %v7168_v27  ;;  %v3719_v62 = vpop.permute.xlu0 %3718  ;;  %v7175_v27 = vld [vmem:[#allocation24_spill] sm:$0xff] }
 0x552   :  { %v3721_v11 = vpop.permute.xlu1 %3720 }
 0x553   :  { %2357 = vst [vmem:[%s7105_s2 + $0x98] sm:$0xff] %v2333_v0  ;;  %v3763_v8 = vsel %vm2096_vm12, %v3719_v62, %v3721_v11 }
 0x555   :  { %v3863_v17 = vpop.permute.xlu0 %3862 }
 0x556   :  { %v3865_v16 = vpop.permute.xlu1 %3864 }
 0x557   :  { %v3907_v54 = vsel %vm2241_vm13, %v3863_v17, %v3865_v16 }
 0x558   :  { %v3955_v34 = vsel %vm1949_vm14, %v3763_v8, %v3907_v54 }
 0x559   :  { %v3979_v24 = vadd.f32 %v3955_v34, %v7169_v31  ;;  %v2081_v37 = vpop.permute.xlu0 %2080  ;;  %v7176_v31 = vld [vmem:[#allocation23_spill] sm:$0xff] }
 0x55a   :  { %v2083_v22 = vpop.permute.xlu1 %2082 }
 0x55b   :  { %4182 = vst [vmem:[%s7105_s2 + $0x148] sm:$0xff] %v3979_v24  ;;  %v2117_v49 = vsel %vm2096_vm12, %v2081_v37, %v2083_v22 }
 0x55d   :  { %v2226_v55 = vpop.permute.xlu0 %2225 }
 0x55e   :  { %v2228_v46 = vpop.permute.xlu1 %2227 }
 0x55f   :  { %v2262_v32 = vsel %vm2241_vm13, %v2226_v55, %v2228_v46 }
 0x560   :  { %v2310_v28 = vsel %vm1949_vm14, %v2117_v49, %v2262_v32 }
 0x561   :  { %v2334_v45 = vadd.f32 %v2310_v28, %v7170_v36  ;;  %v3723_v10 = vpop.permute.xlu0 %3722  ;;  %v7177_v36 = vld [vmem:[#allocation25_spill] sm:$0xff] }
 0x562   :  { %v3725_v38 = vpop.permute.xlu1 %3724 }
 0x563   :  { %2358 = vst [vmem:[%s7105_s2 + $0xa0] sm:$0xff] %v2334_v45  ;;  %v3764_v25 = vsel %vm2096_vm12, %v3723_v10, %v3725_v38 }
 0x565   :  { %v3867_v21 = vpop.permute.xlu0 %3866 }
 0x566   :  { %v3869_v1 = vpop.permute.xlu1 %3868 }
 0x567   :  { %v3908_v44 = vsel %vm2241_vm13, %v3867_v21, %v3869_v1 }
 0x568   :  { %v3956_v48 = vsel %vm1949_vm14, %v3764_v25, %v3908_v44 }
 0x569   :  { %v3980_v29 = vadd.f32 %v3956_v48, %v7171_v39  ;;  %v2085_v63 = vpop.permute.xlu0 %2084  ;;  %v7178_v39 = vld [vmem:[#allocation26_spill] sm:$0xff] }
 0x56a   :  { %v2087_v3 = vpop.permute.xlu1 %2086 }
 0x56b   :  { %4183 = vst [vmem:[%s7105_s2 + $0x150] sm:$0xff] %v3980_v29  ;;  %v2118_v5 = vsel %vm2096_vm12, %v2085_v63, %v2087_v3 }
 0x56d   :  { %v2230_v53 = vpop.permute.xlu0 %2229 }
 0x56e   :  { %v2232_v30 = vpop.permute.xlu1 %2231 }
 0x56f   :  { %v2263_v33 = vsel %vm2241_vm13, %v2230_v53, %v2232_v30 }
 0x570   :  { %v2311_v2 = vsel %vm1949_vm14, %v2118_v5, %v2263_v33 }
 0x571   :  { %v2335_v7 = vadd.f32 %v2311_v2, %v7172_v42  ;;  %v3727_v50 = vpop.permute.xlu0 %3726  ;;  %v7179_v42 = vld [vmem:[#allocation27_spill] sm:$0xff] }
 0x572   :  { %v3729_v13 = vpop.permute.xlu1 %3728 }
 0x573   :  { %2359 = vst [vmem:[%s7105_s2 + $0xa8] sm:$0xff] %v2335_v7  ;;  %v3765_v14 = vsel %vm2096_vm12, %v3727_v50, %v3729_v13 }
 0x575   :  { %v3871_v57 = vpop.permute.xlu0 %3870 }
 0x576   :  { %v3873_v20 = vpop.permute.xlu1 %3872 }
 0x577   :  { %v3909_v35 = vsel %vm2241_vm13, %v3871_v57, %v3873_v20 }
 0x578   :  { %v3957_v40 = vsel %vm1949_vm14, %v3765_v14, %v3909_v35 }
 0x579   :  { %v3981_v52 = vadd.f32 %v3957_v40, %v7173_v56  ;;  %v2089_v51 = vpop.permute.xlu0 %2088 }
 0x57a   :  { %v2091_v59 = vpop.permute.xlu1 %2090 }
 0x57b   :  { %4184 = vst [vmem:[%s7105_s2 + $0x158] sm:$0xff] %v3981_v52  ;;  %v2119_v47 = vsel %vm2096_vm12, %v2089_v51, %v2091_v59 }
 0x57d   :  { %v2234_v12 = vpop.permute.xlu0 %2233 }
 0x57e   :  { %v2236_v41 = vpop.permute.xlu1 %2235 }
 0x57f   :  { %v2264_v58 = vsel %vm2241_vm13, %v2234_v12, %v2236_v41 }
 0x580   :  { %v2312_v26 = vsel %vm1949_vm14, %v2119_v47, %v2264_v58 }
 0x581   :  { %v2336_v15 = vadd.f32 %v2312_v26, %v7174_v43  ;;  %v3731_v9 = vpop.permute.xlu0 %3730 }
 0x582   :  { %v3733_v61 = vpop.permute.xlu1 %3732 }
 0x583   :  { %2360 = vst [vmem:[%s7105_s2 + $0xb0] sm:$0xff] %v2336_v15  ;;  %v3766_v19 = vsel %vm2096_vm12, %v3731_v9, %v3733_v61 }
 0x585   :  { %v3875_v60 = vpop.permute.xlu0 %3874 }
 0x586   :  { %v3877_v18 = vpop.permute.xlu1 %3876 }
 0x587   :  { %v3910_v6 = vsel %vm2241_vm13, %v3875_v60, %v3877_v18 }
 0x588   :  { %v3958_v4 = vsel %vm1949_vm14, %v3766_v19, %v3910_v6 }
 0x589   :  { %v3982_v0 = vadd.f32 %v3958_v4, %v7175_v27  ;;  %v2093_v62 = vpop.permute.xlu0 %2092 }
 0x58a   :  { %v2095_v11 = vpop.permute.xlu1 %2094 }
 0x58b   :  { %4185 = vst [vmem:[%s7105_s2 + $0x160] sm:$0xff] %v3982_v0  ;;  %v2120_v8 = vsel %vm2096_vm12, %v2093_v62, %v2095_v11 }
 0x58d   :  { %v2238_v17 = vpop.permute.xlu0 %2237 }
 0x58e   :  { %v2240_v16 = vpop.permute.xlu1 %2239 }
 0x58f   :  { %v2265_v54 = vsel %vm2241_vm13, %v2238_v17, %v2240_v16 }
 0x590   :  { %v2313_v34 = vsel %vm1949_vm14, %v2120_v8, %v2265_v54 }
 0x591   :  { %v2337_v24 = vadd.f32 %v2313_v34, %v7176_v31  ;;  %v3735_v37 = vpop.permute.xlu0 %3734 }
 0x592   :  { %v3737_v22 = vpop.permute.xlu1 %3736 }
 0x593   :  { %2361 = vst [vmem:[%s7105_s2 + $0xb8] sm:$0xff] %v2337_v24  ;;  %v3767_v49 = vsel %vm2096_vm12, %v3735_v37, %v3737_v22 }
 0x595   :  { %v3879_v55 = vpop.permute.xlu0 %3878 }
 0x596   :  { %v3881_v46 = vpop.permute.xlu1 %3880 }
 0x597   :  { %v3911_v32 = vsel %vm2241_vm13, %v3879_v55, %v3881_v46 }
 0x598   :  { %v3959_v28 = vsel %vm1949_vm14, %v3767_v49, %v3911_v32 }
 0x599   :  { %v3983_v45 = vadd.f32 %v3959_v28, %v7177_v36  ;;  %v3739_v10 = vpop.permute.xlu0 %3738 }
 0x59a   :  { %v3741_v38 = vpop.permute.xlu1 %3740 }
 0x59b   :  { %4186 = vst [vmem:[%s7105_s2 + $0x168] sm:$0xff] %v3983_v45  ;;  %v3768_v25 = vsel %vm2096_vm12, %v3739_v10, %v3741_v38 }
 0x59d   :  { %v3883_v21 = vpop.permute.xlu0 %3882 }
 0x59e   :  { %v3885_v1 = vpop.permute.xlu1 %3884 }
 0x59f   :  { %v3912_v44 = vsel %vm2241_vm13, %v3883_v21, %v3885_v1 }
 0x5a0   :  { %v3960_v48 = vsel %vm1949_vm14, %v3768_v25, %v3912_v44 }
 0x5a1   :  { %v3984_v29 = vadd.f32 %v3960_v48, %v7178_v39  ;;  %v3743_v63 = vpop.permute.xlu0 %3742 }
 0x5a2   :  { %v3745_v3 = vpop.permute.xlu1 %3744 }
 0x5a3   :  { %4187 = vst [vmem:[%s7105_s2 + $0x170] sm:$0xff] %v3984_v29  ;;  %v3769_v5 = vsel %vm2096_vm12, %v3743_v63, %v3745_v3 }
 0x5a5   :  { %v3887_v53 = vpop.permute.xlu0 %3886 }
 0x5a6   :  { %v3889_v30 = vpop.permute.xlu1 %3888 }
 0x5a7   :  { %v3913_v33 = vsel %vm2241_vm13, %v3887_v53, %v3889_v30 }
 0x5a8   :  { %v3961_v2 = vsel %vm1949_vm14, %v3769_v5, %v3913_v33 }
 0x5a9   :  { %v3985_v7 = vadd.f32 %v3961_v2, %v7179_v42 }
 0x5ab   :  { %4188 = vst [vmem:[%s7105_s2 + $0x178] sm:$0xff] %v3985_v7 }

</bundles_post_ra>
